<compile_context>
chip_gen: v7x
topology: tpu7x:2x2x1
jax: 0.10.0
libtpu: 0.0.40
codegen_flags: <defaults>
</compile_context>

<pallas_src>
import functools

import jax
import jax.numpy as jnp
from jax import lax
from jax.experimental import pallas as pl
from jax.experimental.pallas import tpu as pltpu

NEG_SLOPE = 0.01          # nn.LeakyReLU(negative_slope=0.01)
BN_EPS = 1e-5             # nn.BatchNorm3d default eps
LANE = 128                # TPU lane width
VMEM_LIMIT = 48 * 1024 * 1024   # explicit scoped-VMEM budget (fits v7x 64MiB)


def _ru(x, m):
    return (x + m - 1) // m * m


def _pad_last(a, target):
    pad = target - a.shape[-1]
    if pad == 0:
        return a
    return jnp.pad(a, [(0, 0)] * (a.ndim - 1) + [(0, pad)])


# ----------------------------------------------------------------------------
# Pallas kernels
# ----------------------------------------------------------------------------
def _gemm_kernel(*refs, relu, mode):
    """K-tiled GEMM with fused BN (+ residual / fused identity-downsample) epilogue.

    mode: "plain"      -> x, w, s, b,                       o, acc
          "residual"   -> x, w, s, b, r,                    o, acc
          "downsample" -> x, w, s, b, ident, wd, sd, bd,    o, acc
    """
    if mode == "downsample":
        x_ref, w_ref, s_ref, b_ref, i_ref, wd_ref, sd_ref, bd_ref, o_ref, acc_ref = refs
    elif mode == "residual":
        x_ref, w_ref, s_ref, b_ref, r_ref, o_ref, acc_ref = refs
    else:
        x_ref, w_ref, s_ref, b_ref, o_ref, acc_ref = refs

    k = pl.program_id(1)

    @pl.when(k == 0)
    def _():
        acc_ref[...] = jnp.zeros_like(acc_ref)

    acc_ref[...] += jnp.dot(x_ref[...], w_ref[...],
                            preferred_element_type=jnp.float32)

    @pl.when(k == pl.num_programs(1) - 1)
    def _():
        y = acc_ref[...] * s_ref[...] + b_ref[...]
        if mode == "downsample":
            idn = jnp.dot(i_ref[...], wd_ref[...],
                          preferred_element_type=jnp.float32)
            y = y + idn * sd_ref[...] + bd_ref[...]
        elif mode == "residual":
            y = y + r_ref[...].astype(jnp.float32)
        if relu:
            y = jnp.where(y > 0, y, NEG_SLOPE * y)
        o_ref[...] = y.astype(o_ref.dtype)


def _conv3x3_kernel(x0_ref, x1_ref, x2_ref, w_ref, s_ref, b_ref, o_ref, acc_ref,
                    *, flat_starts, length):
    """One (n, d_out) slab of the 3x3x3 conv: 27 shifted GEMMs + BN + LeakyReLU.

    x?_refs are the three depth slices (kd = 0,1,2) of the padded activation in
    flattened-HW layout; each tap (kh, kw) is a contiguous slice of that slab.
    """
    acc_ref[...] = jnp.zeros_like(acc_ref)
    xs = (x0_ref, x1_ref, x2_ref)
    for kd in range(3):
        for t in range(9):                       # t = kh * 3 + kw
            xin = xs[kd][0, 0, pl.ds(flat_starts[t], length), :]
            acc_ref[...] += jnp.dot(xin, w_ref[kd, t],
                                    preferred_element_type=jnp.float32)
    y = acc_ref[...] * s_ref[...] + b_ref[...]
    y = jnp.where(y > 0, y, NEG_SLOPE * y)
    o_ref[0, 0] = y.astype(o_ref.dtype)


# ----------------------------------------------------------------------------
# Kernel wrappers
# ----------------------------------------------------------------------------
def gemm_bn_act(x2d, w2d, scale, bias, *, relu=True, residual=None,
                ident=None, wd=None, scale_d=None, bias_d=None,
                out_dtype=jnp.bfloat16, tile_m=512, k_tile=512):
    """Fused (X @ W) * scale + bias [+ residual | + BN_d(ident @ Wd)] [-> leaky_relu].

    Channel dim C must already be padded to a multiple of 128 by the caller.
    """
    M, K = x2d.shape
    Kw, C = w2d.shape
    assert K == Kw and C % LANE == 0

    x2d = x2d.astype(jnp.bfloat16)
    w2d = w2d.astype(jnp.bfloat16)
    scale = scale.reshape(1, C).astype(jnp.float32)
    bias = bias.reshape(1, C).astype(jnp.float32)

    # --- M tiling (pad, never fall back to a single giant tile) -------------
    tm = min(tile_m, _ru(M, 8))
    Mp = _ru(M, tm)
    pad_m = Mp - M
    if pad_m:
        x2d = jnp.pad(x2d, ((0, pad_m), (0, 0)))

    # --- K tiling (bounds VMEM independently of K) ---------------------------
    if K > 2 * k_tile:
        tk = k_tile
        Kp = _ru(K, tk)
        if Kp != K:
            x2d = jnp.pad(x2d, ((0, 0), (0, Kp - K)))
            w2d = jnp.pad(w2d, ((0, Kp - K), (0, 0)))
    else:
        tk, Kp = K, K
    nk = Kp // tk

    in_specs = [
        pl.BlockSpec((tm, tk), lambda i, k: (i, k)),   # X tile
        pl.BlockSpec((tk, C), lambda i, k: (k, 0)),    # W K-slab
        pl.BlockSpec((1, C), lambda i, k: (0, 0)),     # bn scale
        pl.BlockSpec((1, C), lambda i, k: (0, 0)),     # bn bias
    ]
    args = [x2d, w2d, scale, bias]
    flops = 2 * Mp * Kp * C
    out_bytes = Mp * C * (4 if out_dtype == jnp.float32 else 2)
    bytes_acc = x2d.size * 2 + w2d.size * 2 + out_bytes + 2 * C * 4

    if ident is not None:
        mode = "downsample"
        ident = ident.astype(jnp.bfloat16)
        if pad_m:
            ident = jnp.pad(ident, ((0, pad_m), (0, 0)))
        Kd = ident.shape[1]
        wd = wd.astype(jnp.bfloat16)
        in_specs += [
            pl.BlockSpec((tm, Kd), lambda i, k: (i, 0)),
            pl.BlockSpec((Kd, C), lambda i, k: (0, 0)),
            pl.BlockSpec((1, C), lambda i, k: (0, 0)),
            pl.BlockSpec((1, C), lambda i, k: (0, 0)),
        ]
        args += [ident, wd,
                 scale_d.reshape(1, C).astype(jnp.float32),
                 bias_d.reshape(1, C).astype(jnp.float32)]
        flops += 2 * Mp * Kd * C
        bytes_acc += ident.size * 2 + wd.size * 2 + 2 * C * 4
    elif residual is not None:
        mode = "residual"
        residual = residual.astype(jnp.bfloat16)
        if pad_m:
            residual = jnp.pad(residual, ((0, pad_m), (0, 0)))
        in_specs.append(pl.BlockSpec((tm, C), lambda i, k: (i, 0)))
        args.append(residual)
        bytes_acc += residual.size * 2
    else:
        mode = "plain"

    out = pl.pallas_call(
        functools.partial(_gemm_kernel, relu=relu, mode=mode),
        out_shape=jax.ShapeDtypeStruct((Mp, C), out_dtype),
        grid_spec=pltpu.PrefetchScalarGridSpec(
            num_scalar_prefetch=0,
            grid=(Mp // tm, nk),
            in_specs=in_specs,
            out_specs=pl.BlockSpec((tm, C), lambda i, k: (i, 0)),
            scratch_shapes=[pltpu.VMEM((tm, C), jnp.float32)],
        ),
        compiler_params=pltpu.CompilerParams(
            dimension_semantics=("parallel", "arbitrary"),
            vmem_limit_bytes=VMEM_LIMIT),
        cost_estimate=pl.CostEstimate(flops=int(flops), transcendentals=0,
                                      bytes_accessed=int(bytes_acc)),
    )(*args)

    if pad_m:
        out = out[:M]
    return out


def conv3x3x3_bn_act(h, w1, scale, bias, stride):
    """3x3x3 conv (stride, pad=1) + BN + LeakyReLU without im2col.

    h: (N, D, H, W, Cp) bf16, channels already lane-padded.
    w1: (3, 3, 3, Cp, Cp).  Returns ((N*Do*Ho*Wo, Cp) bf16, (Do, Ho, Wo)).
    """
    N, D, H, W, Cp = h.shape
    s = stride
    Dp, Hp, Wp = D + 2, H + 2, W + 2
    Do, Ho, Wo = [(t - 1) // s + 1 for t in (D, H, W)]

    xp = jnp.pad(h, ((0, 0), (1, 1), (1, 1), (1, 1), (0, 0)))

    # Parity-group permutation so every strided tap window becomes contiguous.
    def parity(P):
        counts = [len(range(r, P, s)) for r in range(s)]
        offs = [sum(counts[:r]) for r in range(s)]
        perm = [q for r in range(s) for q in range(r, P, s)]
        starts = [offs[k % s] + k // s for k in range(3)]
        return perm, starts

    perm_h, st_h = parity(Hp)
    perm_w, st_w = parity(Wp)
    if s > 1:
        xp = jnp.take(xp, jnp.asarray(perm_h, dtype=jnp.int32), axis=2)
        xp = jnp.take(xp, jnp.asarray(perm_w, dtype=jnp.int32), axis=3)

    L = Ho * Wp                                   # output rows per depth slab
    flat_starts = tuple(st_h[kh] * Wp + st_w[kw]
                        for kh in range(3) for kw in range(3))
    total = max(Hp * Wp, max(flat_starts) + L)    # keep every tap slice in-bounds

    xf = xp.reshape(N, Dp, Hp * Wp, Cp).astype(jnp.bfloat16)
    if total > Hp * Wp:
        xf = jnp.pad(xf, ((0, 0), (0, 0), (0, total - Hp * Wp), (0, 0)))

    w_taps = w1.reshape(3, 9, Cp, Cp).astype(jnp.bfloat16)
    s2d = scale.reshape(1, Cp).astype(jnp.float32)
    b2d = bias.reshape(1, Cp).astype(jnp.float32)

    def x_map(o):
        return lambda n, d, o=o: (n, d * s + o, 0, 0)

    kernel = functools.partial(_conv3x3_kernel,
                               flat_starts=flat_starts, length=L)
    out = pl.pallas_call(
        kernel,
        out_shape=jax.ShapeDtypeStruct((N, Do, L, Cp), jnp.bfloat16),
        grid_spec=pltpu.PrefetchScalarGridSpec(
            num_scalar_prefetch=0,
            grid=(N, Do),
            in_specs=[
                pl.BlockSpec((1, 1, total, Cp), x_map(0)),
                pl.BlockSpec((1, 1, total, Cp), x_map(1)),
                pl.BlockSpec((1, 1, total, Cp), x_map(2)),
                pl.BlockSpec((3, 9, Cp, Cp), lambda n, d: (0, 0, 0, 0)),
                pl.BlockSpec((1, Cp), lambda n, d: (0, 0)),
                pl.BlockSpec((1, Cp), lambda n, d: (0, 0)),
            ],
            out_specs=pl.BlockSpec((1, 1, L, Cp), lambda n, d: (n, d, 0, 0)),
            scratch_shapes=[pltpu.VMEM((L, Cp), jnp.float32)],
        ),
        compiler_params=pltpu.CompilerParams(
            dimension_semantics=("parallel", "parallel"),
            vmem_limit_bytes=VMEM_LIMIT),
        cost_estimate=pl.CostEstimate(
            flops=int(2 * 27 * N * Do * L * Cp * Cp),
            transcendentals=0,
            bytes_accessed=int(3 * xf.size * 2 + w_taps.size * 2
                               + N * Do * L * Cp * 2)),
    )(xf, xf, xf, w_taps, s2d, b2d)

    # strip junk columns (j >= Wo) introduced by the flattened-HW trick
    out = out.reshape(N, Do, Ho, Wp, Cp)[:, :, :, :Wo, :]
    return out.reshape(N * Do * Ho * Wo, Cp), (Do, Ho, Wo)


# ----------------------------------------------------------------------------
# Glue (plain JAX): BN folding, channel padding, block orchestration
# ----------------------------------------------------------------------------
def fold_bn(gamma, beta, mean, var, cpad):
    scale = gamma / jnp.sqrt(var + BN_EPS)
    bias = beta - mean * scale
    return _pad_last(scale, cpad), _pad_last(bias, cpad)


def block_forward(x, p, stride):
    """Bottleneck Block forward. x: (N, D, H, W, Cin) channels-last, f32."""
    N, D, H, W, Cin = x.shape
    Cmid = p["w0"].shape[-1]
    Cout = 4 * Cmid
    Cmid_p = _ru(Cmid, LANE)
    Cout_p = _ru(Cout, LANE)

    xb = x.astype(jnp.bfloat16)

    # conv0 (1x1x1) + bn0 + leaky_relu
    s0, b0 = fold_bn(p["bn0_g"], p["bn0_b"], p["bn0_m"], p["bn0_v"], Cmid_p)
    w0 = _pad_last(p["w0"], Cmid_p)
    h = gemm_bn_act(xb.reshape(N * D * H * W, Cin), w0, s0, b0, relu=True)
    h = h.reshape(N, D, H, W, Cmid_p)

    # conv1 (3x3x3, stride, pad=1) + bn1 + leaky_relu   (no im2col)
    s1, b1 = fold_bn(p["bn1_g"], p["bn1_b"], p["bn1_m"], p["bn1_v"], Cmid_p)
    w1 = jnp.pad(p["w1"], ((0, 0), (0, 0), (0, 0),
                           (0, Cmid_p - Cmid), (0, Cmid_p - Cmid)))
    h, (Do, Ho, Wo) = conv3x3x3_bn_act(h, w1, s1, b1, stride)

    # conv2 (1x1x1) + bn2 + identity + leaky_relu  (all fused in one kernel)
    s2, b2 = fold_bn(p["bn2_g"], p["bn2_b"], p["bn2_m"], p["bn2_v"], Cout_p)
    w2 = jnp.pad(p["w2"], ((0, Cmid_p - Cmid), (0, Cout_p - Cout)))

    if stride != 1 or Cin != Cout:
        sd, bd = fold_bn(p["bnd_g"], p["bnd_b"], p["bnd_m"], p["bnd_v"], Cout_p)
        wd = _pad_last(p["wd"], Cout_p)
        ident_in = xb[:, ::stride, ::stride, ::stride, :].reshape(
            N * Do * Ho * Wo, Cin)
        out = gemm_bn_act(h, w2, s2, b2, relu=True,
                          ident=ident_in, wd=wd, scale_d=sd, bias_d=bd,
                          out_dtype=jnp.float32)
    else:
        resid = _pad_last(xb.reshape(N * D * H * W, Cin), Cout_p)
        out = gemm_bn_act(h, w2, s2, b2, relu=True, residual=resid,
                          out_dtype=jnp.float32)

    return out[:, :Cout].reshape(N, Do, Ho, Wo, Cout)


block_forward_jit = jax.jit(block_forward, static_argnums=2)


# ----------------------------------------------------------------------------
# Pure-JAX reference (lax convs, f32) for correctness check
# ----------------------------------------------------------------------------
def ref_block(x, p, stride):
    dn = ("NDHWC", "DHWIO", "NDHWC")
    bn = lambda y, g, b, m, v: (y - m) * (g / jnp.sqrt(v + BN_EPS)) + b
    lrelu = lambda y: jnp.where(y > 0, y, NEG_SLOPE * y)
    Cin = x.shape[-1]
    Cmid = p["w0"].shape[-1]
    Cout = 4 * Cmid

    h = lax.conv_general_dilated(x, p["w0"].reshape(1, 1, 1, Cin, Cmid),
                                 (1, 1, 1), "VALID", dimension_numbers=dn)
    h = lrelu(bn(h, p["bn0_g"], p["bn0_b"], p["bn0_m"], p["bn0_v"]))
    h = lax.conv_general_dilated(h, p["w1"], (stride,) * 3,
                                 [(1, 1)] * 3, dimension_numbers=dn)
    h = lrelu(bn(h, p["bn1_g"], p["bn1_b"], p["bn1_m"], p["bn1_v"]))
    h = lax.conv_general_dilated(h, p["w2"].reshape(1, 1, 1, Cmid, Cout),
                                 (1, 1, 1), "VALID", dimension_numbers=dn)
    h = bn(h, p["bn2_g"], p["bn2_b"], p["bn2_m"], p["bn2_v"])
    if stride != 1 or Cin != Cout:
        idn = lax.conv_general_dilated(x, p["wd"].reshape(1, 1, 1, Cin, Cout),
                                       (stride,) * 3, "VALID",
                                       dimension_numbers=dn)
        idn = bn(idn, p["bnd_g"], p["bnd_b"], p["bnd_m"], p["bnd_v"])
    else:
        idn = x
    return lrelu(h + idn)


# ----------------------------------------------------------------------------
def make_params(key, in_channels, out_channels):
    C, Cout = out_channels, 4 * out_channels
    ks = jax.random.split(key, 24)
    k = iter(ks)
    n = lambda shape, s=0.1: s * jax.random.normal(next(k), shape, jnp.float32)
    u = lambda shape: jax.random.uniform(next(k), shape, jnp.float32, 0.5, 1.5)
    p = {
        "w0": n((in_channels, C)),            # conv0: 1x1x1
        "w1": n((3, 3, 3, C, C)),             # conv1: 3x3x3 (DHWIO)
        "w2": n((C, Cout)),                   # conv2: 1x1x1
        "wd": n((in_channels, Cout)),         # identity downsample 1x1x1
    }
    for name, ch in (("bn0", C), ("bn1", C), ("bn2", Cout), ("bnd", Cout)):
        p[f"{name}_g"] = u((ch,))
        p[f"{name}_b"] = n((ch,))
        p[f"{name}_m"] = n((ch,))
        p[f"{name}_v"] = u((ch,))
    return p


if __name__ == "__main__":
    key = jax.random.PRNGKey(0)
    k1, k2, k3, k4 = jax.random.split(key, 4)

    N, D, H, W = 2, 8, 8, 8

    # Test 1: stride-2 block with identity downsample (fused into conv2 kernel)
    in_ch, out_ch, stride = 8, 4, 2
    x1 = jax.random.normal(k1, (N, D, H, W, in_ch), jnp.float32)
    p1 = make_params(k2, in_ch, out_ch)
    out1 = jax.block_until_ready(block_forward_jit(x1, p1, stride))
    ref1 = ref_block(x1, p1, stride)
    assert out1.shape == ref1.shape == (N, D // 2, H // 2, W // 2, 4 * out_ch)
    assert jnp.allclose(out1, ref1, atol=5e-2, rtol=5e-2), (
        float(jnp.max(jnp.abs(out1 - ref1))))

    # Test 2: stride-1 block with pass-through identity (Cin == 4*Cmid)
    in_ch2, out_ch2 = 16, 4
    x2 = jax.random.normal(k3, (N, D, H, W, in_ch2), jnp.float32)
    p2 = make_params(k4, in_ch2, out_ch2)
    out2 = jax.block_until_ready(block_forward_jit(x2, p2, 1))
    ref2 = ref_block(x2, p2, 1)
    assert out2.shape == ref2.shape == (N, D, H, W, 4 * out_ch2)
    assert jnp.allclose(out2, ref2, atol=5e-2, rtol=5e-2), (
        float(jnp.max(jnp.abs(out2 - ref2))))

    print("KERNEL_OK")
</pallas_src>

<mosaic_0001>
module attributes {stable_mosaic.version = 11 : i64} {
  func.func @_gemm_kernel(%arg0: i32, %arg1: i32, %arg2: memref<512x8xbf16, #tpu.memory_space<vmem>>, %arg3: memref<8x128xbf16, #tpu.memory_space<vmem>>, %arg4: memref<1x128xf32, #tpu.memory_space<vmem>>, %arg5: memref<1x128xf32, #tpu.memory_space<vmem>>, %arg6: memref<512x128xbf16, #tpu.memory_space<vmem>>, %arg7: memref<512x128xf32, #tpu.memory_space<vmem>>) attributes {dimension_semantics = [#tpu.dimension_semantics<parallel>, #tpu.dimension_semantics<arbitrary>], iteration_bounds = array<i64: 2, 1>, scalar_prefetch = 0 : i64, scratch_operands = 1 : i64, tpu.core_type = #tpu.core_type<tc>, window_params = [{transform_indices = @transform_0, window_bounds = array<i64: 512, 8>}, {transform_indices = @transform_1, window_bounds = array<i64: 8, 128>}, {pipeline_mode = #tpu.pipeline_mode<synchronous>, transform_indices = @transform_2, window_bounds = array<i64: 1, 128>}, {pipeline_mode = #tpu.pipeline_mode<synchronous>, transform_indices = @transform_3, window_bounds = array<i64: 1, 128>}, {transform_indices = @transform_4, window_bounds = array<i64: 512, 128>}]} {
    %c0_i32 = arith.constant 0 : i32
    %0 = arith.cmpi eq, %arg1, %c0_i32 : i32
    %1 = arith.extui %0 : i1 to i32
    %c0_i32_0 = arith.constant 0 : i32
    %2 = arith.cmpi ne, %1, %c0_i32_0 : i32
    scf.if %2 {
      %cst_10 = arith.constant 0.000000e+00 : f32
      %12 = vector.broadcast %cst_10 : f32 to vector<512x128xf32>
      %c0_11 = arith.constant 0 : index
      %c0_12 = arith.constant 0 : index
      %13 = vector.load %arg7[%c0_11, %c0_12] : memref<512x128xf32, #tpu.memory_space<vmem>>, vector<512x128xf32>
      tpu.vector_store %arg7[%c0_11, %c0_12], %12 {strides = array<i32>} : memref<512x128xf32, #tpu.memory_space<vmem>>, vector<512x128xf32>,
    } else {
    }
    %c0 = arith.constant 0 : index
    %c0_1 = arith.constant 0 : index
    %3 = vector.load %arg7[%c0, %c0_1] : memref<512x128xf32, #tpu.memory_space<vmem>>, vector<512x128xf32>
    %c0_2 = arith.constant 0 : index
    %c0_3 = arith.constant 0 : index
    %4 = vector.load %arg2[%c0_2, %c0_3] : memref<512x8xbf16, #tpu.memory_space<vmem>>, vector<512x8xbf16>
    %c0_4 = arith.constant 0 : index
    %c0_5 = arith.constant 0 : index
    %5 = vector.load %arg3[%c0_4, %c0_5] : memref<8x128xbf16, #tpu.memory_space<vmem>>, vector<8x128xbf16>
    %cst = arith.constant dense<0.000000e+00> : vector<512x128xf32>
    %6 = tpu.matmul %4, %5, %cst {dimension_numbers = #tpu.dot_dimension_numbers<[1], [0], [0], [1], [0, 0, 1, 1], [], []>} : vector<512x8xbf16>, vector<8x128xbf16>, vector<512x128xf32> -> vector<512x128xf32>
    %7 = arith.addf %3, %6 : vector<512x128xf32>
    %c0_6 = arith.constant 0 : index
    %c0_7 = arith.constant 0 : index
    %8 = vector.load %arg7[%c0_6, %c0_7] : memref<512x128xf32, #tpu.memory_space<vmem>>, vector<512x128xf32>
    tpu.vector_store %arg7[%c0_6, %c0_7], %7 {strides = array<i32>} : memref<512x128xf32, #tpu.memory_space<vmem>>, vector<512x128xf32>,
    %c0_i32_8 = arith.constant 0 : i32
    %9 = arith.cmpi eq, %arg1, %c0_i32_8 : i32
    %10 = arith.extui %9 : i1 to i32
    %c0_i32_9 = arith.constant 0 : i32
    %11 = arith.cmpi ne, %10, %c0_i32_9 : i32
    scf.if %11 {
      %c0_10 = arith.constant 0 : index
      %c0_11 = arith.constant 0 : index
      %12 = vector.load %arg7[%c0_10, %c0_11] : memref<512x128xf32, #tpu.memory_space<vmem>>, vector<512x128xf32>
      %c0_12 = arith.constant 0 : index
      %c0_13 = arith.constant 0 : index
      %13 = vector.load %arg4[%c0_12, %c0_13] : memref<1x128xf32, #tpu.memory_space<vmem>>, vector<1x128xf32>
      %14 = vector.broadcast %13 : vector<1x128xf32> to vector<512x128xf32>
      %15 = arith.mulf %12, %14 : vector<512x128xf32>
      %c0_14 = arith.constant 0 : index
      %c0_15 = arith.constant 0 : index
      %16 = vector.load %arg5[%c0_14, %c0_15] : memref<1x128xf32, #tpu.memory_space<vmem>>, vector<1x128xf32>
      %17 = vector.broadcast %16 : vector<1x128xf32> to vector<512x128xf32>
      %18 = arith.addf %15, %17 : vector<512x128xf32>
      %cst_16 = arith.constant 0.000000e+00 : f32
      %19 = vector.broadcast %cst_16 : f32 to vector<512x128xf32>
      %20 = arith.cmpf ogt, %18, %19 : vector<512x128xf32>
      %cst_17 = arith.constant 0.00999999977 : f32
      %21 = vector.broadcast %cst_17 : f32 to vector<512x128xf32>
      %22 = arith.mulf %21, %18 : vector<512x128xf32>
      %23 = arith.select %20, %18, %22 : vector<512x128xi1>, vector<512x128xf32>
      %24 = arith.truncf %23 : vector<512x128xf32> to vector<512x128xbf16>
      %c0_18 = arith.constant 0 : index
      %c0_19 = arith.constant 0 : index
      %25 = vector.load %arg6[%c0_18, %c0_19] : memref<512x128xbf16, #tpu.memory_space<vmem>>, vector<512x128xbf16>
      tpu.vector_store %arg6[%c0_18, %c0_19], %24 {strides = array<i32>} : memref<512x128xbf16, #tpu.memory_space<vmem>>, vector<512x128xbf16>,
    } else {
    }
    return
  }
  func.func @transform_0(%arg0: i32, %arg1: i32) -> (i32, i32) {
    %c0_i32 = arith.constant 0 : i32
    return %arg0, %arg1 : i32, i32
  }
  func.func @transform_1(%arg0: i32, %arg1: i32) -> (i32, i32) {
    %c0_i32 = arith.constant 0 : i32
    %c0_i32_0 = arith.constant 0 : i32
    return %arg1, %c0_i32 : i32, i32
  }
  func.func @transform_2(%arg0: i32, %arg1: i32) -> (i32, i32) {
    %c0_i32 = arith.constant 0 : i32
    %c0_i32_0 = arith.constant 0 : i32
    %c0_i32_1 = arith.constant 0 : i32
    return %c0_i32, %c0_i32_0 : i32, i32
  }
  func.func @transform_3(%arg0: i32, %arg1: i32) -> (i32, i32) {
    %c0_i32 = arith.constant 0 : i32
    %c0_i32_0 = arith.constant 0 : i32
    %c0_i32_1 = arith.constant 0 : i32
    return %c0_i32, %c0_i32_0 : i32, i32
  }
  func.func @transform_4(%arg0: i32, %arg1: i32) -> (i32, i32) {
    %c0_i32 = arith.constant 0 : i32
    %c0_i32_0 = arith.constant 0 : i32
    return %arg0, %c0_i32 : i32, i32
  }
}

module attributes {stable_mosaic.version = 11 : i64} {
  func.func @_conv3x3_kernel(%arg0: i32, %arg1: i32, %arg2: memref<1x1x100x128xbf16, #tpu.memory_space<vmem>>, %arg3: memref<1x1x100x128xbf16, #tpu.memory_space<vmem>>, %arg4: memref<1x1x100x128xbf16, #tpu.memory_space<vmem>>, %arg5: memref<3x9x128x128xbf16, #tpu.memory_space<vmem>>, %arg6: memref<1x128xf32, #tpu.memory_space<vmem>>, %arg7: memref<1x128xf32, #tpu.memory_space<vmem>>, %arg8: memref<1x1x40x128xbf16, #tpu.memory_space<vmem>>, %arg9: memref<40x128xf32, #tpu.memory_space<vmem>>) attributes {dimension_semantics = [#tpu.dimension_semantics<parallel>, #tpu.dimension_semantics<parallel>], iteration_bounds = array<i64: 2, 4>, scalar_prefetch = 0 : i64, scratch_operands = 1 : i64, tpu.core_type = #tpu.core_type<tc>, window_params = [{transform_indices = @transform_0, window_bounds = array<i64: 1, 1, 100, 128>}, {transform_indices = @transform_1, window_bounds = array<i64: 1, 1, 100, 128>}, {transform_indices = @transform_2, window_bounds = array<i64: 1, 1, 100, 128>}, {pipeline_mode = #tpu.pipeline_mode<synchronous>, transform_indices = @transform_3, window_bounds = array<i64: 3, 9, 128, 128>}, {pipeline_mode = #tpu.pipeline_mode<synchronous>, transform_indices = @transform_4, window_bounds = array<i64: 1, 128>}, {pipeline_mode = #tpu.pipeline_mode<synchronous>, transform_indices = @transform_5, window_bounds = array<i64: 1, 128>}, {transform_indices = @transform_6, window_bounds = array<i64: 1, 1, 40, 128>}]} {
    %cst = arith.constant 0.000000e+00 : f32
    %0 = vector.broadcast %cst : f32 to vector<40x128xf32>
    %c0 = arith.constant 0 : index
    %c0_0 = arith.constant 0 : index
    %1 = vector.load %arg9[%c0, %c0_0] : memref<40x128xf32, #tpu.memory_space<vmem>>, vector<40x128xf32>
    tpu.vector_store %arg9[%c0, %c0_0], %0 {strides = array<i32>} : memref<40x128xf32, #tpu.memory_space<vmem>>, vector<40x128xf32>,
    %c0_1 = arith.constant 0 : index
    %c0_2 = arith.constant 0 : index
    %c0_3 = arith.constant 0 : index
    %c0_4 = arith.constant 0 : index
    %2 = vector.load %arg2[%c0_1, %c0_2, %c0_3, %c0_4] : memref<1x1x100x128xbf16, #tpu.memory_space<vmem>>, vector<1x1x40x128xbf16>
    %3 = vector.shape_cast %2 : vector<1x1x40x128xbf16> to vector<40x128xbf16>
    %c0_5 = arith.constant 0 : index
    %c0_6 = arith.constant 0 : index
    %4 = vector.load %arg9[%c0_5, %c0_6] : memref<40x128xf32, #tpu.memory_space<vmem>>, vector<40x128xf32>
    %c0_7 = arith.constant 0 : index
    %c0_8 = arith.constant 0 : index
    %c0_9 = arith.constant 0 : index
    %c0_10 = arith.constant 0 : index
    %5 = vector.load %arg5[%c0_7, %c0_8, %c0_9, %c0_10] : memref<3x9x128x128xbf16, #tpu.memory_space<vmem>>, vector<1x1x128x128xbf16>
    %6 = vector.shape_cast %5 : vector<1x1x128x128xbf16> to vector<128x128xbf16>
    %cst_11 = arith.constant dense<0.000000e+00> : vector<40x128xf32>
    %7 = tpu.matmul %3, %6, %cst_11 {dimension_numbers = #tpu.dot_dimension_numbers<[1], [0], [0], [1], [0, 0, 1, 1], [], []>} : vector<40x128xbf16>, vector<128x128xbf16>, vector<40x128xf32> -> vector<40x128xf32>
    %8 = arith.addf %4, %7 : vector<40x128xf32>
    %c0_12 = arith.constant 0 : index
    %c0_13 = arith.constant 0 : index
    %9 = vector.load %arg9[%c0_12, %c0_13] : memref<40x128xf32, #tpu.memory_space<vmem>>, vector<40x128xf32>
    tpu.vector_store %arg9[%c0_12, %c0_13], %8 {strides = array<i32>} : memref<40x128xf32, #tpu.memory_space<vmem>>, vector<40x128xf32>,
    %c0_14 = arith.constant 0 : index
    %c0_15 = arith.constant 0 : index
    %c5 = arith.constant 5 : index
    %c0_16 = arith.constant 0 : index
    %10 = vector.load %arg2[%c0_14, %c0_15, %c5, %c0_16] : memref<1x1x100x128xbf16, #tpu.memory_space<vmem>>, vector<1x1x40x128xbf16>
    %11 = vector.shape_cast %10 : vector<1x1x40x128xbf16> to vector<40x128xbf16>
    %c0_17 = arith.constant 0 : index
    %c0_18 = arith.constant 0 : index
    %12 = vector.load %arg9[%c0_17, %c0_18] : memref<40x128xf32, #tpu.memory_space<vmem>>, vector<40x128xf32>
    %c0_19 = arith.constant 0 : index
    %c1 = arith.constant 1 : index
    %c0_20 = arith.constant 0 : index
    %c0_21 = arith.constant 0 : index
    %13 = vector.load %arg5[%c0_19, %c1, %c0_20, %c0_21] : memref<3x9x128x128xbf16, #tpu.memory_space<vmem>>, vector<1x1x128x128xbf16>
    %14 = vector.shape_cast %13 : vector<1x1x128x128xbf16> to vector<128x128xbf16>
    %cst_22 = arith.constant dense<0.000000e+00> : vector<40x128xf32>
    %15 = tpu.matmul %11, %14, %cst_22 {dimension_numbers = #tpu.dot_dimension_numbers<[1], [0], [0], [1], [0, 0, 1, 1], [], []>} : vector<40x128xbf16>, vector<128x128xbf16>, vector<40x128xf32> -> vector<40x128xf32>
    %16 = arith.addf %12, %15 : vector<40x128xf32>
    %c0_23 = arith.constant 0 : index
    %c0_24 = arith.constant 0 : index
    %17 = vector.load %arg9[%c0_23, %c0_24] : memref<40x128xf32, #tpu.memory_space<vmem>>, vector<40x128xf32>
    tpu.vector_store %arg9[%c0_23, %c0_24], %16 {strides = array<i32>} : memref<40x128xf32, #tpu.memory_space<vmem>>, vector<40x128xf32>,
    %c0_25 = arith.constant 0 : index
    %c0_26 = arith.constant 0 : index
    %c1_27 = arith.constant 1 : index
    %c0_28 = arith.constant 0 : index
    %18 = vector.load %arg2[%c0_25, %c0_26, %c1_27, %c0_28] : memref<1x1x100x128xbf16, #tpu.memory_space<vmem>>, vector<1x1x40x128xbf16>
    %19 = vector.shape_cast %18 : vector<1x1x40x128xbf16> to vector<40x128xbf16>
    %c0_29 = arith.constant 0 : index
    %c0_30 = arith.constant 0 : index
    %20 = vector.load %arg9[%c0_29, %c0_30] : memref<40x128xf32, #tpu.memory_space<vmem>>, vector<40x128xf32>
    %c0_31 = arith.constant 0 : index
    %c2 = arith.constant 2 : index
    %c0_32 = arith.constant 0 : index
    %c0_33 = arith.constant 0 : index
    %21 = vector.load %arg5[%c0_31, %c2, %c0_32, %c0_33] : memref<3x9x128x128xbf16, #tpu.memory_space<vmem>>, vector<1x1x128x128xbf16>
    %22 = vector.shape_cast %21 : vector<1x1x128x128xbf16> to vector<128x128xbf16>
    %cst_34 = arith.constant dense<0.000000e+00> : vector<40x128xf32>
    %23 = tpu.matmul %19, %22, %cst_34 {dimension_numbers = #tpu.dot_dimension_numbers<[1], [0], [0], [1], [0, 0, 1, 1], [], []>} : vector<40x128xbf16>, vector<128x128xbf16>, vector<40x128xf32> -> vector<40x128xf32>
    %24 = arith.addf %20, %23 : vector<40x128xf32>
    %c0_35 = arith.constant 0 : index
    %c0_36 = arith.constant 0 : index
    %25 = vector.load %arg9[%c0_35, %c0_36] : memref<40x128xf32, #tpu.memory_space<vmem>>, vector<40x128xf32>
    tpu.vector_store %arg9[%c0_35, %c0_36], %24 {strides = array<i32>} : memref<40x128xf32, #tpu.memory_space<vmem>>, vector<40x128xf32>,
    %c0_37 = arith.constant 0 : index
    %c0_38 = arith.constant 0 : index
    %c50 = arith.constant 50 : index
    %c0_39 = arith.constant 0 : index
    %26 = vector.load %arg2[%c0_37, %c0_38, %c50, %c0_39] : memref<1x1x100x128xbf16, #tpu.memory_space<vmem>>, vector<1x1x40x128xbf16>
    %27 = vector.shape_cast %26 : vector<1x1x40x128xbf16> to vector<40x128xbf16>
    %c0_40 = arith.constant 0 : index
    %c0_41 = arith.constant 0 : index
    %28 = vector.load %arg9[%c0_40, %c0_41] : memref<40x128xf32, #tpu.memory_space<vmem>>, vector<40x128xf32>
    %c0_42 = arith.constant 0 : index
    %c3 = arith.constant 3 : index
    %c0_43 = arith.constant 0 : index
    %c0_44 = arith.constant 0 : index
    %29 = vector.load %arg5[%c0_42, %c3, %c0_43, %c0_44] : memref<3x9x128x128xbf16, #tpu.memory_space<vmem>>, vector<1x1x128x128xbf16>
    %30 = vector.shape_cast %29 : vector<1x1x128x128xbf16> to vector<128x128xbf16>
    %cst_45 = arith.constant dense<0.000000e+00> : vector<40x128xf32>
    %31 = tpu.matmul %27, %30, %cst_45 {dimension_numbers = #tpu.dot_dimension_numbers<[1], [0], [0], [1], [0, 0, 1, 1], [], []>} : vector<40x128xbf16>, vector<128x128xbf16>, vector<40x128xf32> -> vector<40x128xf32>
    %32 = arith.addf %28, %31 : vector<40x128xf32>
    %c0_46 = arith.constant 0 : index
    %c0_47 = arith.constant 0 : index
    %33 = vector.load %arg9[%c0_46, %c0_47] : memref<40x128xf32, #tpu.memory_space<vmem>>, vector<40x128xf32>
    tpu.vector_store %arg9[%c0_46, %c0_47], %32 {strides = array<i32>} : memref<40x128xf32, #tpu.memory_space<vmem>>, vector<40x128xf32>,
    %c0_48 = arith.constant 0 : index
    %c0_49 = arith.constant 0 : index
    %c55 = arith.constant 55 : index
    %c0_50 = arith.constant 0 : index
    %34 = vector.load %arg2[%c0_48, %c0_49, %c55, %c0_50] : memref<1x1x100x128xbf16, #tpu.memory_space<vmem>>, vector<1x1x40x128xbf16>
    %35 = vector.shape_cast %34 : vector<1x1x40x128xbf16> to vector<40x128xbf16>
    %c0_51 = arith.constant 0 : index
    %c0_52 = arith.constant 0 : index
    %36 = vector.load %arg9[%c0_51, %c0_52] : memref<40x128xf32, #tpu.memory_space<vmem>>, vector<40x128xf32>
    %c0_53 = arith.constant 0 : index
    %c4 = arith.constant 4 : index
    %c0_54 = arith.constant 0 : index
    %c0_55 = arith.constant 0 : index
    %37 = vector.load %arg5[%c0_53, %c4, %c0_54, %c0_55] : memref<3x9x128x128xbf16, #tpu.memory_space<vmem>>, vector<1x1x128x128xbf16>
    %38 = vector.shape_cast %37 : vector<1x1x128x128xbf16> to vector<128x128xbf16>
    %cst_56 = arith.constant dense<0.000000e+00> : vector<40x128xf32>
    %39 = tpu.matmul %35, %38, %cst_56 {dimension_numbers = #tpu.dot_dimension_numbers<[1], [0], [0], [1], [0, 0, 1, 1], [], []>} : vector<40x128xbf16>, vector<128x128xbf16>, vector<40x128xf32> -> vector<40x128xf32>
    %40 = arith.addf %36, %39 : vector<40x128xf32>
    %c0_57 = arith.constant 0 : index
    %c0_58 = arith.constant 0 : index
    %41 = vector.load %arg9[%c0_57, %c0_58] : memref<40x128xf32, #tpu.memory_space<vmem>>, vector<40x128xf32>
    tpu.vector_store %arg9[%c0_57, %c0_58], %40 {strides = array<i32>} : memref<40x128xf32, #tpu.memory_space<vmem>>, vector<40x128xf32>,
    %c0_59 = arith.constant 0 : index
    %c0_60 = arith.constant 0 : index
    %c51 = arith.constant 51 : index
    %c0_61 = arith.constant 0 : index
    %42 = vector.load %arg2[%c0_59, %c0_60, %c51, %c0_61] : memref<1x1x100x128xbf16, #tpu.memory_space<vmem>>, vector<1x1x40x128xbf16>
    %43 = vector.shape_cast %42 : vector<1x1x40x128xbf16> to vector<40x128xbf16>
    %c0_62 = arith.constant 0 : index
    %c0_63 = arith.constant 0 : index
    %44 = vector.load %arg9[%c0_62, %c0_63] : memref<40x128xf32, #tpu.memory_space<vmem>>, vector<40x128xf32>
    %c0_64 = arith.constant 0 : index
    %c5_65 = arith.constant 5 : index
    %c0_66 = arith.constant 0 : index
    %c0_67 = arith.constant 0 : index
    %45 = vector.load %arg5[%c0_64, %c5_65, %c0_66, %c0_67] : memref<3x9x128x128xbf16, #tpu.memory_space<vmem>>, vector<1x1x128x128xbf16>
    %46 = vector.shape_cast %45 : vector<1x1x128x128xbf16> to vector<128x128xbf16>
    %cst_68 = arith.constant dense<0.000000e+00> : vector<40x128xf32>
    %47 = tpu.matmul %43, %46, %cst_68 {dimension_numbers = #tpu.dot_dimension_numbers<[1], [0], [0], [1], [0, 0, 1, 1], [], []>} : vector<40x128xbf16>, vector<128x128xbf16>, vector<40x128xf32> -> vector<40x128xf32>
    %48 = arith.addf %44, %47 : vector<40x128xf32>
    %c0_69 = arith.constant 0 : index
    %c0_70 = arith.constant 0 : index
    %49 = vector.load %arg9[%c0_69, %c0_70] : memref<40x128xf32, #tpu.memory_space<vmem>>, vector<40x128xf32>
    tpu.vector_store %arg9[%c0_69, %c0_70], %48 {strides = array<i32>} : memref<40x128xf32, #tpu.memory_space<vmem>>, vector<40x128xf32>,
    %c0_71 = arith.constant 0 : index
    %c0_72 = arith.constant 0 : index
    %c10 = arith.constant 10 : index
    %c0_73 = arith.constant 0 : index
    %50 = vector.load %arg2[%c0_71, %c0_72, %c10, %c0_73] : memref<1x1x100x128xbf16, #tpu.memory_space<vmem>>, vector<1x1x40x128xbf16>
    %51 = vector.shape_cast %50 : vector<1x1x40x128xbf16> to vector<40x128xbf16>
    %c0_74 = arith.constant 0 : index
    %c0_75 = arith.constant 0 : index
    %52 = vector.load %arg9[%c0_74, %c0_75] : memref<40x128xf32, #tpu.memory_space<vmem>>, vector<40x128xf32>
    %c0_76 = arith.constant 0 : index
    %c6 = arith.constant 6 : index
    %c0_77 = arith.constant 0 : index
    %c0_78 = arith.constant 0 : index
    %53 = vector.load %arg5[%c0_76, %c6, %c0_77, %c0_78] : memref<3x9x128x128xbf16, #tpu.memory_space<vmem>>, vector<1x1x128x128xbf16>
    %54 = vector.shape_cast %53 : vector<1x1x128x128xbf16> to vector<128x128xbf16>
    %cst_79 = arith.constant dense<0.000000e+00> : vector<40x128xf32>
    %55 = tpu.matmul %51, %54, %cst_79 {dimension_numbers = #tpu.dot_dimension_numbers<[1], [0], [0], [1], [0, 0, 1, 1], [], []>} : vector<40x128xbf16>, vector<128x128xbf16>, vector<40x128xf32> -> vector<40x128xf32>
    %56 = arith.addf %52, %55 : vector<40x128xf32>
    %c0_80 = arith.constant 0 : index
    %c0_81 = arith.constant 0 : index
    %57 = vector.load %arg9[%c0_80, %c0_81] : memref<40x128xf32, #tpu.memory_space<vmem>>, vector<40x128xf32>
    tpu.vector_store %arg9[%c0_80, %c0_81], %56 {strides = array<i32>} : memref<40x128xf32, #tpu.memory_space<vmem>>, vector<40x128xf32>,
    %c0_82 = arith.constant 0 : index
    %c0_83 = arith.constant 0 : index
    %c15 = arith.constant 15 : index
    %c0_84 = arith.constant 0 : index
    %58 = vector.load %arg2[%c0_82, %c0_83, %c15, %c0_84] : memref<1x1x100x128xbf16, #tpu.memory_space<vmem>>, vector<1x1x40x128xbf16>
    %59 = vector.shape_cast %58 : vector<1x1x40x128xbf16> to vector<40x128xbf16>
    %c0_85 = arith.constant 0 : index
    %c0_86 = arith.constant 0 : index
    %60 = vector.load %arg9[%c0_85, %c0_86] : memref<40x128xf32, #tpu.memory_space<vmem>>, vector<40x128xf32>
    %c0_87 = arith.constant 0 : index
    %c7 = arith.constant 7 : index
    %c0_88 = arith.constant 0 : index
    %c0_89 = arith.constant 0 : index
    %61 = vector.load %arg5[%c0_87, %c7, %c0_88, %c0_89] : memref<3x9x128x128xbf16, #tpu.memory_space<vmem>>, vector<1x1x128x128xbf16>
    %62 = vector.shape_cast %61 : vector<1x1x128x128xbf16> to vector<128x128xbf16>
    %cst_90 = arith.constant dense<0.000000e+00> : vector<40x128xf32>
    %63 = tpu.matmul %59, %62, %cst_90 {dimension_numbers = #tpu.dot_dimension_numbers<[1], [0], [0], [1], [0, 0, 1, 1], [], []>} : vector<40x128xbf16>, vector<128x128xbf16>, vector<40x128xf32> -> vector<40x128xf32>
    %64 = arith.addf %60, %63 : vector<40x128xf32>
    %c0_91 = arith.constant 0 : index
    %c0_92 = arith.constant 0 : index
    %65 = vector.load %arg9[%c0_91, %c0_92] : memref<40x128xf32, #tpu.memory_space<vmem>>, vector<40x128xf32>
    tpu.vector_store %arg9[%c0_91, %c0_92], %64 {strides = array<i32>} : memref<40x128xf32, #tpu.memory_space<vmem>>, vector<40x128xf32>,
    %c0_93 = arith.constant 0 : index
    %c0_94 = arith.constant 0 : index
    %c11 = arith.constant 11 : index
    %c0_95 = arith.constant 0 : index
    %66 = vector.load %arg2[%c0_93, %c0_94, %c11, %c0_95] : memref<1x1x100x128xbf16, #tpu.memory_space<vmem>>, vector<1x1x40x128xbf16>
    %67 = vector.shape_cast %66 : vector<1x1x40x128xbf16> to vector<40x128xbf16>
    %c0_96 = arith.constant 0 : index
    %c0_97 = arith.constant 0 : index
    %68 = vector.load %arg9[%c0_96, %c0_97] : memref<40x128xf32, #tpu.memory_space<vmem>>, vector<40x128xf32>
    %c0_98 = arith.constant 0 : index
    %c8 = arith.constant 8 : index
    %c0_99 = arith.constant 0 : index
    %c0_100 = arith.constant 0 : index
    %69 = vector.load %arg5[%c0_98, %c8, %c0_99, %c0_100] : memref<3x9x128x128xbf16, #tpu.memory_space<vmem>>, vector<1x1x128x128xbf16>
    %70 = vector.shape_cast %69 : vector<1x1x128x128xbf16> to vector<128x128xbf16>
    %cst_101 = arith.constant dense<0.000000e+00> : vector<40x128xf32>
    %71 = tpu.matmul %67, %70, %cst_101 {dimension_numbers = #tpu.dot_dimension_numbers<[1], [0], [0], [1], [0, 0, 1, 1], [], []>} : vector<40x128xbf16>, vector<128x128xbf16>, vector<40x128xf32> -> vector<40x128xf32>
    %72 = arith.addf %68, %71 : vector<40x128xf32>
    %c0_102 = arith.constant 0 : index
    %c0_103 = arith.constant 0 : index
    %73 = vector.load %arg9[%c0_102, %c0_103] : memref<40x128xf32, #tpu.memory_space<vmem>>, vector<40x128xf32>
    tpu.vector_store %arg9[%c0_102, %c0_103], %72 {strides = array<i32>} : memref<40x128xf32, #tpu.memory_space<vmem>>, vector<40x128xf32>,
    %c0_104 = arith.constant 0 : index
    %c0_105 = arith.constant 0 : index
    %c0_106 = arith.constant 0 : index
    %c0_107 = arith.constant 0 : index
    %74 = vector.load %arg3[%c0_104, %c0_105, %c0_106, %c0_107] : memref<1x1x100x128xbf16, #tpu.memory_space<vmem>>, vector<1x1x40x128xbf16>
    %75 = vector.shape_cast %74 : vector<1x1x40x128xbf16> to vector<40x128xbf16>
    %c0_108 = arith.constant 0 : index
    %c0_109 = arith.constant 0 : index
    %76 = vector.load %arg9[%c0_108, %c0_109] : memref<40x128xf32, #tpu.memory_space<vmem>>, vector<40x128xf32>
    %c1_110 = arith.constant 1 : index
    %c0_111 = arith.constant 0 : index
    %c0_112 = arith.constant 0 : index
    %c0_113 = arith.constant 0 : index
    %77 = vector.load %arg5[%c1_110, %c0_111, %c0_112, %c0_113] : memref<3x9x128x128xbf16, #tpu.memory_space<vmem>>, vector<1x1x128x128xbf16>
    %78 = vector.shape_cast %77 : vector<1x1x128x128xbf16> to vector<128x128xbf16>
    %cst_114 = arith.constant dense<0.000000e+00> : vector<40x128xf32>
    %79 = tpu.matmul %75, %78, %cst_114 {dimension_numbers = #tpu.dot_dimension_numbers<[1], [0], [0], [1], [0, 0, 1, 1], [], []>} : vector<40x128xbf16>, vector<128x128xbf16>, vector<40x128xf32> -> vector<40x128xf32>
    %80 = arith.addf %76, %79 : vector<40x128xf32>
    %c0_115 = arith.constant 0 : index
    %c0_116 = arith.constant 0 : index
    %81 = vector.load %arg9[%c0_115, %c0_116] : memref<40x128xf32, #tpu.memory_space<vmem>>, vector<40x128xf32>
    tpu.vector_store %arg9[%c0_115, %c0_116], %80 {strides = array<i32>} : memref<40x128xf32, #tpu.memory_space<vmem>>, vector<40x128xf32>,
    %c0_117 = arith.constant 0 : index
    %c0_118 = arith.constant 0 : index
    %c5_119 = arith.constant 5 : index
    %c0_120 = arith.constant 0 : index
    %82 = vector.load %arg3[%c0_117, %c0_118, %c5_119, %c0_120] : memref<1x1x100x128xbf16, #tpu.memory_space<vmem>>, vector<1x1x40x128xbf16>
    %83 = vector.shape_cast %82 : vector<1x1x40x128xbf16> to vector<40x128xbf16>
    %c0_121 = arith.constant 0 : index
    %c0_122 = arith.constant 0 : index
    %84 = vector.load %arg9[%c0_121, %c0_122] : memref<40x128xf32, #tpu.memory_space<vmem>>, vector<40x128xf32>
    %c1_123 = arith.constant 1 : index
    %c1_124 = arith.constant 1 : index
    %c0_125 = arith.constant 0 : index
    %c0_126 = arith.constant 0 : index
    %85 = vector.load %arg5[%c1_123, %c1_124, %c0_125, %c0_126] : memref<3x9x128x128xbf16, #tpu.memory_space<vmem>>, vector<1x1x128x128xbf16>
    %86 = vector.shape_cast %85 : vector<1x1x128x128xbf16> to vector<128x128xbf16>
    %cst_127 = arith.constant dense<0.000000e+00> : vector<40x128xf32>
    %87 = tpu.matmul %83, %86, %cst_127 {dimension_numbers = #tpu.dot_dimension_numbers<[1], [0], [0], [1], [0, 0, 1, 1], [], []>} : vector<40x128xbf16>, vector<128x128xbf16>, vector<40x128xf32> -> vector<40x128xf32>
    %88 = arith.addf %84, %87 : vector<40x128xf32>
    %c0_128 = arith.constant 0 : index
    %c0_129 = arith.constant 0 : index
    %89 = vector.load %arg9[%c0_128, %c0_129] : memref<40x128xf32, #tpu.memory_space<vmem>>, vector<40x128xf32>
    tpu.vector_store %arg9[%c0_128, %c0_129], %88 {strides = array<i32>} : memref<40x128xf32, #tpu.memory_space<vmem>>, vector<40x128xf32>,
    %c0_130 = arith.constant 0 : index
    %c0_131 = arith.constant 0 : index
    %c1_132 = arith.constant 1 : index
    %c0_133 = arith.constant 0 : index
    %90 = vector.load %arg3[%c0_130, %c0_131, %c1_132, %c0_133] : memref<1x1x100x128xbf16, #tpu.memory_space<vmem>>, vector<1x1x40x128xbf16>
    %91 = vector.shape_cast %90 : vector<1x1x40x128xbf16> to vector<40x128xbf16>
    %c0_134 = arith.constant 0 : index
    %c0_135 = arith.constant 0 : index
    %92 = vector.load %arg9[%c0_134, %c0_135] : memref<40x128xf32, #tpu.memory_space<vmem>>, vector<40x128xf32>
    %c1_136 = arith.constant 1 : index
    %c2_137 = arith.constant 2 : index
    %c0_138 = arith.constant 0 : index
    %c0_139 = arith.constant 0 : index
    %93 = vector.load %arg5[%c1_136, %c2_137, %c0_138, %c0_139] : memref<3x9x128x128xbf16, #tpu.memory_space<vmem>>, vector<1x1x128x128xbf16>
    %94 = vector.shape_cast %93 : vector<1x1x128x128xbf16> to vector<128x128xbf16>
    %cst_140 = arith.constant dense<0.000000e+00> : vector<40x128xf32>
    %95 = tpu.matmul %91, %94, %cst_140 {dimension_numbers = #tpu.dot_dimension_numbers<[1], [0], [0], [1], [0, 0, 1, 1], [], []>} : vector<40x128xbf16>, vector<128x128xbf16>, vector<40x128xf32> -> vector<40x128xf32>
    %96 = arith.addf %92, %95 : vector<40x128xf32>
    %c0_141 = arith.constant 0 : index
    %c0_142 = arith.constant 0 : index
    %97 = vector.load %arg9[%c0_141, %c0_142] : memref<40x128xf32, #tpu.memory_space<vmem>>, vector<40x128xf32>
    tpu.vector_store %arg9[%c0_141, %c0_142], %96 {strides = array<i32>} : memref<40x128xf32, #tpu.memory_space<vmem>>, vector<40x128xf32>,
    %c0_143 = arith.constant 0 : index
    %c0_144 = arith.constant 0 : index
    %c50_145 = arith.constant 50 : index
    %c0_146 = arith.constant 0 : index
    %98 = vector.load %arg3[%c0_143, %c0_144, %c50_145, %c0_146] : memref<1x1x100x128xbf16, #tpu.memory_space<vmem>>, vector<1x1x40x128xbf16>
    %99 = vector.shape_cast %98 : vector<1x1x40x128xbf16> to vector<40x128xbf16>
    %c0_147 = arith.constant 0 : index
    %c0_148 = arith.constant 0 : index
    %100 = vector.load %arg9[%c0_147, %c0_148] : memref<40x128xf32, #tpu.memory_space<vmem>>, vector<40x128xf32>
    %c1_149 = arith.constant 1 : index
    %c3_150 = arith.constant 3 : index
    %c0_151 = arith.constant 0 : index
    %c0_152 = arith.constant 0 : index
    %101 = vector.load %arg5[%c1_149, %c3_150, %c0_151, %c0_152] : memref<3x9x128x128xbf16, #tpu.memory_space<vmem>>, vector<1x1x128x128xbf16>
    %102 = vector.shape_cast %101 : vector<1x1x128x128xbf16> to vector<128x128xbf16>
    %cst_153 = arith.constant dense<0.000000e+00> : vector<40x128xf32>
    %103 = tpu.matmul %99, %102, %cst_153 {dimension_numbers = #tpu.dot_dimension_numbers<[1], [0], [0], [1], [0, 0, 1, 1], [], []>} : vector<40x128xbf16>, vector<128x128xbf16>, vector<40x128xf32> -> vector<40x128xf32>
    %104 = arith.addf %100, %103 : vector<40x128xf32>
    %c0_154 = arith.constant 0 : index
    %c0_155 = arith.constant 0 : index
    %105 = vector.load %arg9[%c0_154, %c0_155] : memref<40x128xf32, #tpu.memory_space<vmem>>, vector<40x128xf32>
    tpu.vector_store %arg9[%c0_154, %c0_155], %104 {strides = array<i32>} : memref<40x128xf32, #tpu.memory_space<vmem>>, vector<40x128xf32>,
    %c0_156 = arith.constant 0 : index
    %c0_157 = arith.constant 0 : index
    %c55_158 = arith.constant 55 : index
    %c0_159 = arith.constant 0 : index
    %106 = vector.load %arg3[%c0_156, %c0_157, %c55_158, %c0_159] : memref<1x1x100x128xbf16, #tpu.memory_space<vmem>>, vector<1x1x40x128xbf16>
    %107 = vector.shape_cast %106 : vector<1x1x40x128xbf16> to vector<40x128xbf16>
    %c0_160 = arith.constant 0 : index
    %c0_161 = arith.constant 0 : index
    %108 = vector.load %arg9[%c0_160, %c0_161] : memref<40x128xf32, #tpu.memory_space<vmem>>, vector<40x128xf32>
    %c1_162 = arith.constant 1 : index
    %c4_163 = arith.constant 4 : index
    %c0_164 = arith.constant 0 : index
    %c0_165 = arith.constant 0 : index
    %109 = vector.load %arg5[%c1_162, %c4_163, %c0_164, %c0_165] : memref<3x9x128x128xbf16, #tpu.memory_space<vmem>>, vector<1x1x128x128xbf16>
    %110 = vector.shape_cast %109 : vector<1x1x128x128xbf16> to vector<128x128xbf16>
    %cst_166 = arith.constant dense<0.000000e+00> : vector<40x128xf32>
    %111 = tpu.matmul %107, %110, %cst_166 {dimension_numbers = #tpu.dot_dimension_numbers<[1], [0], [0], [1], [0, 0, 1, 1], [], []>} : vector<40x128xbf16>, vector<128x128xbf16>, vector<40x128xf32> -> vector<40x128xf32>
    %112 = arith.addf %108, %111 : vector<40x128xf32>
    %c0_167 = arith.constant 0 : index
    %c0_168 = arith.constant 0 : index
    %113 = vector.load %arg9[%c0_167, %c0_168] : memref<40x128xf32, #tpu.memory_space<vmem>>, vector<40x128xf32>
    tpu.vector_store %arg9[%c0_167, %c0_168], %112 {strides = array<i32>} : memref<40x128xf32, #tpu.memory_space<vmem>>, vector<40x128xf32>,
    %c0_169 = arith.constant 0 : index
    %c0_170 = arith.constant 0 : index
    %c51_171 = arith.constant 51 : index
    %c0_172 = arith.constant 0 : index
    %114 = vector.load %arg3[%c0_169, %c0_170, %c51_171, %c0_172] : memref<1x1x100x128xbf16, #tpu.memory_space<vmem>>, vector<1x1x40x128xbf16>
    %115 = vector.shape_cast %114 : vector<1x1x40x128xbf16> to vector<40x128xbf16>
    %c0_173 = arith.constant 0 : index
    %c0_174 = arith.constant 0 : index
    %116 = vector.load %arg9[%c0_173, %c0_174] : memref<40x128xf32, #tpu.memory_space<vmem>>, vector<40x128xf32>
    %c1_175 = arith.constant 1 : index
    %c5_176 = arith.constant 5 : index
    %c0_177 = arith.constant 0 : index
    %c0_178 = arith.constant 0 : index
    %117 = vector.load %arg5[%c1_175, %c5_176, %c0_177, %c0_178] : memref<3x9x128x128xbf16, #tpu.memory_space<vmem>>, vector<1x1x128x128xbf16>
    %118 = vector.shape_cast %117 : vector<1x1x128x128xbf16> to vector<128x128xbf16>
    %cst_179 = arith.constant dense<0.000000e+00> : vector<40x128xf32>
    %119 = tpu.matmul %115, %118, %cst_179 {dimension_numbers = #tpu.dot_dimension_numbers<[1], [0], [0], [1], [0, 0, 1, 1], [], []>} : vector<40x128xbf16>, vector<128x128xbf16>, vector<40x128xf32> -> vector<40x128xf32>
    %120 = arith.addf %116, %119 : vector<40x128xf32>
    %c0_180 = arith.constant 0 : index
    %c0_181 = arith.constant 0 : index
    %121 = vector.load %arg9[%c0_180, %c0_181] : memref<40x128xf32, #tpu.memory_space<vmem>>, vector<40x128xf32>
    tpu.vector_store %arg9[%c0_180, %c0_181], %120 {strides = array<i32>} : memref<40x128xf32, #tpu.memory_space<vmem>>, vector<40x128xf32>,
    %c0_182 = arith.constant 0 : index
    %c0_183 = arith.constant 0 : index
    %c10_184 = arith.constant 10 : index
    %c0_185 = arith.constant 0 : index
    %122 = vector.load %arg3[%c0_182, %c0_183, %c10_184, %c0_185] : memref<1x1x100x128xbf16, #tpu.memory_space<vmem>>, vector<1x1x40x128xbf16>
    %123 = vector.shape_cast %122 : vector<1x1x40x128xbf16> to vector<40x128xbf16>
    %c0_186 = arith.constant 0 : index
    %c0_187 = arith.constant 0 : index
    %124 = vector.load %arg9[%c0_186, %c0_187] : memref<40x128xf32, #tpu.memory_space<vmem>>, vector<40x128xf32>
    %c1_188 = arith.constant 1 : index
    %c6_189 = arith.constant 6 : index
    %c0_190 = arith.constant 0 : index
    %c0_191 = arith.constant 0 : index
    %125 = vector.load %arg5[%c1_188, %c6_189, %c0_190, %c0_191] : memref<3x9x128x128xbf16, #tpu.memory_space<vmem>>, vector<1x1x128x128xbf16>
    %126 = vector.shape_cast %125 : vector<1x1x128x128xbf16> to vector<128x128xbf16>
    %cst_192 = arith.constant dense<0.000000e+00> : vector<40x128xf32>
    %127 = tpu.matmul %123, %126, %cst_192 {dimension_numbers = #tpu.dot_dimension_numbers<[1], [0], [0], [1], [0, 0, 1, 1], [], []>} : vector<40x128xbf16>, vector<128x128xbf16>, vector<40x128xf32> -> vector<40x128xf32>
    %128 = arith.addf %124, %127 : vector<40x128xf32>
    %c0_193 = arith.constant 0 : index
    %c0_194 = arith.constant 0 : index
    %129 = vector.load %arg9[%c0_193, %c0_194] : memref<40x128xf32, #tpu.memory_space<vmem>>, vector<40x128xf32>
    tpu.vector_store %arg9[%c0_193, %c0_194], %128 {strides = array<i32>} : memref<40x128xf32, #tpu.memory_space<vmem>>, vector<40x128xf32>,
    %c0_195 = arith.constant 0 : index
    %c0_196 = arith.constant 0 : index
    %c15_197 = arith.constant 15 : index
    %c0_198 = arith.constant 0 : index
    %130 = vector.load %arg3[%c0_195, %c0_196, %c15_197, %c0_198] : memref<1x1x100x128xbf16, #tpu.memory_space<vmem>>, vector<1x1x40x128xbf16>
    %131 = vector.shape_cast %130 : vector<1x1x40x128xbf16> to vector<40x128xbf16>
    %c0_199 = arith.constant 0 : index
    %c0_200 = arith.constant 0 : index
    %132 = vector.load %arg9[%c0_199, %c0_200] : memref<40x128xf32, #tpu.memory_space<vmem>>, vector<40x128xf32>
    %c1_201 = arith.constant 1 : index
    %c7_202 = arith.constant 7 : index
    %c0_203 = arith.constant 0 : index
    %c0_204 = arith.constant 0 : index
    %133 = vector.load %arg5[%c1_201, %c7_202, %c0_203, %c0_204] : memref<3x9x128x128xbf16, #tpu.memory_space<vmem>>, vector<1x1x128x128xbf16>
    %134 = vector.shape_cast %133 : vector<1x1x128x128xbf16> to vector<128x128xbf16>
    %cst_205 = arith.constant dense<0.000000e+00> : vector<40x128xf32>
    %135 = tpu.matmul %131, %134, %cst_205 {dimension_numbers = #tpu.dot_dimension_numbers<[1], [0], [0], [1], [0, 0, 1, 1], [], []>} : vector<40x128xbf16>, vector<128x128xbf16>, vector<40x128xf32> -> vector<40x128xf32>
    %136 = arith.addf %132, %135 : vector<40x128xf32>
    %c0_206 = arith.constant 0 : index
    %c0_207 = arith.constant 0 : index
    %137 = vector.load %arg9[%c0_206, %c0_207] : memref<40x128xf32, #tpu.memory_space<vmem>>, vector<40x128xf32>
    tpu.vector_store %arg9[%c0_206, %c0_207], %136 {strides = array<i32>} : memref<40x128xf32, #tpu.memory_space<vmem>>, vector<40x128xf32>,
    %c0_208 = arith.constant 0 : index
    %c0_209 = arith.constant 0 : index
    %c11_210 = arith.constant 11 : index
    %c0_211 = arith.constant 0 : index
    %138 = vector.load %arg3[%c0_208, %c0_209, %c11_210, %c0_211] : memref<1x1x100x128xbf16, #tpu.memory_space<vmem>>, vector<1x1x40x128xbf16>
    %139 = vector.shape_cast %138 : vector<1x1x40x128xbf16> to vector<40x128xbf16>
    %c0_212 = arith.constant 0 : index
    %c0_213 = arith.constant 0 : index
    %140 = vector.load %arg9[%c0_212, %c0_213] : memref<40x128xf32, #tpu.memory_space<vmem>>, vector<40x128xf32>
    %c1_214 = arith.constant 1 : index
    %c8_215 = arith.constant 8 : index
    %c0_216 = arith.constant 0 : index
    %c0_217 = arith.constant 0 : index
    %141 = vector.load %arg5[%c1_214, %c8_215, %c0_216, %c0_217] : memref<3x9x128x128xbf16, #tpu.memory_space<vmem>>, vector<1x1x128x128xbf16>
    %142 = vector.shape_cast %141 : vector<1x1x128x128xbf16> to vector<128x128xbf16>
    %cst_218 = arith.constant dense<0.000000e+00> : vector<40x128xf32>
    %143 = tpu.matmul %139, %142, %cst_218 {dimension_numbers = #tpu.dot_dimension_numbers<[1], [0], [0], [1], [0, 0, 1, 1], [], []>} : vector<40x128xbf16>, vector<128x128xbf16>, vector<40x128xf32> -> vector<40x128xf32>
    %144 = arith.addf %140, %143 : vector<40x128xf32>
    %c0_219 = arith.constant 0 : index
    %c0_220 = arith.constant 0 : index
    %145 = vector.load %arg9[%c0_219, %c0_220] : memref<40x128xf32, #tpu.memory_space<vmem>>, vector<40x128xf32>
    tpu.vector_store %arg9[%c0_219, %c0_220], %144 {strides = array<i32>} : memref<40x128xf32, #tpu.memory_space<vmem>>, vector<40x128xf32>,
    %c0_221 = arith.constant 0 : index
    %c0_222 = arith.constant 0 : index
    %c0_223 = arith.constant 0 : index
    %c0_224 = arith.constant 0 : index
    %146 = vector.load %arg4[%c0_221, %c0_222, %c0_223, %c0_224] : memref<1x1x100x128xbf16, #tpu.memory_space<vmem>>, vector<1x1x40x128xbf16>
    %147 = vector.shape_cast %146 : vector<1x1x40x128xbf16> to vector<40x128xbf16>
    %c0_225 = arith.constant 0 : index
    %c0_226 = arith.constant 0 : index
    %148 = vector.load %arg9[%c0_225, %c0_226] : memref<40x128xf32, #tpu.memory_space<vmem>>, vector<40x128xf32>
    %c2_227 = arith.constant 2 : index
    %c0_228 = arith.constant 0 : index
    %c0_229 = arith.constant 0 : index
    %c0_230 = arith.constant 0 : index
    %149 = vector.load %arg5[%c2_227, %c0_228, %c0_229, %c0_230] : memref<3x9x128x128xbf16, #tpu.memory_space<vmem>>, vector<1x1x128x128xbf16>
    %150 = vector.shape_cast %149 : vector<1x1x128x128xbf16> to vector<128x128xbf16>
    %cst_231 = arith.constant dense<0.000000e+00> : vector<40x128xf32>
    %151 = tpu.matmul %147, %150, %cst_231 {dimension_numbers = #tpu.dot_dimension_numbers<[1], [0], [0], [1], [0, 0, 1, 1], [], []>} : vector<40x128xbf16>, vector<128x128xbf16>, vector<40x128xf32> -> vector<40x128xf32>
    %152 = arith.addf %148, %151 : vector<40x128xf32>
    %c0_232 = arith.constant 0 : index
    %c0_233 = arith.constant 0 : index
    %153 = vector.load %arg9[%c0_232, %c0_233] : memref<40x128xf32, #tpu.memory_space<vmem>>, vector<40x128xf32>
    tpu.vector_store %arg9[%c0_232, %c0_233], %152 {strides = array<i32>} : memref<40x128xf32, #tpu.memory_space<vmem>>, vector<40x128xf32>,
    %c0_234 = arith.constant 0 : index
    %c0_235 = arith.constant 0 : index
    %c5_236 = arith.constant 5 : index
    %c0_237 = arith.constant 0 : index
    %154 = vector.load %arg4[%c0_234, %c0_235, %c5_236, %c0_237] : memref<1x1x100x128xbf16, #tpu.memory_space<vmem>>, vector<1x1x40x128xbf16>
    %155 = vector.shape_cast %154 : vector<1x1x40x128xbf16> to vector<40x128xbf16>
    %c0_238 = arith.constant 0 : index
    %c0_239 = arith.constant 0 : index
    %156 = vector.load %arg9[%c0_238, %c0_239] : memref<40x128xf32, #tpu.memory_space<vmem>>, vector<40x128xf32>
    %c2_240 = arith.constant 2 : index
    %c1_241 = arith.constant 1 : index
    %c0_242 = arith.constant 0 : index
    %c0_243 = arith.constant 0 : index
    %157 = vector.load %arg5[%c2_240, %c1_241, %c0_242, %c0_243] : memref<3x9x128x128xbf16, #tpu.memory_space<vmem>>, vector<1x1x128x128xbf16>
    %158 = vector.shape_cast %157 : vector<1x1x128x128xbf16> to vector<128x128xbf16>
    %cst_244 = arith.constant dense<0.000000e+00> : vector<40x128xf32>
    %159 = tpu.matmul %155, %158, %cst_244 {dimension_numbers = #tpu.dot_dimension_numbers<[1], [0], [0], [1], [0, 0, 1, 1], [], []>} : vector<40x128xbf16>, vector<128x128xbf16>, vector<40x128xf32> -> vector<40x128xf32>
    %160 = arith.addf %156, %159 : vector<40x128xf32>
    %c0_245 = arith.constant 0 : index
    %c0_246 = arith.constant 0 : index
    %161 = vector.load %arg9[%c0_245, %c0_246] : memref<40x128xf32, #tpu.memory_space<vmem>>, vector<40x128xf32>
    tpu.vector_store %arg9[%c0_245, %c0_246], %160 {strides = array<i32>} : memref<40x128xf32, #tpu.memory_space<vmem>>, vector<40x128xf32>,
    %c0_247 = arith.constant 0 : index
    %c0_248 = arith.constant 0 : index
    %c1_249 = arith.constant 1 : index
    %c0_250 = arith.constant 0 : index
    %162 = vector.load %arg4[%c0_247, %c0_248, %c1_249, %c0_250] : memref<1x1x100x128xbf16, #tpu.memory_space<vmem>>, vector<1x1x40x128xbf16>
    %163 = vector.shape_cast %162 : vector<1x1x40x128xbf16> to vector<40x128xbf16>
    %c0_251 = arith.constant 0 : index
    %c0_252 = arith.constant 0 : index
    %164 = vector.load %arg9[%c0_251, %c0_252] : memref<40x128xf32, #tpu.memory_space<vmem>>, vector<40x128xf32>
    %c2_253 = arith.constant 2 : index
    %c2_254 = arith.constant 2 : index
    %c0_255 = arith.constant 0 : index
    %c0_256 = arith.constant 0 : index
    %165 = vector.load %arg5[%c2_253, %c2_254, %c0_255, %c0_256] : memref<3x9x128x128xbf16, #tpu.memory_space<vmem>>, vector<1x1x128x128xbf16>
    %166 = vector.shape_cast %165 : vector<1x1x128x128xbf16> to vector<128x128xbf16>
    %cst_257 = arith.constant dense<0.000000e+00> : vector<40x128xf32>
    %167 = tpu.matmul %163, %166, %cst_257 {dimension_numbers = #tpu.dot_dimension_numbers<[1], [0], [0], [1], [0, 0, 1, 1], [], []>} : vector<40x128xbf16>, vector<128x128xbf16>, vector<40x128xf32> -> vector<40x128xf32>
    %168 = arith.addf %164, %167 : vector<40x128xf32>
    %c0_258 = arith.constant 0 : index
    %c0_259 = arith.constant 0 : index
    %169 = vector.load %arg9[%c0_258, %c0_259] : memref<40x128xf32, #tpu.memory_space<vmem>>, vector<40x128xf32>
    tpu.vector_store %arg9[%c0_258, %c0_259], %168 {strides = array<i32>} : memref<40x128xf32, #tpu.memory_space<vmem>>, vector<40x128xf32>,
    %c0_260 = arith.constant 0 : index
    %c0_261 = arith.constant 0 : index
    %c50_262 = arith.constant 50 : index
    %c0_263 = arith.constant 0 : index
    %170 = vector.load %arg4[%c0_260, %c0_261, %c50_262, %c0_263] : memref<1x1x100x128xbf16, #tpu.memory_space<vmem>>, vector<1x1x40x128xbf16>
    %171 = vector.shape_cast %170 : vector<1x1x40x128xbf16> to vector<40x128xbf16>
    %c0_264 = arith.constant 0 : index
    %c0_265 = arith.constant 0 : index
    %172 = vector.load %arg9[%c0_264, %c0_265] : memref<40x128xf32, #tpu.memory_space<vmem>>, vector<40x128xf32>
    %c2_266 = arith.constant 2 : index
    %c3_267 = arith.constant 3 : index
    %c0_268 = arith.constant 0 : index
    %c0_269 = arith.constant 0 : index
    %173 = vector.load %arg5[%c2_266, %c3_267, %c0_268, %c0_269] : memref<3x9x128x128xbf16, #tpu.memory_space<vmem>>, vector<1x1x128x128xbf16>
    %174 = vector.shape_cast %173 : vector<1x1x128x128xbf16> to vector<128x128xbf16>
    %cst_270 = arith.constant dense<0.000000e+00> : vector<40x128xf32>
    %175 = tpu.matmul %171, %174, %cst_270 {dimension_numbers = #tpu.dot_dimension_numbers<[1], [0], [0], [1], [0, 0, 1, 1], [], []>} : vector<40x128xbf16>, vector<128x128xbf16>, vector<40x128xf32> -> vector<40x128xf32>
    %176 = arith.addf %172, %175 : vector<40x128xf32>
    %c0_271 = arith.constant 0 : index
    %c0_272 = arith.constant 0 : index
    %177 = vector.load %arg9[%c0_271, %c0_272] : memref<40x128xf32, #tpu.memory_space<vmem>>, vector<40x128xf32>
    tpu.vector_store %arg9[%c0_271, %c0_272], %176 {strides = array<i32>} : memref<40x128xf32, #tpu.memory_space<vmem>>, vector<40x128xf32>,
    %c0_273 = arith.constant 0 : index
    %c0_274 = arith.constant 0 : index
    %c55_275 = arith.constant 55 : index
    %c0_276 = arith.constant 0 : index
    %178 = vector.load %arg4[%c0_273, %c0_274, %c55_275, %c0_276] : memref<1x1x100x128xbf16, #tpu.memory_space<vmem>>, vector<1x1x40x128xbf16>
    %179 = vector.shape_cast %178 : vector<1x1x40x128xbf16> to vector<40x128xbf16>
    %c0_277 = arith.constant 0 : index
    %c0_278 = arith.constant 0 : index
    %180 = vector.load %arg9[%c0_277, %c0_278] : memref<40x128xf32, #tpu.memory_space<vmem>>, vector<40x128xf32>
    %c2_279 = arith.constant 2 : index
    %c4_280 = arith.constant 4 : index
    %c0_281 = arith.constant 0 : index
    %c0_282 = arith.constant 0 : index
    %181 = vector.load %arg5[%c2_279, %c4_280, %c0_281, %c0_282] : memref<3x9x128x128xbf16, #tpu.memory_space<vmem>>, vector<1x1x128x128xbf16>
    %182 = vector.shape_cast %181 : vector<1x1x128x128xbf16> to vector<128x128xbf16>
    %cst_283 = arith.constant dense<0.000000e+00> : vector<40x128xf32>
    %183 = tpu.matmul %179, %182, %cst_283 {dimension_numbers = #tpu.dot_dimension_numbers<[1], [0], [0], [1], [0, 0, 1, 1], [], []>} : vector<40x128xbf16>, vector<128x128xbf16>, vector<40x128xf32> -> vector<40x128xf32>
    %184 = arith.addf %180, %183 : vector<40x128xf32>
    %c0_284 = arith.constant 0 : index
    %c0_285 = arith.constant 0 : index
    %185 = vector.load %arg9[%c0_284, %c0_285] : memref<40x128xf32, #tpu.memory_space<vmem>>, vector<40x128xf32>
    tpu.vector_store %arg9[%c0_284, %c0_285], %184 {strides = array<i32>} : memref<40x128xf32, #tpu.memory_space<vmem>>, vector<40x128xf32>,
    %c0_286 = arith.constant 0 : index
    %c0_287 = arith.constant 0 : index
    %c51_288 = arith.constant 51 : index
    %c0_289 = arith.constant 0 : index
    %186 = vector.load %arg4[%c0_286, %c0_287, %c51_288, %c0_289] : memref<1x1x100x128xbf16, #tpu.memory_space<vmem>>, vector<1x1x40x128xbf16>
    %187 = vector.shape_cast %186 : vector<1x1x40x128xbf16> to vector<40x128xbf16>
    %c0_290 = arith.constant 0 : index
    %c0_291 = arith.constant 0 : index
    %188 = vector.load %arg9[%c0_290, %c0_291] : memref<40x128xf32, #tpu.memory_space<vmem>>, vector<40x128xf32>
    %c2_292 = arith.constant 2 : index
    %c5_293 = arith.constant 5 : index
    %c0_294 = arith.constant 0 : index
    %c0_295 = arith.constant 0 : index
    %189 = vector.load %arg5[%c2_292, %c5_293, %c0_294, %c0_295] : memref<3x9x128x128xbf16, #tpu.memory_space<vmem>>, vector<1x1x128x128xbf16>
    %190 = vector.shape_cast %189 : vector<1x1x128x128xbf16> to vector<128x128xbf16>
    %cst_296 = arith.constant dense<0.000000e+00> : vector<40x128xf32>
    %191 = tpu.matmul %187, %190, %cst_296 {dimension_numbers = #tpu.dot_dimension_numbers<[1], [0], [0], [1], [0, 0, 1, 1], [], []>} : vector<40x128xbf16>, vector<128x128xbf16>, vector<40x128xf32> -> vector<40x128xf32>
    %192 = arith.addf %188, %191 : vector<40x128xf32>
    %c0_297 = arith.constant 0 : index
    %c0_298 = arith.constant 0 : index
    %193 = vector.load %arg9[%c0_297, %c0_298] : memref<40x128xf32, #tpu.memory_space<vmem>>, vector<40x128xf32>
    tpu.vector_store %arg9[%c0_297, %c0_298], %192 {strides = array<i32>} : memref<40x128xf32, #tpu.memory_space<vmem>>, vector<40x128xf32>,
    %c0_299 = arith.constant 0 : index
    %c0_300 = arith.constant 0 : index
    %c10_301 = arith.constant 10 : index
    %c0_302 = arith.constant 0 : index
    %194 = vector.load %arg4[%c0_299, %c0_300, %c10_301, %c0_302] : memref<1x1x100x128xbf16, #tpu.memory_space<vmem>>, vector<1x1x40x128xbf16>
    %195 = vector.shape_cast %194 : vector<1x1x40x128xbf16> to vector<40x128xbf16>
    %c0_303 = arith.constant 0 : index
    %c0_304 = arith.constant 0 : index
    %196 = vector.load %arg9[%c0_303, %c0_304] : memref<40x128xf32, #tpu.memory_space<vmem>>, vector<40x128xf32>
    %c2_305 = arith.constant 2 : index
    %c6_306 = arith.constant 6 : index
    %c0_307 = arith.constant 0 : index
    %c0_308 = arith.constant 0 : index
    %197 = vector.load %arg5[%c2_305, %c6_306, %c0_307, %c0_308] : memref<3x9x128x128xbf16, #tpu.memory_space<vmem>>, vector<1x1x128x128xbf16>
    %198 = vector.shape_cast %197 : vector<1x1x128x128xbf16> to vector<128x128xbf16>
    %cst_309 = arith.constant dense<0.000000e+00> : vector<40x128xf32>
    %199 = tpu.matmul %195, %198, %cst_309 {dimension_numbers = #tpu.dot_dimension_numbers<[1], [0], [0], [1], [0, 0, 1, 1], [], []>} : vector<40x128xbf16>, vector<128x128xbf16>, vector<40x128xf32> -> vector<40x128xf32>
    %200 = arith.addf %196, %199 : vector<40x128xf32>
    %c0_310 = arith.constant 0 : index
    %c0_311 = arith.constant 0 : index
    %201 = vector.load %arg9[%c0_310, %c0_311] : memref<40x128xf32, #tpu.memory_space<vmem>>, vector<40x128xf32>
    tpu.vector_store %arg9[%c0_310, %c0_311], %200 {strides = array<i32>} : memref<40x128xf32, #tpu.memory_space<vmem>>, vector<40x128xf32>,
    %c0_312 = arith.constant 0 : index
    %c0_313 = arith.constant 0 : index
    %c15_314 = arith.constant 15 : index
    %c0_315 = arith.constant 0 : index
    %202 = vector.load %arg4[%c0_312, %c0_313, %c15_314, %c0_315] : memref<1x1x100x128xbf16, #tpu.memory_space<vmem>>, vector<1x1x40x128xbf16>
    %203 = vector.shape_cast %202 : vector<1x1x40x128xbf16> to vector<40x128xbf16>
    %c0_316 = arith.constant 0 : index
    %c0_317 = arith.constant 0 : index
    %204 = vector.load %arg9[%c0_316, %c0_317] : memref<40x128xf32, #tpu.memory_space<vmem>>, vector<40x128xf32>
    %c2_318 = arith.constant 2 : index
    %c7_319 = arith.constant 7 : index
    %c0_320 = arith.constant 0 : index
    %c0_321 = arith.constant 0 : index
    %205 = vector.load %arg5[%c2_318, %c7_319, %c0_320, %c0_321] : memref<3x9x128x128xbf16, #tpu.memory_space<vmem>>, vector<1x1x128x128xbf16>
    %206 = vector.shape_cast %205 : vector<1x1x128x128xbf16> to vector<128x128xbf16>
    %cst_322 = arith.constant dense<0.000000e+00> : vector<40x128xf32>
    %207 = tpu.matmul %203, %206, %cst_322 {dimension_numbers = #tpu.dot_dimension_numbers<[1], [0], [0], [1], [0, 0, 1, 1], [], []>} : vector<40x128xbf16>, vector<128x128xbf16>, vector<40x128xf32> -> vector<40x128xf32>
    %208 = arith.addf %204, %207 : vector<40x128xf32>
    %c0_323 = arith.constant 0 : index
    %c0_324 = arith.constant 0 : index
    %209 = vector.load %arg9[%c0_323, %c0_324] : memref<40x128xf32, #tpu.memory_space<vmem>>, vector<40x128xf32>
    tpu.vector_store %arg9[%c0_323, %c0_324], %208 {strides = array<i32>} : memref<40x128xf32, #tpu.memory_space<vmem>>, vector<40x128xf32>,
    %c0_325 = arith.constant 0 : index
    %c0_326 = arith.constant 0 : index
    %c11_327 = arith.constant 11 : index
    %c0_328 = arith.constant 0 : index
    %210 = vector.load %arg4[%c0_325, %c0_326, %c11_327, %c0_328] : memref<1x1x100x128xbf16, #tpu.memory_space<vmem>>, vector<1x1x40x128xbf16>
    %211 = vector.shape_cast %210 : vector<1x1x40x128xbf16> to vector<40x128xbf16>
    %c0_329 = arith.constant 0 : index
    %c0_330 = arith.constant 0 : index
    %212 = vector.load %arg9[%c0_329, %c0_330] : memref<40x128xf32, #tpu.memory_space<vmem>>, vector<40x128xf32>
    %c2_331 = arith.constant 2 : index
    %c8_332 = arith.constant 8 : index
    %c0_333 = arith.constant 0 : index
    %c0_334 = arith.constant 0 : index
    %213 = vector.load %arg5[%c2_331, %c8_332, %c0_333, %c0_334] : memref<3x9x128x128xbf16, #tpu.memory_space<vmem>>, vector<1x1x128x128xbf16>
    %214 = vector.shape_cast %213 : vector<1x1x128x128xbf16> to vector<128x128xbf16>
    %cst_335 = arith.constant dense<0.000000e+00> : vector<40x128xf32>
    %215 = tpu.matmul %211, %214, %cst_335 {dimension_numbers = #tpu.dot_dimension_numbers<[1], [0], [0], [1], [0, 0, 1, 1], [], []>} : vector<40x128xbf16>, vector<128x128xbf16>, vector<40x128xf32> -> vector<40x128xf32>
    %216 = arith.addf %212, %215 : vector<40x128xf32>
    %c0_336 = arith.constant 0 : index
    %c0_337 = arith.constant 0 : index
    %217 = vector.load %arg9[%c0_336, %c0_337] : memref<40x128xf32, #tpu.memory_space<vmem>>, vector<40x128xf32>
    tpu.vector_store %arg9[%c0_336, %c0_337], %216 {strides = array<i32>} : memref<40x128xf32, #tpu.memory_space<vmem>>, vector<40x128xf32>,
    %c0_338 = arith.constant 0 : index
    %c0_339 = arith.constant 0 : index
    %218 = vector.load %arg9[%c0_338, %c0_339] : memref<40x128xf32, #tpu.memory_space<vmem>>, vector<40x128xf32>
    %c0_340 = arith.constant 0 : index
    %c0_341 = arith.constant 0 : index
    %219 = vector.load %arg6[%c0_340, %c0_341] : memref<1x128xf32, #tpu.memory_space<vmem>>, vector<1x128xf32>
    %220 = vector.broadcast %219 : vector<1x128xf32> to vector<40x128xf32>
    %221 = arith.mulf %218, %220 : vector<40x128xf32>
    %c0_342 = arith.constant 0 : index
    %c0_343 = arith.constant 0 : index
    %222 = vector.load %arg7[%c0_342, %c0_343] : memref<1x128xf32, #tpu.memory_space<vmem>>, vector<1x128xf32>
    %223 = vector.broadcast %222 : vector<1x128xf32> to vector<40x128xf32>
    %224 = arith.addf %221, %223 : vector<40x128xf32>
    %cst_344 = arith.constant 0.000000e+00 : f32
    %225 = vector.broadcast %cst_344 : f32 to vector<40x128xf32>
    %226 = arith.cmpf ogt, %224, %225 : vector<40x128xf32>
    %cst_345 = arith.constant 0.00999999977 : f32
    %227 = vector.broadcast %cst_345 : f32 to vector<40x128xf32>
    %228 = arith.mulf %227, %224 : vector<40x128xf32>
    %229 = arith.select %226, %224, %228 : vector<40x128xi1>, vector<40x128xf32>
    %230 = arith.truncf %229 : vector<40x128xf32> to vector<40x128xbf16>
    %c0_346 = arith.constant 0 : index
    %c0_347 = arith.constant 0 : index
    %c0_348 = arith.constant 0 : index
    %c0_349 = arith.constant 0 : index
    %231 = vector.load %arg8[%c0_346, %c0_347, %c0_348, %c0_349] : memref<1x1x40x128xbf16, #tpu.memory_space<vmem>>, vector<1x1x40x128xbf16>
    %232 = vector.shape_cast %231 : vector<1x1x40x128xbf16> to vector<40x128xbf16>
    %233 = vector.shape_cast %230 : vector<40x128xbf16> to vector<1x1x40x128xbf16>
    tpu.vector_store %arg8[%c0_346, %c0_347, %c0_348, %c0_349], %233 {strides = array<i32>} : memref<1x1x40x128xbf16, #tpu.memory_space<vmem>>, vector<1x1x40x128xbf16>,
    return
  }
  func.func @transform_0(%arg0: i32, %arg1: i32) -> (i32, i32, i32, i32) {
    %c2_i32 = arith.constant 2 : i32
    %0 = arith.muli %arg1, %c2_i32 : i32
    %c0_i32 = arith.constant 0 : i32
    %1 = arith.addi %0, %c0_i32 : i32
    %c0_i32_0 = arith.constant 0 : i32
    %c0_i32_1 = arith.constant 0 : i32
    %c0_i32_2 = arith.constant 0 : i32
    return %arg0, %1, %c0_i32_0, %c0_i32_1 : i32, i32, i32, i32
  }
  func.func @transform_1(%arg0: i32, %arg1: i32) -> (i32, i32, i32, i32) {
    %c2_i32 = arith.constant 2 : i32
    %0 = arith.muli %arg1, %c2_i32 : i32
    %c1_i32 = arith.constant 1 : i32
    %1 = arith.addi %0, %c1_i32 : i32
    %c0_i32 = arith.constant 0 : i32
    %c0_i32_0 = arith.constant 0 : i32
    %c0_i32_1 = arith.constant 0 : i32
    return %arg0, %1, %c0_i32, %c0_i32_0 : i32, i32, i32, i32
  }
  func.func @transform_2(%arg0: i32, %arg1: i32) -> (i32, i32, i32, i32) {
    %c2_i32 = arith.constant 2 : i32
    %0 = arith.muli %arg1, %c2_i32 : i32
    %c2_i32_0 = arith.constant 2 : i32
    %1 = arith.addi %0, %c2_i32_0 : i32
    %c0_i32 = arith.constant 0 : i32
    %c0_i32_1 = arith.constant 0 : i32
    %c0_i32_2 = arith.constant 0 : i32
    return %arg0, %1, %c0_i32, %c0_i32_1 : i32, i32, i32, i32
  }
  func.func @transform_3(%arg0: i32, %arg1: i32) -> (i32, i32, i32, i32) {
    %c0_i32 = arith.constant 0 : i32
    %c0_i32_0 = arith.constant 0 : i32
    %c0_i32_1 = arith.constant 0 : i32
    %c0_i32_2 = arith.constant 0 : i32
    %c0_i32_3 = arith.constant 0 : i32
    return %c0_i32, %c0_i32_0, %c0_i32_1, %c0_i32_2 : i32, i32, i32, i32
  }
  func.func @transform_4(%arg0: i32, %arg1: i32) -> (i32, i32) {
    %c0_i32 = arith.constant 0 : i32
    %c0_i32_0 = arith.constant 0 : i32
    %c0_i32_1 = arith.constant 0 : i32
    return %c0_i32, %c0_i32_0 : i32, i32
  }
  func.func @transform_5(%arg0: i32, %arg1: i32) -> (i32, i32) {
    %c0_i32 = arith.constant 0 : i32
    %c0_i32_0 = arith.constant 0 : i32
    %c0_i32_1 = arith.constant 0 : i32
    return %c0_i32, %c0_i32_0 : i32, i32
  }
  func.func @transform_6(%arg0: i32, %arg1: i32) -> (i32, i32, i32, i32) {
    %c0_i32 = arith.constant 0 : i32
    %c0_i32_0 = arith.constant 0 : i32
    %c0_i32_1 = arith.constant 0 : i32
    return %arg0, %arg1, %c0_i32, %c0_i32_0 : i32, i32, i32, i32
  }
}

module attributes {stable_mosaic.version = 11 : i64} {
  func.func @_gemm_kernel(%arg0: i32, %arg1: i32, %arg2: memref<128x128xbf16, #tpu.memory_space<vmem>>, %arg3: memref<128x128xbf16, #tpu.memory_space<vmem>>, %arg4: memref<1x128xf32, #tpu.memory_space<vmem>>, %arg5: memref<1x128xf32, #tpu.memory_space<vmem>>, %arg6: memref<128x8xbf16, #tpu.memory_space<vmem>>, %arg7: memref<8x128xbf16, #tpu.memory_space<vmem>>, %arg8: memref<1x128xf32, #tpu.memory_space<vmem>>, %arg9: memref<1x128xf32, #tpu.memory_space<vmem>>, %arg10: memref<128x128xf32, #tpu.memory_space<vmem>>, %arg11: memref<128x128xf32, #tpu.memory_space<vmem>>) attributes {dimension_semantics = [#tpu.dimension_semantics<parallel>, #tpu.dimension_semantics<arbitrary>], iteration_bounds = array<i64: 1, 1>, scalar_prefetch = 0 : i64, scratch_operands = 1 : i64, tpu.core_type = #tpu.core_type<tc>, window_params = [{transform_indices = @transform_0, window_bounds = array<i64: 128, 128>}, {transform_indices = @transform_1, window_bounds = array<i64: 128, 128>}, {pipeline_mode = #tpu.pipeline_mode<synchronous>, transform_indices = @transform_2, window_bounds = array<i64: 1, 128>}, {pipeline_mode = #tpu.pipeline_mode<synchronous>, transform_indices = @transform_3, window_bounds = array<i64: 1, 128>}, {transform_indices = @transform_4, window_bounds = array<i64: 128, 8>}, {pipeline_mode = #tpu.pipeline_mode<synchronous>, transform_indices = @transform_5, window_bounds = array<i64: 8, 128>}, {pipeline_mode = #tpu.pipeline_mode<synchronous>, transform_indices = @transform_6, window_bounds = array<i64: 1, 128>}, {pipeline_mode = #tpu.pipeline_mode<synchronous>, transform_indices = @transform_7, window_bounds = array<i64: 1, 128>}, {transform_indices = @transform_8, window_bounds = array<i64: 128, 128>}]} {
    %c0_i32 = arith.constant 0 : i32
    %0 = arith.cmpi eq, %arg1, %c0_i32 : i32
    %1 = arith.extui %0 : i1 to i32
    %c0_i32_0 = arith.constant 0 : i32
    %2 = arith.cmpi ne, %1, %c0_i32_0 : i32
    scf.if %2 {
      %cst_10 = arith.constant 0.000000e+00 : f32
      %12 = vector.broadcast %cst_10 : f32 to vector<128x128xf32>
      %c0_11 = arith.constant 0 : index
      %c0_12 = arith.constant 0 : index
      %13 = vector.load %arg11[%c0_11, %c0_12] : memref<128x128xf32, #tpu.memory_space<vmem>>, vector<128x128xf32>
      tpu.vector_store %arg11[%c0_11, %c0_12], %12 {strides = array<i32>} : memref<128x128xf32, #tpu.memory_space<vmem>>, vector<128x128xf32>,
    } else {
    }
    %c0 = arith.constant 0 : index
    %c0_1 = arith.constant 0 : index
    %3 = vector.load %arg11[%c0, %c0_1] : memref<128x128xf32, #tpu.memory_space<vmem>>, vector<128x128xf32>
    %c0_2 = arith.constant 0 : index
    %c0_3 = arith.constant 0 : index
    %4 = vector.load %arg2[%c0_2, %c0_3] : memref<128x128xbf16, #tpu.memory_space<vmem>>, vector<128x128xbf16>
    %c0_4 = arith.constant 0 : index
    %c0_5 = arith.constant 0 : index
    %5 = vector.load %arg3[%c0_4, %c0_5] : memref<128x128xbf16, #tpu.memory_space<vmem>>, vector<128x128xbf16>
    %cst = arith.constant dense<0.000000e+00> : vector<128x128xf32>
    %6 = tpu.matmul %4, %5, %cst {dimension_numbers = #tpu.dot_dimension_numbers<[1], [0], [0], [1], [0, 0, 1, 1], [], []>} : vector<128x128xbf16>, vector<128x128xbf16>, vector<128x128xf32> -> vector<128x128xf32>
    %7 = arith.addf %3, %6 : vector<128x128xf32>
    %c0_6 = arith.constant 0 : index
    %c0_7 = arith.constant 0 : index
    %8 = vector.load %arg11[%c0_6, %c0_7] : memref<128x128xf32, #tpu.memory_space<vmem>>, vector<128x128xf32>
    tpu.vector_store %arg11[%c0_6, %c0_7], %7 {strides = array<i32>} : memref<128x128xf32, #tpu.memory_space<vmem>>, vector<128x128xf32>,
    %c0_i32_8 = arith.constant 0 : i32
    %9 = arith.cmpi eq, %arg1, %c0_i32_8 : i32
    %10 = arith.extui %9 : i1 to i32
    %c0_i32_9 = arith.constant 0 : i32
    %11 = arith.cmpi ne, %10, %c0_i32_9 : i32
    scf.if %11 {
      %c0_10 = arith.constant 0 : index
      %c0_11 = arith.constant 0 : index
      %12 = vector.load %arg11[%c0_10, %c0_11] : memref<128x128xf32, #tpu.memory_space<vmem>>, vector<128x128xf32>
      %c0_12 = arith.constant 0 : index
      %c0_13 = arith.constant 0 : index
      %13 = vector.load %arg4[%c0_12, %c0_13] : memref<1x128xf32, #tpu.memory_space<vmem>>, vector<1x128xf32>
      %14 = vector.broadcast %13 : vector<1x128xf32> to vector<128x128xf32>
      %15 = arith.mulf %12, %14 : vector<128x128xf32>
      %c0_14 = arith.constant 0 : index
      %c0_15 = arith.constant 0 : index
      %16 = vector.load %arg5[%c0_14, %c0_15] : memref<1x128xf32, #tpu.memory_space<vmem>>, vector<1x128xf32>
      %17 = vector.broadcast %16 : vector<1x128xf32> to vector<128x128xf32>
      %18 = arith.addf %15, %17 : vector<128x128xf32>
      %c0_16 = arith.constant 0 : index
      %c0_17 = arith.constant 0 : index
      %19 = vector.load %arg6[%c0_16, %c0_17] : memref<128x8xbf16, #tpu.memory_space<vmem>>, vector<128x8xbf16>
      %c0_18 = arith.constant 0 : index
      %c0_19 = arith.constant 0 : index
      %20 = vector.load %arg7[%c0_18, %c0_19] : memref<8x128xbf16, #tpu.memory_space<vmem>>, vector<8x128xbf16>
      %cst_20 = arith.constant dense<0.000000e+00> : vector<128x128xf32>
      %21 = tpu.matmul %19, %20, %cst_20 {dimension_numbers = #tpu.dot_dimension_numbers<[1], [0], [0], [1], [0, 0, 1, 1], [], []>} : vector<128x8xbf16>, vector<8x128xbf16>, vector<128x128xf32> -> vector<128x128xf32>
      %c0_21 = arith.constant 0 : index
      %c0_22 = arith.constant 0 : index
      %22 = vector.load %arg8[%c0_21, %c0_22] : memref<1x128xf32, #tpu.memory_space<vmem>>, vector<1x128xf32>
      %23 = vector.broadcast %22 : vector<1x128xf32> to vector<128x128xf32>
      %24 = arith.mulf %21, %23 : vector<128x128xf32>
      %25 = arith.addf %18, %24 : vector<128x128xf32>
      %c0_23 = arith.constant 0 : index
      %c0_24 = arith.constant 0 : index
      %26 = vector.load %arg9[%c0_23, %c0_24] : memref<1x128xf32, #tpu.memory_space<vmem>>, vector<1x128xf32>
      %27 = vector.broadcast %26 : vector<1x128xf32> to vector<128x128xf32>
      %28 = arith.addf %25, %27 : vector<128x128xf32>
      %cst_25 = arith.constant 0.000000e+00 : f32
      %29 = vector.broadcast %cst_25 : f32 to vector<128x128xf32>
      %30 = arith.cmpf ogt, %28, %29 : vector<128x128xf32>
      %cst_26 = arith.constant 0.00999999977 : f32
      %31 = vector.broadcast %cst_26 : f32 to vector<128x128xf32>
      %32 = arith.mulf %31, %28 : vector<128x128xf32>
      %33 = arith.select %30, %28, %32 : vector<128x128xi1>, vector<128x128xf32>
      %c0_27 = arith.constant 0 : index
      %c0_28 = arith.constant 0 : index
      %34 = vector.load %arg10[%c0_27, %c0_28] : memref<128x128xf32, #tpu.memory_space<vmem>>, vector<128x128xf32>
      tpu.vector_store %arg10[%c0_27, %c0_28], %33 {strides = array<i32>} : memref<128x128xf32, #tpu.memory_space<vmem>>, vector<128x128xf32>,
    } else {
    }
    return
  }
  func.func @transform_0(%arg0: i32, %arg1: i32) -> (i32, i32) {
    %c0_i32 = arith.constant 0 : i32
    return %arg0, %arg1 : i32, i32
  }
  func.func @transform_1(%arg0: i32, %arg1: i32) -> (i32, i32) {
    %c0_i32 = arith.constant 0 : i32
    %c0_i32_0 = arith.constant 0 : i32
    return %arg1, %c0_i32 : i32, i32
  }
  func.func @transform_2(%arg0: i32, %arg1: i32) -> (i32, i32) {
    %c0_i32 = arith.constant 0 : i32
    %c0_i32_0 = arith.constant 0 : i32
    %c0_i32_1 = arith.constant 0 : i32
    return %c0_i32, %c0_i32_0 : i32, i32
  }
  func.func @transform_3(%arg0: i32, %arg1: i32) -> (i32, i32) {
    %c0_i32 = arith.constant 0 : i32
    %c0_i32_0 = arith.constant 0 : i32
    %c0_i32_1 = arith.constant 0 : i32
    return %c0_i32, %c0_i32_0 : i32, i32
  }
  func.func @transform_4(%arg0: i32, %arg1: i32) -> (i32, i32) {
    %c0_i32 = arith.constant 0 : i32
    %c0_i32_0 = arith.constant 0 : i32
    return %arg0, %c0_i32 : i32, i32
  }
  func.func @transform_5(%arg0: i32, %arg1: i32) -> (i32, i32) {
    %c0_i32 = arith.constant 0 : i32
    %c0_i32_0 = arith.constant 0 : i32
    %c0_i32_1 = arith.constant 0 : i32
    return %c0_i32, %c0_i32_0 : i32, i32
  }
  func.func @transform_6(%arg0: i32, %arg1: i32) -> (i32, i32) {
    %c0_i32 = arith.constant 0 : i32
    %c0_i32_0 = arith.constant 0 : i32
    %c0_i32_1 = arith.constant 0 : i32
    return %c0_i32, %c0_i32_0 : i32, i32
  }
  func.func @transform_7(%arg0: i32, %arg1: i32) -> (i32, i32) {
    %c0_i32 = arith.constant 0 : i32
    %c0_i32_0 = arith.constant 0 : i32
    %c0_i32_1 = arith.constant 0 : i32
    return %c0_i32, %c0_i32_0 : i32, i32
  }
  func.func @transform_8(%arg0: i32, %arg1: i32) -> (i32, i32) {
    %c0_i32 = arith.constant 0 : i32
    %c0_i32_0 = arith.constant 0 : i32
    return %arg0, %c0_i32 : i32, i32
  }
}

</mosaic_0001>

<bundles_post_ra>
// kernel: block_forward.3
= control target key start
LH: loop header
LB: loop body
LE: loop exit
PB: predicated region body
PF: predicated region fallthrough
CT: control target
= control target key end

     0   :  { %s2526_s15 = smov 0   ;;  %s2528_s16 = smov 0   ;;  %s2904_s0 = inlined_call_operand.vmem [shape: bf16[1024,8], index: 0, kind: input, shape index: {}]   ;;  %s2905_s1 = inlined_call_operand.vmem [shape: bf16[8,128], index: 1, kind: input, shape index: {}]   ;;  %s2906_s2 = inlined_call_operand.vmem [shape: f32[1,128], index: 2, kind: input, shape index: {}]   ;;  %s2907_s3 = inlined_call_operand.vmem [shape: f32[1,128], index: 3, kind: input, shape index: {}]   ;;  %s2908_s4 = inlined_call_operand.vmem [shape: bf16[1024,128], index: 4, kind: output, shape index: {}]  }
   0x1   :  { %s2530_s17 = smov 0  }
   0x2 LB: > { %s26_s18 = sadd.s32 1, %s2495_s16  ;;  %p1926_p0 = scmp.ge.s32.totalorder %s2499_s17, 1  ;;  %s2499_s17 = sphi %s2530_s17, %s14_s17   ;;  %s2495_s16 = sphi %s2528_s16, %s2910_s16   ;;  %s2491_s15 = sphi %s2526_s15, %s2909_s15  }
   0x3   : > { %p28_p1 = scmp.ge.s32.totalorder %s26_s18, 2  ;;  %p189_p2 = scmp.lt.s32.totalorder %s2499_s17, 3 }
   0x5   : > { %s2912_s18 = smov (%p28_p1, %s26_s18), 0  ;;  %p190_p3 = pnand %p1926_p0, %p189_p2 }
   0x6   : > { %v438_v0 = vld [vmem:[%s2905_s1] sm:$0xf] (!%p190_p3)  ;;  %vm696_vm0 = vcmask (!%p190_p3), 1043456   ;;  %s1927_s21 = sshll.u32 (!%p190_p3), %s2491_s15, 6  ;;  %vm599_vm1 = vcmask (!%p190_p3), 64512  }
   0x7   : > { %193 = sbr.rel (%p190_p3) target bundleno = 325 (0x145), region = 36  ;;  %2419 = vmatprep.subr.msk.bf16.mxu0 (!%p190_p3), %vm696_vm0, %v438_v0  ;;  %2420 = vmatprep.subr.msk.bf16.mxu1 (!%p190_p3), %vm696_vm0, %v438_v0  ;;  %v698_v1 = vsel (!%p190_p3), %vm696_vm0, %v438_v0, 0  ;;  %p223_p4 = scmp.lt.s32.totalorder (!%p190_p3), %s1927_s21, 127  ;;  %v2624_v34 = vld [vmem:[%s2906_s2] ss:$0 sm:$0xff] (!%p190_p3) }
   0x8   : > { %2352 = vmatpush3.bf16.msra.mxu0 (!%p190_p3), %v698_v1  ;;  %2418 = vmatpush3.bf16.msra.mxu1 (!%p190_p3), %v698_v1  ;;  %v2629_v36 = vld [vmem:[%s2907_s3] ss:$0 sm:$0xff] (!%p190_p3) }
   0xe   : > { %s2914_s21 = smov (!%p223_p4, %s1927_s21), 127 }
   0xf   : > { %s1928_s22 = sshll.u32 %s2914_s21, 2 }
  0x10   : > { %s2555_s25 = scalar_lea.vmem %s2904_s0, %s1928_s22  ;;  %s2652_s6 = scalar_lea.vmem %s2908_s4, %s1928_s22 }
  0x11   : > { %v2445_v2 = vld [vmem:[%s2555_s25] sm:$0xff]   ;;  %v2447_v4 = vld [vmem:[%s2555_s25 + $0x8] sm:$0xff]   ;;  %v2449_v6 = vld [vmem:[%s2555_s25 + $0x10] sm:$0xff]  }
  0x12   : > { %v2446_v3 = vld [vmem:[%s2555_s25 + $0x80] sm:$0xff]   ;;  %2353 = vmatprep.mubr.msk.bf16.mxu0 %vm599_vm1, %v2445_v2  ;;  %v2448_v5 = vld [vmem:[%s2555_s25 + $0x88] sm:$0xff]   ;;  %v2450_v7 = vld [vmem:[%s2555_s25 + $0x90] sm:$0xff]  }
  0x13   : > { %2385 = vmatprep.mubr.msk.bf16.mxu1 %vm599_vm1, %v2446_v3  ;;  %2354 = vmatmul.mubr.msk.bf16.vlgmr.msra.gmra.mrb[0].mxu0 %vm599_vm1, %v2447_v4  ;;  %v2451_v8 = vld [vmem:[%s2555_s25 + $0x18] sm:$0xff]   ;;  %v2453_v10 = vld [vmem:[%s2555_s25 + $0x20] sm:$0xff]   ;;  %v2455_v12 = vld [vmem:[%s2555_s25 + $0x28] sm:$0xff]  }
  0x14   : > { %2386 = vmatmul.mubr.msk.bf16.vlgmr.msra.gmra.mrb[0].mxu1 %vm599_vm1, %v2448_v5  ;;  %2357 = vmatprep.mubr.msk.bf16.mxu0 %vm599_vm1, %v2449_v6  ;;  %v2452_v9 = vld [vmem:[%s2555_s25 + $0x98] sm:$0xff]   ;;  %v2454_v11 = vld [vmem:[%s2555_s25 + $0xa0] sm:$0xff]   ;;  %v2456_v13 = vld [vmem:[%s2555_s25 + $0xa8] sm:$0xff]  }
  0x15   : > { %2389 = vmatprep.mubr.msk.bf16.mxu1 %vm599_vm1, %v2450_v7  ;;  %v2457_v14 = vld [vmem:[%s2555_s25 + $0x30] sm:$0xff]   ;;  %v2459_v16 = vld [vmem:[%s2555_s25 + $0x38] sm:$0xff]   ;;  %v2461_v18 = vld [vmem:[%s2555_s25 + $0x40] sm:$0xff]  }
  0x16   : > { %v2458_v15 = vld [vmem:[%s2555_s25 + $0xb0] sm:$0xff]   ;;  %v2460_v17 = vld [vmem:[%s2555_s25 + $0xb8] sm:$0xff]   ;;  %v2462_v19 = vld [vmem:[%s2555_s25 + $0xc0] sm:$0xff]  }
  0x17   : > { %v2463_v20 = vld [vmem:[%s2555_s25 + $0x48] sm:$0xff]   ;;  %v2465_v22 = vld [vmem:[%s2555_s25 + $0x50] sm:$0xff]   ;;  %v2467_v24 = vld [vmem:[%s2555_s25 + $0x58] sm:$0xff]  }
  0x18   : > { %v2464_v21 = vld [vmem:[%s2555_s25 + $0xc8] sm:$0xff]   ;;  %v2466_v23 = vld [vmem:[%s2555_s25 + $0xd0] sm:$0xff]   ;;  %v2468_v25 = vld [vmem:[%s2555_s25 + $0xd8] sm:$0xff]  }
  0x19   : > { %v2469_v26 = vld [vmem:[%s2555_s25 + $0x60] sm:$0xff]   ;;  %v2471_v28 = vld [vmem:[%s2555_s25 + $0x68] sm:$0xff]   ;;  %v2473_v30 = vld [vmem:[%s2555_s25 + $0x70] sm:$0xff]  }
  0x1a   : > { %v2470_v27 = vld [vmem:[%s2555_s25 + $0xe0] sm:$0xff]   ;;  %v2472_v29 = vld [vmem:[%s2555_s25 + $0xe8] sm:$0xff]   ;;  %v2474_v31 = vld [vmem:[%s2555_s25 + $0xf0] sm:$0xff]  }
  0x1b   : > { %2358 = vmatmul.mubr.msk.bf16.gmra.mrb[4].mxu0 %vm599_vm1, %v2451_v8  ;;  %v2475_v32 = vld [vmem:[%s2555_s25 + $0x78] sm:$0xff]  }
  0x1c   : > { %2390 = vmatmul.mubr.msk.bf16.gmra.mrb[4].mxu1 %vm599_vm1, %v2452_v9  ;;  %2361 = vmatprep.mubr.msk.bf16.mxu0 %vm599_vm1, %v2453_v10  ;;  %v2476_v33 = vld [vmem:[%s2555_s25 + $0xf8] sm:$0xff]  }
  0x1d   : > { %2393 = vmatprep.mubr.msk.bf16.mxu1 %vm599_vm1, %v2454_v11 }
  0x23   : > { %2362 = vmatmul.mubr.msk.bf16.gmra.mrb[8].mxu0 %vm599_vm1, %v2455_v12 }
  0x24   : > { %2394 = vmatmul.mubr.msk.bf16.gmra.mrb[8].mxu1 %vm599_vm1, %v2456_v13  ;;  %2365 = vmatprep.mubr.msk.bf16.mxu0 %vm599_vm1, %v2457_v14 }
  0x25   : > { %2397 = vmatprep.mubr.msk.bf16.mxu1 %vm599_vm1, %v2458_v15 }
  0x2b   : > { %2366 = vmatmul.mubr.msk.bf16.gmra.mrb[12].mxu0 %vm599_vm1, %v2459_v16 }
  0x2c   : > { %2398 = vmatmul.mubr.msk.bf16.gmra.mrb[12].mxu1 %vm599_vm1, %v2460_v17  ;;  %2369 = vmatprep.mubr.msk.bf16.mxu0 %vm599_vm1, %v2461_v18 }
  0x2d   : > { %2401 = vmatprep.mubr.msk.bf16.mxu1 %vm599_vm1, %v2462_v19 }
  0x33   : > { %2370 = vmatmul.mubr.msk.bf16.gmra.mrb[16].mxu0 %vm599_vm1, %v2463_v20 }
  0x34   : > { %2402 = vmatmul.mubr.msk.bf16.gmra.mrb[16].mxu1 %vm599_vm1, %v2464_v21  ;;  %2373 = vmatprep.mubr.msk.bf16.mxu0 %vm599_vm1, %v2465_v22 }
  0x35   : > { %2405 = vmatprep.mubr.msk.bf16.mxu1 %vm599_vm1, %v2466_v23 }
  0x3b   : > { %2374 = vmatmul.mubr.msk.bf16.gmra.mrb[20].mxu0 %vm599_vm1, %v2467_v24 }
  0x3c   : > { %2406 = vmatmul.mubr.msk.bf16.gmra.mrb[20].mxu1 %vm599_vm1, %v2468_v25  ;;  %2377 = vmatprep.mubr.msk.bf16.mxu0 %vm599_vm1, %v2469_v26 }
  0x3d   : > { %2409 = vmatprep.mubr.msk.bf16.mxu1 %vm599_vm1, %v2470_v27 }
  0x43   : > { %2378 = vmatmul.mubr.msk.bf16.gmra.mrb[24].mxu0 %vm599_vm1, %v2471_v28 }
  0x44   : > { %2410 = vmatmul.mubr.msk.bf16.gmra.mrb[24].mxu1 %vm599_vm1, %v2472_v29  ;;  %2381 = vmatprep.mubr.msk.bf16.mxu0 %vm599_vm1, %v2473_v30 }
  0x45   : > { %2413 = vmatprep.mubr.msk.bf16.mxu1 %vm599_vm1, %v2474_v31 }
  0x4b   : > { %2382 = vmatmul.mubr.msk.bf16.gmra.mrb[28].mxu0 %vm599_vm1, %v2475_v32 }
  0x4c   : > { %2414 = vmatmul.mubr.msk.bf16.gmra.mrb[28].mxu1 %vm599_vm1, %v2476_v33 }
  0xe6   : > { %v2355_v35 = vpop.f32.mrb[0].mxu0 }
  0xe7   : > { %v1193_v37 = vmul.f32 %v2355_v35, %v2624_v34  ;;  %v2387_v38 = vpop.f32.mrb[0].mxu1  ;;  %v734_v39 = vpop.f32.mrb[1].mxu0 }
  0xe8   : > { %v1225_v40 = vmul.f32 %v2387_v38, %v2624_v34  ;;  %v1191_v41 = vmul.f32 %v2624_v34, %v734_v39  ;;  %v862_v42 = vpop.f32.mrb[1].mxu1  ;;  %v2356_v43 = vpop.f32.mrb[2].mxu0 }
  0xe9   : > { %v1264_v44 = vadd.f32 %v2629_v36, %v1193_v37  ;;  %v1223_v45 = vmul.f32 %v2624_v34, %v862_v42  ;;  %v1194_v46 = vmul.f32 %v2356_v43, %v2624_v34  ;;  %v2388_v47 = vpop.f32.mrb[2].mxu1  ;;  %v737_v48 = vpop.f32.mrb[3].mxu0 }
  0xea   : > { %v1296_v49 = vadd.f32 %v2629_v36, %v1225_v40  ;;  %v1262_v50 = vadd.f32 %v2629_v36, %v1191_v41  ;;  %v1226_v51 = vmul.f32 %v2388_v47, %v2624_v34  ;;  %v1192_v52 = vmul.f32 %v2624_v34, %v737_v48  ;;  %v865_v53 = vpop.f32.mrb[3].mxu1 }
  0xeb   : > { %vm1328_vm2 = vcmp.gt.f32.partialorder %v1264_v44, 0.0  ;;  %v1392_v54 = vmul.f32 0.01, %v1264_v44  ;;  %v1294_v55 = vadd.f32 %v2629_v36, %v1223_v45  ;;  %v1265_v56 = vadd.f32 %v2629_v36, %v1194_v46 }
  0xec   : > { %vm1360_vm3 = vcmp.gt.f32.partialorder %v1296_v49, 0.0  ;;  %v1424_v57 = vmul.f32 0.01, %v1296_v49  ;;  %vm1326_vm4 = vcmp.gt.f32.partialorder %v1262_v50, 0.0  ;;  %v1390_v58 = vmul.f32 0.01, %v1262_v50 }
  0xed   : > { %v1456_v59 = vsel %vm1328_vm2, %v1264_v44, %v1392_v54  ;;  %vm1358_vm5 = vcmp.gt.f32.partialorder %v1294_v55, 0.0  ;;  %v1422_v60 = vmul.f32 0.01, %v1294_v55  ;;  %vm1329_vm6 = vcmp.gt.f32.partialorder %v1265_v56, 0.0 }
  0xee   : > { %v1488_v61 = vsel %vm1360_vm3, %v1296_v49, %v1424_v57  ;;  %v1454_v62 = vsel %vm1326_vm4, %v1262_v50, %v1390_v58  ;;  %v1393_v63 = vmul.f32 0.01, %v1265_v56  ;;  %v1297_v0 = vadd.f32 %v2629_v36, %v1226_v51  ;;  %v2359_v1 = vpop.f32.mrb[4].mxu0 }
  0xef   : > { %v1486_v2 = vsel %vm1358_vm5, %v1294_v55, %v1422_v60  ;;  %v1263_v3 = vadd.f32 %v2629_v36, %v1192_v52  ;;  %v1224_v4 = vmul.f32 %v2624_v34, %v865_v53  ;;  %v1197_v5 = vmul.f32 %v2359_v1, %v2624_v34  ;;  %v2391_v6 = vpop.f32.mrb[4].mxu1  ;;  %v750_v7 = vpop.f32.mrb[5].mxu0 }
  0xf0   : > { %v1457_v8 = vsel %vm1329_vm6, %v1265_v56, %v1393_v63  ;;  %vm1361_vm7 = vcmp.gt.f32.partialorder %v1297_v0, 0.0  ;;  %v1425_v9 = vmul.f32 0.01, %v1297_v0  ;;  %v1229_v10 = vmul.f32 %v2391_v6, %v2624_v34  ;;  %v878_v11 = vpop.f32.mrb[5].mxu1  ;;  %v2360_v12 = vpop.f32.mrb[6].mxu0 }
  0xf1   : > { %v2135_v13 = vpack.c.bf16 %v1457_v8, %v1456_v59  ;;  %vm1327_vm8 = vcmp.gt.f32.partialorder %v1263_v3, 0.0  ;;  %v1391_v14 = vmul.f32 0.01, %v1263_v3  ;;  %v1295_v15 = vadd.f32 %v2629_v36, %v1224_v4  ;;  %v2392_v16 = vpop.f32.mrb[6].mxu1  ;;  %v753_v17 = vpop.f32.mrb[7].mxu0 }
  0xf2   : > { %v1489_v18 = vsel %vm1361_vm7, %v1297_v0, %v1425_v9  ;;  %v1268_v19 = vadd.f32 %v2629_v36, %v1197_v5  ;;  %v1300_v20 = vadd.f32 %v2629_v36, %v1229_v10  ;;  %v1195_v21 = vmul.f32 %v2624_v34, %v750_v7  ;;  %v881_v22 = vpop.f32.mrb[7].mxu1 }
  0xf3   : > { %2287 = vst [vmem:[%s2652_s6 + $0x8] sm:$0xff] %v2135_v13   ;;  %v2215_v23 = vpack.c.bf16 %v1489_v18, %v1488_v61  ;;  %v1455_v24 = vsel %vm1327_vm8, %v1263_v3, %v1391_v14  ;;  %vm1359_vm9 = vcmp.gt.f32.partialorder %v1295_v15, 0.0  ;;  %v1423_v25 = vmul.f32 0.01, %v1295_v15 }
  0xf4   : > { %v2130_v26 = vpack.c.bf16 %v1455_v24, %v1454_v62  ;;  %vm1332_vm10 = vcmp.gt.f32.partialorder %v1268_v19, 0.0  ;;  %v1396_v27 = vmul.f32 0.01, %v1268_v19  ;;  %vm1364_vm11 = vcmp.gt.f32.partialorder %v1300_v20, 0.0 }
  0xf5   : > { %2303 = vst [vmem:[%s2652_s6 + $0x88] sm:$0xff] %v2215_v23   ;;  %v1487_v28 = vsel %vm1359_vm9, %v1295_v15, %v1423_v25  ;;  %v1428_v29 = vmul.f32 0.01, %v1300_v20  ;;  %v1266_v30 = vadd.f32 %v2629_v36, %v1195_v21  ;;  %v1227_v31 = vmul.f32 %v2624_v34, %v878_v11 }
  0xf6   : > { %2131 = vst [vmem:[%s2652_s6] sm:$0xff] %v2130_v26   ;;  %v2210_v32 = vpack.c.bf16 %v1487_v28, %v1486_v2  ;;  %v1460_v33 = vsel %vm1332_vm10, %v1268_v19, %v1396_v27  ;;  %v1198_v35 = vmul.f32 %v2360_v12, %v2624_v34  ;;  %v1230_v37 = vmul.f32 %v2392_v16, %v2624_v34  ;;  %v2363_v38 = vpop.f32.mrb[8].mxu0 }
  0xf7   : > { %v1492_v39 = vsel %vm1364_vm11, %v1300_v20, %v1428_v29  ;;  %vm1330_vm12 = vcmp.gt.f32.partialorder %v1266_v30, 0.0  ;;  %v1394_v40 = vmul.f32 0.01, %v1266_v30  ;;  %v1298_v41 = vadd.f32 %v2629_v36, %v1227_v31  ;;  %v2395_v42 = vpop.f32.mrb[8].mxu1  ;;  %v766_v43 = vpop.f32.mrb[9].mxu0 }
  0xf8   : > { %2302 = vst [vmem:[%s2652_s6 + $0x80] sm:$0xff] %v2210_v32   ;;  %v1269_v44 = vadd.f32 %v2629_v36, %v1198_v35  ;;  %v1301_v45 = vadd.f32 %v2629_v36, %v1230_v37  ;;  %v1196_v46 = vmul.f32 %v2624_v34, %v753_v17  ;;  %v1228_v47 = vmul.f32 %v2624_v34, %v881_v22  ;;  %v894_v48 = vpop.f32.mrb[9].mxu1  ;;  %v2364_v49 = vpop.f32.mrb[10].mxu0 }
  0xf9   : > { %v1458_v50 = vsel %vm1330_vm12, %v1266_v30, %v1394_v40  ;;  %vm1362_vm13 = vcmp.gt.f32.partialorder %v1298_v41, 0.0  ;;  %v1426_v51 = vmul.f32 0.01, %v1298_v41  ;;  %v1201_v52 = vmul.f32 %v2363_v38, %v2624_v34  ;;  %v2396_v53 = vpop.f32.mrb[10].mxu1  ;;  %v769_v54 = vpop.f32.mrb[11].mxu0 }
  0xfa   : > { %vm1333_vm14 = vcmp.gt.f32.partialorder %v1269_v44, 0.0  ;;  %v1397_v55 = vmul.f32 0.01, %v1269_v44  ;;  %vm1365_vm15 = vcmp.gt.f32.partialorder %v1301_v45, 0.0  ;;  %v1429_v56 = vmul.f32 0.01, %v1301_v45 }
  0xfb   : > { %v1490_v57 = vsel %vm1362_vm13, %v1298_v41, %v1426_v51  ;;  %v1267_v58 = vadd.f32 %v2629_v36, %v1196_v46  ;;  %v1299_v59 = vadd.f32 %v2629_v36, %v1228_v47  ;;  %v1272_v60 = vadd.f32 %v2629_v36, %v1201_v52  ;;  %v897_v61 = vpop.f32.mrb[11].mxu1 }
  0xfc   : > { %v1461_v62 = vsel %vm1333_vm14, %v1269_v44, %v1397_v55  ;;  %v1493_v63 = vsel %vm1365_vm15, %v1301_v45, %v1429_v56  ;;  %v1233_v0 = vmul.f32 %v2395_v42, %v2624_v34  ;;  %v1199_v1 = vmul.f32 %v2624_v34, %v766_v43 }
  0xfd   : > { %v2145_v2 = vpack.c.bf16 %v1461_v62, %v1460_v33  ;;  %v2225_v3 = vpack.c.bf16 %v1493_v63, %v1492_v39  ;;  %vm1331_vm0 = vcmp.gt.f32.partialorder %v1267_v58, 0.0  ;;  %v1395_v4 = vmul.f32 0.01, %v1267_v58 }
  0xfe   : > { %vm1363_vm1 = vcmp.gt.f32.partialorder %v1299_v59, 0.0  ;;  %v1427_v5 = vmul.f32 0.01, %v1299_v59  ;;  %vm1336_vm2 = vcmp.gt.f32.partialorder %v1272_v60, 0.0  ;;  %v1400_v6 = vmul.f32 0.01, %v1272_v60 }
  0xff   : > { %2289 = vst [vmem:[%s2652_s6 + $0x18] sm:$0xff] %v2145_v2   ;;  %2305 = vst [vmem:[%s2652_s6 + $0x98] sm:$0xff] %v2225_v3   ;;  %v1459_v7 = vsel %vm1331_vm0, %v1267_v58, %v1395_v4  ;;  %v1304_v8 = vadd.f32 %v2629_v36, %v1233_v0  ;;  %v1270_v9 = vadd.f32 %v2629_v36, %v1199_v1  ;;  %v2367_v11 = vpop.f32.mrb[12].mxu0  ;;  %v2399_v12 = vpop.f32.mrb[12].mxu1 }
 0x100   : > { %v1231_v10 = vmul.f32 %v2624_v34, %v894_v48  ;;  %v2140_v13 = vpack.c.bf16 %v1459_v7, %v1458_v50  ;;  %v1491_v14 = vsel %vm1363_vm1, %v1299_v59, %v1427_v5  ;;  %v1464_v15 = vsel %vm1336_vm2, %v1272_v60, %v1400_v6  ;;  %v782_v17 = vpop.f32.mrb[13].mxu0  ;;  %v2684_v18 = vpop.f32.mrb[13].mxu1 }
 0x101   : > { %v1202_v16 = vmul.f32 %v2364_v49, %v2624_v34  ;;  %v2220_v19 = vpack.c.bf16 %v1491_v14, %v1490_v57  ;;  %vm1368_vm3 = vcmp.gt.f32.partialorder %v1304_v8, 0.0  ;;  %v1432_v20 = vmul.f32 0.01, %v1304_v8  ;;  %v2368_v21 = vpop.f32.mrb[14].mxu0  ;;  %v2400_v22 = vpop.f32.mrb[14].mxu1 }
 0x102   : > { %vm1334_vm4 = vcmp.gt.f32.partialorder %v1270_v9, 0.0  ;;  %2288 = vst [vmem:[%s2652_s6 + $0x10] sm:$0xff] %v2140_v13   ;;  %v1398_v23 = vmul.f32 0.01, %v1270_v9  ;;  %v1302_v24 = vadd.f32 %v2629_v36, %v1231_v10  ;;  %v1234_v26 = vmul.f32 %v2396_v53, %v2624_v34  ;;  %v785_v27 = vpop.f32.mrb[15].mxu0  ;;  %v913_v28 = vpop.f32.mrb[15].mxu1 }
 0x103   : > { %v1273_v25 = vadd.f32 %v2629_v36, %v1202_v16  ;;  %2304 = vst [vmem:[%s2652_s6 + $0x90] sm:$0xff] %v2220_v19   ;;  %v1496_v29 = vsel %vm1368_vm3, %v1304_v8, %v1432_v20  ;;  %v1200_v30 = vmul.f32 %v2624_v34, %v769_v54  ;;  %v1232_v31 = vmul.f32 %v2624_v34, %v897_v61 }
 0x104   : > { %v1205_v32 = vmul.f32 %v2367_v11, %v2624_v34  ;;  %v1462_v33 = vsel %vm1334_vm4, %v1270_v9, %v1398_v23  ;;  %vm1366_vm5 = vcmp.gt.f32.partialorder %v1302_v24, 0.0  ;;  %v1430_v35 = vmul.f32 0.01, %v1302_v24 }
 0x105   : > { %vm1337_vm6 = vcmp.gt.f32.partialorder %v1273_v25, 0.0  ;;  %v1401_v37 = vmul.f32 0.01, %v1273_v25  ;;  %v1305_v38 = vadd.f32 %v2629_v36, %v1234_v26  ;;  %v1271_v39 = vadd.f32 %v2629_v36, %v1200_v30 }
 0x106   : > { %v1303_v40 = vadd.f32 %v2629_v36, %v1232_v31  ;;  %v1494_v41 = vsel %vm1366_vm5, %v1302_v24, %v1430_v35  ;;  %v1276_v42 = vadd.f32 %v2629_v36, %v1205_v32  ;;  %v1237_v43 = vmul.f32 %v2399_v12, %v2624_v34  ;;  %v2371_v45 = vpop.f32.mrb[16].mxu0 }
 0x107   : > { %v1203_v44 = vmul.f32 %v2624_v34, %v782_v17  ;;  %v1465_v46 = vsel %vm1337_vm6, %v1273_v25, %v1401_v37  ;;  %vm1369_vm7 = vcmp.gt.f32.partialorder %v1305_v38, 0.0  ;;  %v1433_v47 = vmul.f32 0.01, %v1305_v38  ;;  %v2403_v48 = vpop.f32.mrb[16].mxu1  ;;  %v2700_v49 = vpop.f32.mrb[17].mxu0 }
 0x108   : > { %vm1335_vm8 = vcmp.gt.f32.partialorder %v1271_v39, 0.0  ;;  %v2155_v50 = vpack.c.bf16 %v1465_v46, %v1464_v15  ;;  %v1399_v51 = vmul.f32 0.01, %v1271_v39  ;;  %vm1367_vm9 = vcmp.gt.f32.partialorder %v1303_v40, 0.0  ;;  %v2702_v53 = vpop.f32.mrb[17].mxu1  ;;  %v2705_v57 = vpop.f32.mrb[18].mxu0 }
 0x109   : > { %v1431_v52 = vmul.f32 0.01, %v1303_v40  ;;  %v1497_v54 = vsel %vm1369_vm7, %v1305_v38, %v1433_v47  ;;  %vm1340_vm10 = vcmp.gt.f32.partialorder %v1276_v42, 0.0  ;;  %v1404_v55 = vmul.f32 0.01, %v1276_v42  ;;  %v2707_v58 = vpop.f32.mrb[18].mxu1 }
 0x10a   : > { %v1308_v56 = vadd.f32 %v2629_v36, %v1237_v43  ;;  %2291 = vst [vmem:[%s2652_s6 + $0x28] sm:$0xff] %v2155_v50   ;;  %v2235_v59 = vpack.c.bf16 %v1497_v54, %v1496_v29  ;;  %v1463_v60 = vsel %vm1335_vm8, %v1271_v39, %v1399_v51  ;;  %v1274_v62 = vadd.f32 %v2629_v36, %v1203_v44  ;;  %v2712_v63 = vpop.f32.mrb[19].mxu0  ;;  %v2714_v0 = vpop.f32.mrb[19].mxu1 }
 0x10b   : > { %v1495_v61 = vsel %vm1367_vm9, %v1303_v40, %v1431_v52  ;;  %v2150_v1 = vpack.c.bf16 %v1463_v60, %v1462_v33  ;;  %v1468_v3 = vsel %vm1340_vm10, %v1276_v42, %v1404_v55  ;;  %v1235_v6 = vmul.f32 %v2624_v34, %v2684_v18 }
 0x10c   : > { %v2230_v2 = vpack.c.bf16 %v1495_v61, %v1494_v41  ;;  %vm1372_vm11 = vcmp.gt.f32.partialorder %v1308_v56, 0.0  ;;  %2307 = vst [vmem:[%s2652_s6 + $0xa8] sm:$0xff] %v2235_v59   ;;  %v1436_v4 = vmul.f32 0.01, %v1308_v56  ;;  %vm1338_vm12 = vcmp.gt.f32.partialorder %v1274_v62, 0.0 }
 0x10d   : > { %v1402_v5 = vmul.f32 0.01, %v1274_v62  ;;  %2290 = vst [vmem:[%s2652_s6 + $0x20] sm:$0xff] %v2150_v1   ;;  %v1206_v7 = vmul.f32 %v2368_v21, %v2624_v34  ;;  %v1238_v8 = vmul.f32 %v2400_v22, %v2624_v34  ;;  %v1204_v9 = vmul.f32 %v2624_v34, %v785_v27 }
 0x10e   : > { %2306 = vst [vmem:[%s2652_s6 + $0xa0] sm:$0xff] %v2230_v2   ;;  %v1236_v10 = vmul.f32 %v2624_v34, %v913_v28  ;;  %v1500_v11 = vsel %vm1372_vm11, %v1308_v56, %v1436_v4  ;;  %v1306_v13 = vadd.f32 %v2629_v36, %v1235_v6  ;;  %v1209_v14 = vmul.f32 %v2371_v45, %v2624_v34  ;;  %v2727_v15 = vpop.f32.mrb[20].mxu0 }
 0x10f   : > { %v1466_v12 = vsel %vm1338_vm12, %v1274_v62, %v1402_v5  ;;  %v1277_v16 = vadd.f32 %v2629_v36, %v1206_v7  ;;  %v1309_v17 = vadd.f32 %v2629_v36, %v1238_v8  ;;  %v1275_v18 = vadd.f32 %v2629_v36, %v1204_v9  ;;  %v2733_v20 = vpop.f32.mrb[20].mxu1  ;;  %v2735_v21 = vpop.f32.mrb[21].mxu0 }
 0x110   : > { %v1307_v19 = vadd.f32 %v2629_v36, %v1236_v10  ;;  %vm1370_vm13 = vcmp.gt.f32.partialorder %v1306_v13, 0.0  ;;  %v1434_v22 = vmul.f32 0.01, %v1306_v13  ;;  %v1280_v23 = vadd.f32 %v2629_v36, %v1209_v14  ;;  %v2739_v25 = vpop.f32.mrb[21].mxu1  ;;  %v2741_v26 = vpop.f32.mrb[22].mxu0 }
 0x111   : > { %v1241_v24 = vmul.f32 %v2403_v48, %v2624_v34  ;;  %vm1341_vm14 = vcmp.gt.f32.partialorder %v1277_v16, 0.0  ;;  %v1405_v27 = vmul.f32 0.01, %v1277_v16  ;;  %vm1373_vm15 = vcmp.gt.f32.partialorder %v1309_v17, 0.0  ;;  %v2743_v31 = vpop.f32.mrb[22].mxu1  ;;  %v2745_v32 = vpop.f32.mrb[23].mxu0 }
 0x112   : > { %v1437_v28 = vmul.f32 0.01, %v1309_v17  ;;  %v1498_v29 = vsel %vm1370_vm13, %v1306_v13, %v1434_v22  ;;  %vm1339_vm0 = vcmp.gt.f32.partialorder %v1275_v18, 0.0  ;;  %v1403_v30 = vmul.f32 0.01, %v1275_v18  ;;  %v2747_v38 = vpop.f32.mrb[23].mxu1 }
 0x113   : > { %vm1371_vm1 = vcmp.gt.f32.partialorder %v1307_v19, 0.0  ;;  %v1469_v33 = vsel %vm1341_vm14, %v1277_v16, %v1405_v27  ;;  %v1435_v37 = vmul.f32 0.01, %v1307_v19  ;;  %vm1344_vm2 = vcmp.gt.f32.partialorder %v1280_v23, 0.0 }
 0x114   : > { %v1501_v35 = vsel %vm1373_vm15, %v1309_v17, %v1437_v28  ;;  %v2165_v39 = vpack.c.bf16 %v1469_v33, %v1468_v3  ;;  %v1467_v41 = vsel %vm1339_vm0, %v1275_v18, %v1403_v30  ;;  %v1408_v42 = vmul.f32 0.01, %v1280_v23 }
 0x115   : > { %v2245_v40 = vpack.c.bf16 %v1501_v35, %v1500_v11  ;;  %v2160_v43 = vpack.c.bf16 %v1467_v41, %v1466_v12  ;;  %v1499_v44 = vsel %vm1371_vm1, %v1307_v19, %v1435_v37  ;;  %v1312_v45 = vadd.f32 %v2629_v36, %v1241_v24 }
 0x116   : > { %v1207_v46 = vmul.f32 %v2624_v34, %v2700_v49  ;;  %2293 = vst [vmem:[%s2652_s6 + $0x38] sm:$0xff] %v2165_v39   ;;  %v2240_v47 = vpack.c.bf16 %v1499_v44, %v1498_v29  ;;  %v1472_v48 = vsel %vm1344_vm2, %v1280_v23, %v1408_v42  ;;  %v1239_v50 = vmul.f32 %v2624_v34, %v2702_v53  ;;  %v2758_v52 = vpop.f32.mrb[24].mxu0 }
 0x117   : > { %2309 = vst [vmem:[%s2652_s6 + $0xb8] sm:$0xff] %v2245_v40   ;;  %v1210_v51 = vmul.f32 %v2705_v57, %v2624_v34  ;;  %2292 = vst [vmem:[%s2652_s6 + $0x30] sm:$0xff] %v2160_v43   ;;  %vm1376_vm3 = vcmp.gt.f32.partialorder %v1312_v45, 0.0  ;;  %v1440_v54 = vmul.f32 0.01, %v1312_v45  ;;  %v1242_v49 = vmul.f32 %v2707_v58, %v2624_v34  ;;  %v2764_v56 = vpop.f32.mrb[24].mxu1 }
 0x118   : > { %v1278_v55 = vadd.f32 %v2629_v36, %v1207_v46  ;;  %v2766_v59 = vpop.f32.mrb[25].mxu0  ;;  %2308 = vst [vmem:[%s2652_s6 + $0xb0] sm:$0xff] %v2240_v47   ;;  %v1310_v53 = vadd.f32 %v2629_v36, %v1239_v50  ;;  %v1208_v57 = vmul.f32 %v2624_v34, %v2712_v63  ;;  %v1240_v61 = vmul.f32 %v2624_v34, %v2714_v0  ;;  %v2775_v62 = vpop.f32.mrb[25].mxu1 }
 0x119   : > { %v1281_v60 = vadd.f32 %v2629_v36, %v1210_v51  ;;  %v2777_v1 = vpop.f32.mrb[26].mxu0  ;;  %v1504_v58 = vsel %vm1376_vm3, %v1312_v45, %v1440_v54  ;;  %v1313_v3 = vadd.f32 %v2629_v36, %v1242_v49  ;;  %v2780_v4 = vpop.f32.mrb[26].mxu1  ;;  %v1213_v13 = vmul.f32 %v2727_v15, %v2624_v34 }
 0x11a   : > { %vm1342_vm4 = vcmp.gt.f32.partialorder %v1278_v55, 0.0  ;;  %v1406_v2 = vmul.f32 0.01, %v1278_v55  ;;  %v2782_v5 = vpop.f32.mrb[27].mxu0  ;;  %vm1374_vm5 = vcmp.gt.f32.partialorder %v1310_v53, 0.0  ;;  %v1279_v8 = vadd.f32 %v2629_v36, %v1208_v57  ;;  %v2785_v9 = vpop.f32.mrb[27].mxu1 }
 0x11b   : > { %v1438_v6 = vmul.f32 0.01, %v1310_v53  ;;  %vm1345_vm6 = vcmp.gt.f32.partialorder %v1281_v60, 0.0  ;;  %v1409_v63 = vmul.f32 0.01, %v1281_v60  ;;  %vm1377_vm7 = vcmp.gt.f32.partialorder %v1313_v3, 0.0 }
 0x11c   : > { %v1470_v7 = vsel %vm1342_vm4, %v1278_v55, %v1406_v2  ;;  %v1441_v0 = vmul.f32 0.01, %v1313_v3  ;;  %v1311_v12 = vadd.f32 %v2629_v36, %v1240_v61  ;;  %vm1343_vm8 = vcmp.gt.f32.partialorder %v1279_v8, 0.0 }
 0x11d   : > { %v1502_v10 = vsel %vm1374_vm5, %v1310_v53, %v1438_v6  ;;  %v1473_v11 = vsel %vm1345_vm6, %v1281_v60, %v1409_v63  ;;  %v1407_v17 = vmul.f32 0.01, %v1279_v8  ;;  %v1284_v22 = vadd.f32 %v2629_v36, %v1213_v13 }
 0x11e   : > { %v2175_v14 = vpack.c.bf16 %v1473_v11, %v1472_v48  ;;  %v1505_v16 = vsel %vm1377_vm7, %v1313_v3, %v1441_v0  ;;  %vm1375_vm9 = vcmp.gt.f32.partialorder %v1311_v12, 0.0  ;;  %v1439_v19 = vmul.f32 0.01, %v1311_v12  ;;  %v2791_v23 = vpop.f32.mrb[28].mxu0 }
 0x11f   : > { %v2255_v18 = vpack.c.bf16 %v1505_v16, %v1504_v58  ;;  %v1471_v24 = vsel %vm1343_vm8, %v1279_v8, %v1407_v17  ;;  %v1245_v27 = vmul.f32 %v2733_v20, %v2624_v34  ;;  %v1211_v15 = vmul.f32 %v2624_v34, %v2735_v21  ;;  %v2800_v29 = vpop.f32.mrb[28].mxu1  ;;  %v2802_v30 = vpop.f32.mrb[29].mxu0 }
 0x120   : > { %2295 = vst [vmem:[%s2652_s6 + $0x48] sm:$0xff] %v2175_v14   ;;  %v1243_v28 = vmul.f32 %v2624_v34, %v2739_v25  ;;  %v2170_v33 = vpack.c.bf16 %v1471_v24, %v1470_v7  ;;  %v1503_v35 = vsel %vm1375_vm9, %v1311_v12, %v1439_v19  ;;  %vm1348_vm10 = vcmp.gt.f32.partialorder %v1284_v22, 0.0  ;;  %v2805_v39 = vpop.f32.mrb[29].mxu1  ;;  %v2807_v20 = vpop.f32.mrb[30].mxu0 }
 0x121   : > { %2311 = vst [vmem:[%s2652_s6 + $0xc8] sm:$0xff] %v2255_v18   ;;  %v1412_v37 = vmul.f32 0.01, %v1284_v22  ;;  %v2250_v40 = vpack.c.bf16 %v1503_v35, %v1502_v10  ;;  %v1316_v21 = vadd.f32 %v2629_v36, %v1245_v27  ;;  %v1282_v25 = vadd.f32 %v2629_v36, %v1211_v15  ;;  %v2812_v42 = vpop.f32.mrb[30].mxu1  ;;  %v2814_v43 = vpop.f32.mrb[31].mxu0 }
 0x122   : > { %v1314_v41 = vadd.f32 %v2629_v36, %v1243_v28  ;;  %2294 = vst [vmem:[%s2652_s6 + $0x40] sm:$0xff] %v2170_v33   ;;  %v1214_v45 = vmul.f32 %v2741_v26, %v2624_v34  ;;  %v1246_v46 = vmul.f32 %v2743_v31, %v2624_v34  ;;  %v1212_v47 = vmul.f32 %v2624_v34, %v2745_v32  ;;  %v2823_v48 = vpop.f32.mrb[31].mxu1 }
 0x123   : > { %v1476_v44 = vsel %vm1348_vm10, %v1284_v22, %v1412_v37  ;;  %2310 = vst [vmem:[%s2652_s6 + $0xc0] sm:$0xff] %v2250_v40   ;;  %vm1380_vm11 = vcmp.gt.f32.partialorder %v1316_v21, 0.0  ;;  %v1444_v50 = vmul.f32 0.01, %v1316_v21  ;;  %vm1346_vm12 = vcmp.gt.f32.partialorder %v1282_v25, 0.0 }
 0x124   : > { %v1410_v51 = vmul.f32 0.01, %v1282_v25  ;;  %vm1378_vm13 = vcmp.gt.f32.partialorder %v1314_v41, 0.0  ;;  %v1442_v54 = vmul.f32 0.01, %v1314_v41  ;;  %v1285_v55 = vadd.f32 %v2629_v36, %v1214_v45 }
 0x125   : > { %v1317_v49 = vadd.f32 %v2629_v36, %v1246_v46  ;;  %v1508_v26 = vsel %vm1380_vm11, %v1316_v21, %v1444_v50  ;;  %v1283_v31 = vadd.f32 %v2629_v36, %v1212_v47  ;;  %v1244_v32 = vmul.f32 %v2624_v34, %v2747_v38 }
 0x126   : > { %v1474_v53 = vsel %vm1346_vm12, %v1282_v25, %v1410_v51  ;;  %v1506_v60 = vsel %vm1378_vm13, %v1314_v41, %v1442_v54  ;;  %vm1349_vm14 = vcmp.gt.f32.partialorder %v1285_v55, 0.0  ;;  %v1413_v57 = vmul.f32 0.01, %v1285_v55 }
 0x127   : > { %vm1381_vm15 = vcmp.gt.f32.partialorder %v1317_v49, 0.0  ;;  %v1445_v61 = vmul.f32 0.01, %v1317_v49  ;;  %vm1347_vm0 = vcmp.gt.f32.partialorder %v1283_v31, 0.0  ;;  %v1411_v58 = vmul.f32 0.01, %v1283_v31 }
 0x128   : > { %v1315_v2 = vadd.f32 %v2629_v36, %v1244_v32  ;;  %v1477_v3 = vsel %vm1349_vm14, %v1285_v55, %v1413_v57  ;;  %v1217_v6 = vmul.f32 %v2758_v52, %v2624_v34  ;;  %v1249_v63 = vmul.f32 %v2764_v56, %v2624_v34 }
 0x129   : > { %v1215_v38 = vmul.f32 %v2624_v34, %v2766_v59  ;;  %v2185_v7 = vpack.c.bf16 %v1477_v3, %v1476_v44  ;;  %v1509_v0 = vsel %vm1381_vm15, %v1317_v49, %v1445_v61  ;;  %v1475_v8 = vsel %vm1347_vm0, %v1283_v31, %v1411_v58 }
 0x12a   : > { %vm1379_vm1 = vcmp.gt.f32.partialorder %v1315_v2, 0.0  ;;  %v2265_v10 = vpack.c.bf16 %v1509_v0, %v1508_v26  ;;  %v2180_v11 = vpack.c.bf16 %v1475_v8, %v1474_v53  ;;  %v1443_v12 = vmul.f32 0.01, %v1315_v2 }
 0x12b   : > { %v1288_v13 = vadd.f32 %v2629_v36, %v1217_v6  ;;  %2297 = vst [vmem:[%s2652_s6 + $0x58] sm:$0xff] %v2185_v7   ;;  %v1320_v52 = vadd.f32 %v2629_v36, %v1249_v63  ;;  %v1286_v14 = vadd.f32 %v2629_v36, %v1215_v38  ;;  %v1247_v56 = vmul.f32 %v2624_v34, %v2775_v62 }
 0x12c   : > { %v1218_v59 = vmul.f32 %v2777_v1, %v2624_v34  ;;  %2313 = vst [vmem:[%s2652_s6 + $0xd8] sm:$0xff] %v2265_v10   ;;  %2296 = vst [vmem:[%s2652_s6 + $0x50] sm:$0xff] %v2180_v11   ;;  %v1507_v16 = vsel %vm1379_vm1, %v1315_v2, %v1443_v12  ;;  %v1250_v18 = vmul.f32 %v2780_v4, %v2624_v34 }
 0x12d   : > { %vm1352_vm2 = vcmp.gt.f32.partialorder %v1288_v13, 0.0  ;;  %v1416_v17 = vmul.f32 0.01, %v1288_v13  ;;  %v2260_v19 = vpack.c.bf16 %v1507_v16, %v1506_v60  ;;  %vm1384_vm3 = vcmp.gt.f32.partialorder %v1320_v52, 0.0 }
 0x12e   : > { %v1448_v22 = vmul.f32 0.01, %v1320_v52  ;;  %vm1350_vm4 = vcmp.gt.f32.partialorder %v1286_v14, 0.0  ;;  %v1414_v27 = vmul.f32 0.01, %v1286_v14  ;;  %v1318_v62 = vadd.f32 %v2629_v36, %v1247_v56 }
 0x12f   : > { %v1480_v24 = vsel %vm1352_vm2, %v1288_v13, %v1416_v17  ;;  %v1289_v15 = vadd.f32 %v2629_v36, %v1218_v59  ;;  %2312 = vst [vmem:[%s2652_s6 + $0xd0] sm:$0xff] %v2260_v19   ;;  %v1321_v28 = vadd.f32 %v2629_v36, %v1250_v18  ;;  %v1216_v33 = vmul.f32 %v2624_v34, %v2782_v5 }
 0x130   : > { %v1512_v1 = vsel %vm1384_vm3, %v1320_v52, %v1448_v22  ;;  %v1248_v4 = vmul.f32 %v2624_v34, %v2785_v9  ;;  %v1478_v35 = vsel %vm1350_vm4, %v1286_v14, %v1414_v27  ;;  %vm1382_vm5 = vcmp.gt.f32.partialorder %v1318_v62, 0.0 }
 0x131   : > { %v1446_v37 = vmul.f32 0.01, %v1318_v62  ;;  %vm1353_vm6 = vcmp.gt.f32.partialorder %v1289_v15, 0.0  ;;  %v1417_v40 = vmul.f32 0.01, %v1289_v15  ;;  %vm1385_vm7 = vcmp.gt.f32.partialorder %v1321_v28, 0.0 }
 0x132   : > { %v1449_v21 = vmul.f32 0.01, %v1321_v28  ;;  %v1287_v25 = vadd.f32 %v2629_v36, %v1216_v33  ;;  %v1319_v44 = vadd.f32 %v2629_v36, %v1248_v4  ;;  %v1221_v5 = vmul.f32 %v2791_v23, %v2624_v34 }
 0x133   : > { %v1510_v41 = vsel %vm1382_vm5, %v1318_v62, %v1446_v37  ;;  %v1253_v9 = vmul.f32 %v2800_v29, %v2624_v34  ;;  %v1481_v45 = vsel %vm1353_vm6, %v1289_v15, %v1417_v40  ;;  %v1219_v23 = vmul.f32 %v2624_v34, %v2802_v30 }
 0x134   : > { %v1513_v46 = vsel %vm1385_vm7, %v1321_v28, %v1449_v21  ;;  %vm1351_vm8 = vcmp.gt.f32.partialorder %v1287_v25, 0.0  ;;  %v1415_v47 = vmul.f32 0.01, %v1287_v25  ;;  %v2195_v50 = vpack.c.bf16 %v1481_v45, %v1480_v24 }
 0x135   : > { %v2275_v51 = vpack.c.bf16 %v1513_v46, %v1512_v1  ;;  %vm1383_vm9 = vcmp.gt.f32.partialorder %v1319_v44, 0.0  ;;  %v1447_v54 = vmul.f32 0.01, %v1319_v44  ;;  %v1292_v49 = vadd.f32 %v2629_v36, %v1221_v5 }
 0x136   : > { %v1479_v55 = vsel %vm1351_vm8, %v1287_v25, %v1415_v47  ;;  %v1324_v26 = vadd.f32 %v2629_v36, %v1253_v9  ;;  %2299 = vst [vmem:[%s2652_s6 + $0x68] sm:$0xff] %v2195_v50   ;;  %v1251_v31 = vmul.f32 %v2624_v34, %v2805_v39  ;;  %v1222_v32 = vmul.f32 %v2807_v20, %v2624_v34 }
 0x137   : > { %2315 = vst [vmem:[%s2652_s6 + $0xe8] sm:$0xff] %v2275_v51   ;;  %v2190_v29 = vpack.c.bf16 %v1479_v55, %v1478_v35  ;;  %v1511_v53 = vsel %vm1383_vm9, %v1319_v44, %v1447_v54  ;;  %vm1356_vm10 = vcmp.gt.f32.partialorder %v1292_v49, 0.0  ;;  %v1420_v57 = vmul.f32 0.01, %v1292_v49 }
 0x138   : > { %v2270_v60 = vpack.c.bf16 %v1511_v53, %v1510_v41  ;;  %v1290_v61 = vadd.f32 %v2629_v36, %v1219_v23  ;;  %v1322_v58 = vadd.f32 %v2629_v36, %v1251_v31  ;;  %v1293_v30 = vadd.f32 %v2629_v36, %v1222_v32 }
 0x139   : > { %2298 = vst [vmem:[%s2652_s6 + $0x60] sm:$0xff] %v2190_v29   ;;  %v1254_v2 = vmul.f32 %v2812_v42, %v2624_v34  ;;  %v1220_v39 = vmul.f32 %v2624_v34, %v2814_v43  ;;  %v1252_v20 = vmul.f32 %v2624_v34, %v2823_v48  ;;  %v1484_v3 = vsel %vm1356_vm10, %v1292_v49, %v1420_v57 }
 0x13a   : > { %2314 = vst [vmem:[%s2652_s6 + $0xe0] sm:$0xff] %v2270_v60   ;;  %vm1388_vm11 = vcmp.gt.f32.partialorder %v1324_v26, 0.0  ;;  %v1452_v6 = vmul.f32 0.01, %v1324_v26  ;;  %vm1354_vm12 = vcmp.gt.f32.partialorder %v1290_v61, 0.0  ;;  %vm1357_vm13 = vcmp.gt.f32.partialorder %v1293_v30, 0.0 }
 0x13b   : > { %v1421_v63 = vmul.f32 0.01, %v1293_v30  ;;  %v1325_v38 = vadd.f32 %v2629_v36, %v1254_v2  ;;  %v1418_v7 = vmul.f32 0.01, %v1290_v61  ;;  %vm1386_vm14 = vcmp.gt.f32.partialorder %v1322_v58, 0.0 }
 0x13c   : > { %v1291_v0 = vadd.f32 %v2629_v36, %v1220_v39  ;;  %v1323_v42 = vadd.f32 %v2629_v36, %v1252_v20  ;;  %v1450_v8 = vmul.f32 0.01, %v1322_v58  ;;  %v1516_v11 = vsel %vm1388_vm11, %v1324_v26, %v1452_v6 }
 0x13d   : > { %v1485_v43 = vsel %vm1357_vm13, %v1293_v30, %v1421_v63  ;;  %vm1389_vm15 = vcmp.gt.f32.partialorder %v1325_v38, 0.0  ;;  %v1453_v34 = vmul.f32 0.01, %v1325_v38  ;;  %v1482_v52 = vsel %vm1354_vm12, %v1290_v61, %v1418_v7 }
 0x13e   : > { %v2205_v48 = vpack.c.bf16 %v1485_v43, %v1484_v3  ;;  %vm1355_vm0 = vcmp.gt.f32.partialorder %v1291_v0, 0.0  ;;  %v1419_v10 = vmul.f32 0.01, %v1291_v0  ;;  %vm1387_vm1 = vcmp.gt.f32.partialorder %v1323_v42, 0.0 }
 0x13f   : > { %v1517_v12 = vsel %vm1389_vm15, %v1325_v38, %v1453_v34  ;;  %v1451_v13 = vmul.f32 0.01, %v1323_v42  ;;  %v1514_v56 = vsel %vm1386_vm14, %v1322_v58, %v1450_v8 }
 0x140   : > { %2301 = vst [vmem:[%s2652_s6 + $0x78] sm:$0xff] %v2205_v48   ;;  %v2285_v14 = vpack.c.bf16 %v1517_v12, %v1516_v11  ;;  %v1483_v36 = vsel %vm1355_vm0, %v1291_v0, %v1419_v10 }
 0x141   : > { %v2200_v59 = vpack.c.bf16 %v1483_v36, %v1482_v52  ;;  %v1515_v16 = vsel %vm1387_vm1, %v1323_v42, %v1451_v13 }
 0x142   : > { %2317 = vst [vmem:[%s2652_s6 + $0xf8] sm:$0xff] %v2285_v14   ;;  %v2280_v17 = vpack.c.bf16 %v1515_v16, %v1514_v56 }
 0x143   : > { %2300 = vst [vmem:[%s2652_s6 + $0x70] sm:$0xff] %v2200_v59  }
 0x144   : > { %2316 = vst [vmem:[%s2652_s6 + $0xf0] sm:$0xff] %v2280_v17  }
 0x145 PF: > { %s14_s17 = sadd.s32 1, %s2499_s17   ;;  %s2909_s15 = smov %s2495_s16 }
 0x146   : > { %p11_p5 = scmp.ge.s32.totalorder %s14_s17, 4   ;;  %s2910_s16 = smov %s2912_s18 }
 0x148   :  { %13 = sbr.rel (!%p11_p5) target bundleno = 2 (0x2), region = 77 }

// kernel: block_forward.5
= control target key start
LH: loop header
LB: loop body
LE: loop exit
PB: predicated region body
PF: predicated region fallthrough
CT: control target
= control target key end

     0   :  { %vm471_vm0 = vcmask 1043456   ;;  %vm446_vm1 = vcmask 64512   ;;  %s1134_s0 = inlined_call_operand.vmem [shape: bf16[128,128], index: 0, kind: input, shape index: {}]   ;;  %s1135_s1 = inlined_call_operand.vmem [shape: bf16[128,128], index: 1, kind: input, shape index: {}]   ;;  %s1136_s2 = inlined_call_operand.vmem [shape: f32[1,128], index: 2, kind: input, shape index: {}]   ;;  %s1137_s3 = inlined_call_operand.vmem [shape: f32[1,128], index: 3, kind: input, shape index: {}]   ;;  %s1138_s4 = inlined_call_operand.vmem [shape: bf16[128,8], index: 4, kind: input, shape index: {}]   ;;  %s1139_s5 = inlined_call_operand.vmem [shape: bf16[8,128], index: 5, kind: input, shape index: {}]   ;;  %s1140_s6 = inlined_call_operand.vmem [shape: f32[1,128], index: 6, kind: input, shape index: {}]   ;;  %s1141_s7 = inlined_call_operand.vmem [shape: f32[1,128], index: 7, kind: input, shape index: {}]   ;;  %s1142_s8 = inlined_call_operand.hbm [shape: f32[128,128], index: 8, kind: output, shape index: {}]  }
   0x1   :  { %v829_v0 = vld [vmem:[%s1135_s1] sm:$0xff]   ;;  %v830_v1 = vld [vmem:[%s1135_s1 + $0x8] sm:$0xff]   ;;  %v831_v2 = vld [vmem:[%s1135_s1 + $0x10] sm:$0xff]  }
   0x2   :  { %775 = vmatprep.subr.bf16.mxu0 %v829_v0  ;;  %v405_v3 = vld [vmem:[%s1139_s5] sm:$0xf]  ;;  %v832_v4 = vld [vmem:[%s1135_s1 + $0x18] sm:$0xff]   ;;  %v839_v8 = vld [vmem:[%s1138_s4 + $0x8] sm:$0xff]  }
   0x3   :  { %776 = vmatpush3.bf16.msra.mxu0 %v829_v0  ;;  %825 = vmatprep.subr.msk.bf16.mxu1 %vm471_vm0, %v405_v3  ;;  %v473_v5 = vsel %vm471_vm0, %v405_v3, 0  ;;  %v837_v6 = vld [vmem:[%s1138_s4] sm:$0xff]   ;;  %v841_v10 = vld [vmem:[%s1138_s4 + $0x10] sm:$0xff]   ;;  %v834_v11 = vld [vmem:[%s1135_s1 + $0x28] sm:$0xff]  }
   0x4   :  { %777 = vmatprep.subr.bf16.mxu0 %v830_v1  ;;  %808 = vmatpush3.bf16.msra.mxu1 %v473_v5  ;;  %v838_v7 = vld [vmem:[%s1134_s0] sm:$0xff]   ;;  %v843_v12 = vld [vmem:[%s1138_s4 + $0x18] sm:$0xff]   ;;  %v835_v14 = vld [vmem:[%s1135_s1 + $0x30] sm:$0xff]  }
   0x5   :  { %809 = vmatprep.mubr.msk.bf16.mxu1 %vm446_vm1, %v837_v6  ;;  %v833_v9 = vld [vmem:[%s1135_s1 + $0x20] sm:$0xff]   ;;  %791 = vmatprep.mubr.bf16.mxu0 %v838_v7  ;;  %v836_v15 = vld [vmem:[%s1135_s1 + $0x38] sm:$0xff]  }
   0x6   :  { %v845_v13 = vld [vmem:[%s1138_s4 + $0x20] sm:$0xff]  }
   0x7   :  { %778 = vmatpush3.bf16.msra.mxu0 %v830_v1  ;;  %810 = vmatmul.mubr.msk.bf16.vlgmr.msra.gmra.mrb[0].mxu1 %vm446_vm1, %v839_v8 }
   0x8   :  { %779 = vmatprep.subr.bf16.mxu0 %v831_v2  ;;  %813 = vmatprep.mubr.msk.bf16.mxu1 %vm446_vm1, %v841_v10 }
   0xb   :  { %780 = vmatpush3.bf16.msra.mxu0 %v831_v2 }
   0xc   :  { %781 = vmatprep.subr.bf16.mxu0 %v832_v4 }
   0xf   :  { %782 = vmatpush3.bf16.msra.mxu0 %v832_v4  ;;  %814 = vmatmul.mubr.msk.bf16.gmra.mrb[4].mxu1 %vm446_vm1, %v843_v12 }
  0x10   :  { %783 = vmatprep.subr.bf16.mxu0 %v833_v9  ;;  %817 = vmatprep.mubr.msk.bf16.mxu1 %vm446_vm1, %v845_v13 }
  0x13   :  { %784 = vmatpush3.bf16.msra.mxu0 %v833_v9 }
  0x14   :  { %785 = vmatprep.subr.bf16.mxu0 %v834_v11 }
  0x17   :  { %786 = vmatpush3.bf16.msra.mxu0 %v834_v11 }
  0x18   :  { %787 = vmatprep.subr.bf16.mxu0 %v835_v14 }
  0x19   :  { %13 = vsyncpa [#allocation4], 0  ;;  %v847_v16 = vld [vmem:[%s1138_s4 + $0x28] sm:$0xff]   ;;  %v849_v17 = vld [vmem:[%s1138_s4 + $0x30] sm:$0xff]  }
  0x1a   :  { %818 = vmatmul.mubr.msk.bf16.gmra.mrb[8].mxu1 %vm446_vm1, %v847_v16  ;;  %v840_v18 = vld [vmem:[%s1134_s0 + $0x8] sm:$0xff]   ;;  %v842_v19 = vld [vmem:[%s1134_s0 + $0x10] sm:$0xff]   ;;  %v851_v20 = vld [vmem:[%s1138_s4 + $0x38] sm:$0xff]  }
  0x1b   :  { %788 = vmatpush3.bf16.msra.mxu0 %v835_v14  ;;  %821 = vmatprep.mubr.msk.bf16.mxu1 %vm446_vm1, %v849_v17  ;;  %v844_v21 = vld [vmem:[%s1134_s0 + $0x18] sm:$0xff]   ;;  %v846_v22 = vld [vmem:[%s1134_s0 + $0x20] sm:$0xff]   ;;  %v848_v23 = vld [vmem:[%s1134_s0 + $0x28] sm:$0xff]  }
  0x1c   :  { %789 = vmatprep.subr.bf16.mxu0 %v836_v15  ;;  %v850_v24 = vld [vmem:[%s1134_s0 + $0x30] sm:$0xff]   ;;  %v852_v25 = vld [vmem:[%s1134_s0 + $0x38] sm:$0xff]   ;;  %v1021_v37 = vld [vmem:[%s1140_s6] ss:$0 sm:$0xff]  ;;  %s877_s6 = smov [#allocation3]  }
  0x1d   :  { %v1026_v38 = vld [vmem:[%s1136_s2] ss:$0 sm:$0xff] }
  0x1e   :  { %v1033_v41 = vld [vmem:[%s1137_s3] ss:$0 sm:$0xff] }
  0x1f   :  { %790 = vmatpush3.bf16.msra.mxu0 %v836_v15  ;;  %v1046_v52 = vld [vmem:[%s1141_s7] ss:$0 sm:$0xff]  ;;  %s703_s7 = sshll.u32 %s877_s6, 4  ;;  %s704_s7 = int_to_ptr.vmem [resolvable:$true] %s703_s7 }
  0x20   :  { %s853_s12 = scalar_lea.vmem %s704_s7, 2048  ;;  %p858_p1 = scmp.lt.s32.totalorder %s704_s7, %s704_s7 }
  0x21   :  { %p854_p0 = scmp.ne.s32.totalorder %s704_s7, %s853_s12  ;;  %p859_p2 = scmp.lt.s32.totalorder %s853_s12, %s853_s12 }
  0x22   :  { %792 = vmatmul.mubr.bf16.vlgmr.msra.gmra.mrb[0].mxu0 %v840_v18  ;;  %822 = vmatmul.mubr.msk.bf16.gmra.mrb[12].mxu1 %vm446_vm1, %v851_v20 }
  0x23   :  { %795 = vmatprep.mubr.bf16.mxu0 %v842_v19  ;;  %p860_p3 = por %p859_p2, %p858_p1 }
  0x25   :  { %p861_p4 = pnand %p860_p3, %p854_p0 }
  0x2a   :  { %796 = vmatmul.mubr.bf16.gmra.mrb[4].mxu0 %v844_v21 }
  0x2b   :  { %799 = vmatprep.mubr.bf16.mxu0 %v846_v22 }
  0x32   :  { %800 = vmatmul.mubr.bf16.gmra.mrb[8].mxu0 %v848_v23 }
  0x33   :  { %803 = vmatprep.mubr.bf16.mxu0 %v850_v24 }
  0x3a   :  { %804 = vmatmul.mubr.bf16.gmra.mrb[12].mxu0 %v852_v25 }
  0xda   :  { %v811_v26 = vpop.f32.mrb[0].mxu1 }
  0xdb   :  { %v509_v27 = vpop.f32.mrb[1].mxu1  ;;  %v581_v42 = vmul.f32 %v811_v26, %v1021_v37 }
  0xdc   :  { %v812_v28 = vpop.f32.mrb[2].mxu1  ;;  %v579_v45 = vmul.f32 %v1021_v37, %v509_v27 }
  0xdd   :  { %v512_v29 = vpop.f32.mrb[3].mxu1  ;;  %v582_v57 = vmul.f32 %v812_v28, %v1021_v37 }
  0xde   :  { %v580_v61 = vmul.f32 %v1021_v37, %v512_v29 }
  0xe2   :  { %v815_v30 = vpop.f32.mrb[4].mxu1 }
  0xe3   :  { %v525_v31 = vpop.f32.mrb[5].mxu1  ;;  %v585_v4 = vmul.f32 %v815_v30, %v1021_v37 }
  0xe4   :  { %v1008_v32 = vpop.f32.mrb[6].mxu1  ;;  %v583_v6 = vmul.f32 %v1021_v37, %v525_v31 }
  0xe5   :  { %v1010_v33 = vpop.f32.mrb[7].mxu1  ;;  %v586_v28 = vmul.f32 %v1008_v32, %v1021_v37 }
  0xe6   :  { %v584_v29 = vmul.f32 %v1021_v37, %v1010_v33 }
  0xed   :  { %v1012_v34 = vpop.f32.mrb[8].mxu1 }
  0xee   :  { %v1014_v35 = vpop.f32.mrb[9].mxu1 }
  0xef   :  { %v1016_v36 = vpop.f32.mrb[10].mxu1 }
  0xf0   :  { %v1028_v39 = vpop.f32.mrb[11].mxu1  ;;  %v590_v32 = vmul.f32 %v1016_v36, %v1021_v37 }
  0xf1   :  { %v588_v33 = vmul.f32 %v1021_v37, %v1028_v39 }
  0xf5   :  { %v793_v40 = vpop.f32.mrb[0].mxu0  ;;  %v1041_v51 = vpop.f32.mrb[12].mxu1 }
  0xf6   :  { %v352_v43 = vmul.f32 %v793_v40, %v1026_v38  ;;  %v229_v44 = vpop.f32.mrb[1].mxu0  ;;  %v1050_v55 = vpop.f32.mrb[13].mxu1 }
  0xf7   :  { %v350_v46 = vmul.f32 %v1026_v38, %v229_v44  ;;  %v794_v47 = vpop.f32.mrb[2].mxu0  ;;  %v1054_v59 = vpop.f32.mrb[14].mxu1 }
  0xf8   :  { %v375_v48 = vadd.f32 %v1033_v41, %v352_v43  ;;  %v353_v49 = vmul.f32 %v794_v47, %v1026_v38  ;;  %v232_v50 = vpop.f32.mrb[3].mxu0  ;;  %v1058_v63 = vpop.f32.mrb[15].mxu1 }
  0xf9   :  { %v373_v53 = vadd.f32 %v1033_v41, %v350_v46  ;;  %v351_v54 = vmul.f32 %v1026_v38, %v232_v50 }
  0xfa   :  { %v597_v56 = vadd.f32 %v581_v42, %v375_v48  ;;  %v376_v58 = vadd.f32 %v1033_v41, %v353_v49  ;;  %v589_v42 = vmul.f32 %v1012_v34, %v1021_v37 }
  0xfb   :  { %v595_v60 = vadd.f32 %v579_v45, %v373_v53  ;;  %v374_v62 = vadd.f32 %v1033_v41, %v351_v54  ;;  %v587_v45 = vmul.f32 %v1021_v37, %v1014_v35 }
  0xfc   :  { %v620_v0 = vadd.f32 %v1046_v52, %v597_v56  ;;  %v598_v1 = vadd.f32 %v582_v57, %v376_v58 }
  0xfd   :  { %v618_v2 = vadd.f32 %v1046_v52, %v595_v60  ;;  %v596_v3 = vadd.f32 %v580_v61, %v374_v62  ;;  %v797_v5 = vpop.f32.mrb[4].mxu0 }
  0xfe   :  { %vm636_vm2 = vcmp.gt.f32.partialorder %v620_v0, 0.0  ;;  %v652_v7 = vmul.f32 0.01, %v620_v0  ;;  %v621_v8 = vadd.f32 %v1046_v52, %v598_v1  ;;  %v356_v9 = vmul.f32 %v797_v5, %v1026_v38  ;;  %v245_v10 = vpop.f32.mrb[5].mxu0 }
  0xff   :  { %vm634_vm3 = vcmp.gt.f32.partialorder %v618_v2, 0.0  ;;  %v650_v11 = vmul.f32 0.01, %v618_v2  ;;  %v619_v12 = vadd.f32 %v1046_v52, %v596_v3  ;;  %v354_v13 = vmul.f32 %v1026_v38, %v245_v10  ;;  %v798_v14 = vpop.f32.mrb[6].mxu0 }
 0x100   :  { %v668_v15 = vsel %vm636_vm2, %v620_v0, %v652_v7  ;;  %vm637_vm4 = vcmp.gt.f32.partialorder %v621_v8, 0.0  ;;  %v653_v16 = vmul.f32 0.01, %v621_v8  ;;  %v379_v17 = vadd.f32 %v1033_v41, %v356_v9  ;;  %v248_v18 = vpop.f32.mrb[7].mxu0 }
 0x101   :  { %684 = vst [vmem:[#allocation3 + $0x10] sm:$0xff] %v668_v15  ;;  %v666_v19 = vsel %vm634_vm3, %v618_v2, %v650_v11  ;;  %vm635_vm5 = vcmp.gt.f32.partialorder %v619_v12, 0.0  ;;  %v651_v20 = vmul.f32 0.01, %v619_v12  ;;  %v377_v21 = vadd.f32 %v1033_v41, %v354_v13 }
 0x102   :  { %682 = vst [vmem:[#allocation3] sm:$0xff] %v666_v19  ;;  %v669_v22 = vsel %vm637_vm4, %v621_v8, %v653_v16  ;;  %v601_v23 = vadd.f32 %v585_v4, %v379_v17  ;;  %v357_v24 = vmul.f32 %v798_v14, %v1026_v38  ;;  %v355_v25 = vmul.f32 %v1026_v38, %v248_v18 }
 0x103   :  { %685 = vst [vmem:[#allocation3 + $0x18] sm:$0xff] %v669_v22  ;;  %v667_v26 = vsel %vm635_vm5, %v619_v12, %v651_v20  ;;  %v599_v27 = vadd.f32 %v583_v6, %v377_v21  ;;  %v593_v13 = vmul.f32 %v1041_v51, %v1021_v37  ;;  %v591_v15 = vmul.f32 %v1021_v37, %v1050_v55 }
 0x104   :  { %683 = vst [vmem:[#allocation3 + $0x8] sm:$0xff] %v667_v26  ;;  %v624_v30 = vadd.f32 %v1046_v52, %v601_v23  ;;  %v380_v31 = vadd.f32 %v1033_v41, %v357_v24  ;;  %v378_v40 = vadd.f32 %v1033_v41, %v355_v25  ;;  %v594_v25 = vmul.f32 %v1054_v59, %v1021_v37 }
 0x105   :  { %v622_v43 = vadd.f32 %v1046_v52, %v599_v27  ;;  %v801_v44 = vpop.f32.mrb[8].mxu0 }
 0x106   :  { %vm640_vm6 = vcmp.gt.f32.partialorder %v624_v30, 0.0  ;;  %v656_v46 = vmul.f32 0.01, %v624_v30  ;;  %v602_v47 = vadd.f32 %v586_v28, %v380_v31  ;;  %v600_v48 = vadd.f32 %v584_v29, %v378_v40  ;;  %v261_v49 = vpop.f32.mrb[9].mxu0 }
 0x107   :  { %vm638_vm7 = vcmp.gt.f32.partialorder %v622_v43, 0.0  ;;  %v654_v50 = vmul.f32 0.01, %v622_v43  ;;  %v360_v34 = vmul.f32 %v801_v44, %v1026_v38  ;;  %v358_v53 = vmul.f32 %v1026_v38, %v261_v49  ;;  %v802_v54 = vpop.f32.mrb[10].mxu0 }
 0x108   :  { %v672_v56 = vsel %vm640_vm6, %v624_v30, %v656_v46  ;;  %v625_v35 = vadd.f32 %v1046_v52, %v602_v47  ;;  %v623_v36 = vadd.f32 %v1046_v52, %v600_v48  ;;  %v361_v57 = vmul.f32 %v802_v54, %v1026_v38  ;;  %v264_v39 = vpop.f32.mrb[11].mxu0 }
 0x109   :  { %688 = vst [vmem:[#allocation3 + $0x30] sm:$0xff] %v672_v56  ;;  %v670_v58 = vsel %vm638_vm7, %v622_v43, %v654_v50  ;;  %v383_v60 = vadd.f32 %v1033_v41, %v360_v34  ;;  %v381_v61 = vadd.f32 %v1033_v41, %v358_v53  ;;  %v359_v62 = vmul.f32 %v1026_v38, %v264_v39 }
 0x10a   :  { %686 = vst [vmem:[#allocation3 + $0x20] sm:$0xff] %v670_v58  ;;  %vm641_vm8 = vcmp.gt.f32.partialorder %v625_v35, 0.0  ;;  %v657_v0 = vmul.f32 0.01, %v625_v35  ;;  %vm639_vm9 = vcmp.gt.f32.partialorder %v623_v36, 0.0  ;;  %v384_v4 = vadd.f32 %v1033_v41, %v361_v57 }
 0x10b   :  { %v655_v1 = vmul.f32 0.01, %v623_v36  ;;  %v605_v2 = vadd.f32 %v589_v42, %v383_v60  ;;  %v603_v3 = vadd.f32 %v587_v45, %v381_v61  ;;  %v382_v5 = vadd.f32 %v1033_v41, %v359_v62 }
 0x10c   :  { %v673_v6 = vsel %vm641_vm8, %v625_v35, %v657_v0  ;;  %v606_v10 = vadd.f32 %v590_v32, %v384_v4 }
 0x10d   :  { %v671_v7 = vsel %vm639_vm9, %v623_v36, %v655_v1  ;;  %689 = vst [vmem:[#allocation3 + $0x38] sm:$0xff] %v673_v6  ;;  %v628_v8 = vadd.f32 %v1046_v52, %v605_v2  ;;  %v626_v9 = vadd.f32 %v1046_v52, %v603_v3  ;;  %v604_v11 = vadd.f32 %v588_v33, %v382_v5  ;;  %v805_v12 = vpop.f32.mrb[12].mxu0 }
 0x10e   :  { %687 = vst [vmem:[#allocation3 + $0x28] sm:$0xff] %v671_v7  ;;  %v364_v14 = vmul.f32 %v805_v12, %v1026_v38  ;;  %v277_v16 = vpop.f32.mrb[13].mxu0  ;;  %v629_v19 = vadd.f32 %v1046_v52, %v606_v10  ;;  %v592_v33 = vmul.f32 %v1021_v37, %v1058_v63 }
 0x10f   :  { %vm644_vm10 = vcmp.gt.f32.partialorder %v628_v8, 0.0  ;;  %v660_v17 = vmul.f32 0.01, %v628_v8  ;;  %vm642_vm11 = vcmp.gt.f32.partialorder %v626_v9, 0.0  ;;  %v658_v18 = vmul.f32 0.01, %v626_v9 }
 0x110   :  { %v627_v20 = vadd.f32 %v1046_v52, %v604_v11  ;;  %v387_v21 = vadd.f32 %v1033_v41, %v364_v14  ;;  %v362_v22 = vmul.f32 %v1026_v38, %v277_v16  ;;  %v806_v23 = vpop.f32.mrb[14].mxu0  ;;  %vm645_vm12 = vcmp.gt.f32.partialorder %v629_v19, 0.0 }
 0x111   :  { %v676_v51 = vsel %vm644_vm10, %v628_v8, %v660_v17  ;;  %v674_v24 = vsel %vm642_vm11, %v626_v9, %v658_v18  ;;  %v365_v55 = vmul.f32 %v806_v23, %v1026_v38  ;;  %v280_v26 = vpop.f32.mrb[15].mxu0  ;;  %v661_v27 = vmul.f32 0.01, %v629_v19 }
 0x112   :  { %692 = vst [vmem:[#allocation3 + $0x50] sm:$0xff] %v676_v51  ;;  %690 = vst [vmem:[#allocation3 + $0x40] sm:$0xff] %v674_v24  ;;  %vm643_vm13 = vcmp.gt.f32.partialorder %v627_v20, 0.0  ;;  %v659_v28 = vmul.f32 0.01, %v627_v20  ;;  %v609_v29 = vadd.f32 %v593_v13, %v387_v21  ;;  %v385_v30 = vadd.f32 %v1033_v41, %v362_v22 }
 0x113   :  { %v388_v31 = vadd.f32 %v1033_v41, %v365_v55  ;;  %v363_v40 = vmul.f32 %v1026_v38, %v280_v26  ;;  %v677_v42 = vsel %vm645_vm12, %v629_v19, %v661_v27 }
 0x114   :  { %v675_v43 = vsel %vm643_vm13, %v627_v20, %v659_v28  ;;  %693 = vst [vmem:[#allocation3 + $0x58] sm:$0xff] %v677_v42  ;;  %v632_v59 = vadd.f32 %v1046_v52, %v609_v29  ;;  %v607_v44 = vadd.f32 %v591_v15, %v385_v30 }
 0x115   :  { %691 = vst [vmem:[#allocation3 + $0x48] sm:$0xff] %v675_v43  ;;  %v610_v45 = vadd.f32 %v594_v25, %v388_v31  ;;  %v386_v32 = vadd.f32 %v1033_v41, %v363_v40 }
 0x116   :  { %vm648_vm14 = vcmp.gt.f32.partialorder %v632_v59, 0.0  ;;  %v664_v46 = vmul.f32 0.01, %v632_v59  ;;  %v630_v47 = vadd.f32 %v1046_v52, %v607_v44 }
 0x117   :  { %v633_v48 = vadd.f32 %v1046_v52, %v610_v45  ;;  %v608_v38 = vadd.f32 %v592_v33, %v386_v32 }
 0x118   :  { %v680_v49 = vsel %vm648_vm14, %v632_v59, %v664_v46  ;;  %vm646_vm15 = vcmp.gt.f32.partialorder %v630_v47, 0.0  ;;  %v662_v50 = vmul.f32 0.01, %v630_v47 }
 0x119   :  { %vm649_vm0 = vcmp.gt.f32.partialorder %v633_v48, 0.0  ;;  %696 = vst [vmem:[#allocation3 + $0x70] sm:$0xff] %v680_v49  ;;  %v665_v34 = vmul.f32 0.01, %v633_v48  ;;  %v631_v41 = vadd.f32 %v1046_v52, %v608_v38 }
 0x11a   :  { %v678_v53 = vsel %vm646_vm15, %v630_v47, %v662_v50 }
 0x11b   :  { %694 = vst [vmem:[#allocation3 + $0x60] sm:$0xff] %v678_v53  ;;  %v681_v37 = vsel %vm649_vm0, %v633_v48, %v665_v34  ;;  %vm647_vm1 = vcmp.gt.f32.partialorder %v631_v41, 0.0  ;;  %v663_v63 = vmul.f32 0.01, %v631_v41 }
 0x11c   :  { %697 = vst [vmem:[#allocation3 + $0x78] sm:$0xff] %v681_v37 }
 0x11d   :  { %v679_v54 = vsel %vm647_vm1, %v631_v41, %v663_v63 }
 0x11e   :  { %695 = vst [vmem:[#allocation3 + $0x68] sm:$0xff] %v679_v54 }
 0x11f   :  { %864 = shalt.err (!%p861_p4)
}
 0x120   :  { %s865_s15 = scalar_lea.hbm %s1142_s8, 2048 }
 0x121   :  { %p866_p5 = scmp.ne.s32.totalorder %s1142_s8, %s865_s15  ;;  %p869_p6 = scmp.lt.u32.totalorder %s865_s15, %s1142_s8 }
 0x123   :  { %p871_p7 = pnand %p869_p6, %p866_p5 }
 0x125   :  { %874 = shalt.err (!%p871_p7)
}
 0x126   :  { %s878_s5 = smov 128   ;;  %s879_s19 = smov 8  }
 0x127   :  { %709 = dma.vmem_to_hbm [thread:$0]  %s704_s7, 2048, %s1142_s8, [#allocation4], %s878_s5, %s878_s5, %s879_s19  }
 0x128   :  { %875 = dma.done.wait [#allocation4], 2048  }
 0x129   :  { %876 = vsyncadd [#allocation4], 4294965248 }
 0x12a   :  { %713 = vsyncpa [#allocation4], 1 }

// kernel: block_forward.4
= control target key start
LH: loop header
LB: loop body
LE: loop exit
PB: predicated region body
PF: predicated region fallthrough
CT: control target
= control target key end

     0   :  { %s7955_s21 = smov 0   ;;  %s7957_s22 = smov 0   ;;  %s9224_s0 = inlined_call_operand.vmem [shape: bf16[2,10,100,128], index: 0, kind: input, shape index: {}, may-alias: {0,1,2}]   ;;  %s9225_s1 = inlined_call_operand.vmem [shape: bf16[2,10,100,128], index: 1, kind: input, shape index: {}, may-alias: {0,1,2}]   ;;  %s9226_s2 = inlined_call_operand.vmem [shape: bf16[2,10,100,128], index: 2, kind: input, shape index: {}, may-alias: {0,1,2}]   ;;  %s9227_s3 = inlined_call_operand.vmem [shape: bf16[3,9,128,128], index: 3, kind: input, shape index: {}]   ;;  %s9228_s4 = inlined_call_operand.vmem [shape: f32[1,128], index: 4, kind: input, shape index: {}]   ;;  %s9229_s5 = inlined_call_operand.vmem [shape: f32[1,128], index: 5, kind: input, shape index: {}]   ;;  %s9230_s6 = inlined_call_operand.vmem [shape: bf16[2,4,40,128], index: 6, kind: output, shape index: {}]  }
   0x1   :  { %s7959_s23 = smov 0   ;;  %s7961_s24 = smov 0  }
   0x2   :  { %s7963_s25 = smov 0  }
   0x3 LB: > { %s25_s26 = sadd.s32 1, %s7908_s23  ;;  %s28_s27 = sadd.s32 1, %s7912_s24  ;;  %s7916_s25 = sphi %s7963_s25, %s16_s25   ;;  %s7912_s24 = sphi %s7961_s24, %s9235_s24   ;;  %s7908_s23 = sphi %s7959_s23, %s9234_s23   ;;  %s7904_s22 = sphi %s7957_s22, %s9233_s22   ;;  %s7900_s21 = sphi %s7955_s21, %s9232_s21  }
   0x4   : > { %p26_p0 = scmp.ge.s32.totalorder %s25_s26, 4  ;;  %p5418_p1 = scmp.ge.s32.totalorder %s7916_s25, 1 }
   0x5   : > { %p284_p2 = scmp.lt.s32.totalorder %s7916_s25, 9 }
   0x6   : > { %s9237_s26 = smov (%p26_p0, %s25_s26), 0  ;;  %s9239_s27 = smov (!%p26_p0, %s28_s27), %s7912_s24 }
   0x7   : > { %p285_p3 = pnand %p5418_p1, %p284_p2  ;;  %p30_p4 = scmp.ge.s32.totalorder %s9239_s27, 2 }
   0x8   : > { %v7581_v0 = vld [vmem:[%s9227_s3] sm:$0xff] (!%p285_p3)   ;;  %v7918_v1 = vmov (!%p285_p3), 0.0   ;;  %v7583_v3 = vld [vmem:[%s9227_s3 + $0x8] sm:$0xff] (!%p285_p3)   ;;  %vm7919_vm0 = vmmov (!%p285_p3), 0   ;;  %s8003_s10 = sshll.u32 (!%p285_p3), %s7900_s21, 1  ;;  %p346_p5 = scmp.lt.s32.totalorder (!%p285_p3), %s7904_s22, 1 }
   0x9   : > { %s9241_s27 = smov (%p30_p4, %s9239_s27), 0  ;;  %288 = sbr.rel (%p285_p3) target bundleno = 690 (0x2b2), region = 44 }
   0xa   : > { %6461 = vmatprep.subr.bf16.mxu1 (!%p285_p3), %v7918_v1  ;;  %6825 = vmatprep.subr.bf16.mxu0 (!%p285_p3), %v7918_v1  ;;  %v7582_v2 = vld [vmem:[%s9227_s3 + $0x340] sm:$0xff] (!%p285_p3)   ;;  %v7584_v4 = vld [vmem:[%s9227_s3 + $0x348] sm:$0xff] (!%p285_p3)   ;;  %p348_p6 = scmp.lt.s32.totalorder (!%p285_p3), %s8003_s10, 9  ;;  %v7585_v5 = vld [vmem:[%s9227_s3 + $0x10] sm:$0xff] (!%p285_p3)   ;;  %s357_s9 = sadd.s32 (!%p285_p3), 1, %s8003_s10  ;;  %vm967_vm5 = vcmask (!%p285_p3), 1046528  }
   0xb   : > { %6462 = vmatpush3.bf16.msra.mxu1 (!%p285_p3), %v7581_v0  ;;  %6477 = vmatprep.mubr.msk.bf16.mxu1 (!%p285_p3), %vm7919_vm0, %v7918_v1  ;;  %v7586_v6 = vld [vmem:[%s9227_s3 + $0x350] sm:$0xff] (!%p285_p3)   ;;  %v7587_v7 = vld [vmem:[%s9227_s3 + $0x18] sm:$0xff] (!%p285_p3)   ;;  %p360_p7 = scmp.lt.s32.totalorder (!%p285_p3), %s357_s9, 9  ;;  %v7589_v9 = vld [vmem:[%s9227_s3 + $0x20] sm:$0xff] (!%p285_p3)   ;;  %vm1133_vm1 = vsmask.f32 (!%p285_p3), 4352 }
   0xc   : > { %6826 = vmatpush3.bf16.msra.mxu0 (!%p285_p3), %v7582_v2  ;;  %6463 = vmatprep.subr.bf16.mxu1 (!%p285_p3), %v7918_v1  ;;  %v7588_v8 = vld [vmem:[%s9227_s3 + $0x358] sm:$0xff] (!%p285_p3)   ;;  %v7590_v10 = vld [vmem:[%s9227_s3 + $0x360] sm:$0xff] (!%p285_p3)   ;;  %v7591_v11 = vld [vmem:[%s9227_s3 + $0x28] sm:$0xff] (!%p285_p3)   ;;  %s370_s11 = sadd.s32 (!%p285_p3), 2, %s8003_s10  ;;  %vm596_vm2 = vsmask.f32 (!%p285_p3), 5376 }
   0xd   : > { %6827 = vmatprep.subr.bf16.mxu0 (!%p285_p3), %v7918_v1  ;;  %6841 = vmatprep.mubr.msk.bf16.mxu0 (!%p285_p3), %vm7919_vm0, %v7918_v1  ;;  %v7592_v12 = vld [vmem:[%s9227_s3 + $0x368] sm:$0xff] (!%p285_p3)   ;;  %v7593_v13 = vld [vmem:[%s9227_s3 + $0x30] sm:$0xff] (!%p285_p3)   ;;  %v7595_v17 = vld [vmem:[%s9227_s3 + $0x38] sm:$0xff] (!%p285_p3)   ;;  %p8140_p8 = scmp.lt.s32.totalorder (!%p285_p3), %s370_s11, 9  ;;  %vm1320_vm3 = vsmask.f32 (!%p285_p3), 6400 }
   0xe   : > { %v7594_v14 = vld [vmem:[%s9227_s3 + $0x370] sm:$0xff] (!%p285_p3)   ;;  %v7596_v18 = vld [vmem:[%s9227_s3 + $0x378] sm:$0xff] (!%p285_p3)   ;;  %v7598_v28 = vld [vmem:[%s9227_s3 + $0x40] sm:$0xff] (!%p285_p3)   ;;  %vm783_vm4 = vsmask.f32 (!%p285_p3), 7424  ;;  %p384_p9 = scmp.lt.s32.totalorder (!%p285_p3), %s7900_s21, 3 }
   0xf   : > { %6464 = vmatpush3.bf16.msra.mxu1 (!%p285_p3), %v7583_v3  ;;  %v7601_v31 = vld [vmem:[%s9227_s3 + $0x380] sm:$0xff] (!%p285_p3)   ;;  %v7602_v34 = vld [vmem:[%s9227_s3 + $0x48] sm:$0xff] (!%p285_p3)   ;;  %v7604_v42 = vld [vmem:[%s9227_s3 + $0x50] sm:$0xff] (!%p285_p3)  }
  0x10   : > { %s9243_s22 = smov (!%p346_p5, %s7904_s22), 1  ;;  %6828 = vmatpush3.bf16.msra.mxu0 %v7584_v4  ;;  %6465 = vmatprep.subr.bf16.mxu1 %v7918_v1  ;;  %s9245_s9 = smov (!%p360_p7, %s357_s9), 9  ;;  %v7603_v37 = vld [vmem:[%s9227_s3 + $0x388] sm:$0xff]   ;;  %v7605_v43 = vld [vmem:[%s9227_s3 + $0x390] sm:$0xff]   ;;  %v7606_v46 = vld [vmem:[%s9227_s3 + $0x58] sm:$0xff]  }
  0x11   : > { %s349_s15 = scalar_select %p348_p6, %s8003_s10, 9  ;;  %6829 = vmatprep.subr.bf16.mxu0 %v7918_v1  ;;  %v7607_v47 = vld [vmem:[%s9227_s3 + $0x398] sm:$0xff]   ;;  %v7609_v50 = vld [vmem:[%s9227_s3 + $0x60] sm:$0xff]   ;;  %v7612_v56 = vld [vmem:[%s9227_s3 + $0x68] sm:$0xff]  }
  0x12   : > { %s8026_s18 = smul.u32 130, %s9243_s22  ;;  %v7611_v55 = vld [vmem:[%s9227_s3 + $0x3a0] sm:$0xff]   ;;  %v7613_v59 = vld [vmem:[%s9227_s3 + $0x3a8] sm:$0xff]   ;;  %v7615_v3 = vld [vmem:[%s9227_s3 + $0x70] sm:$0xff]   ;;  %s9247_s11 = smov (!%p8140_p8, %s370_s11), 9 }
  0x13   : > { %s7533_s19 = smul.u32 13, %s349_s15  ;;  %6466 = vmatpush3.bf16.msra.mxu1 %v7585_v5  ;;  %s9249_s21 = smov (!%p384_p9, %s7900_s21), 3 }
  0x14   : > { %6830 = vmatpush3.bf16.msra.mxu0 %v7586_v6  ;;  %6467 = vmatprep.subr.bf16.mxu1 %v7918_v1  ;;  %v7616_v6 = vld [vmem:[%s9227_s3 + $0x3b0] sm:$0xff]   ;;  %s7536_s10 = smul.u32 13, %s9247_s11 }
  0x15   : > { %s352_s29 = sadd.s32 %s8026_s18, %s7533_s19  ;;  %6831 = vmatprep.subr.bf16.mxu0 %v7918_v1  ;;  %s7535_s19 = smul.u32 13, %s9245_s9 }
  0x16   : > { %s5420_s8 = sshll.u32 %s352_s29, 2  ;;  %s8194_s13 = sadd.s32 %s7536_s10, %s8026_s18 }
  0x17   : > { %6468 = vmatpush3.bf16.msra.mxu1 %v7587_v7  ;;  %s8045_s15 = scalar_lea.vmem %s9224_s0, %s5420_s8  ;;  %s364_s7 = sadd.s32 %s7535_s19, %s8026_s18 }
  0x18   : > { %6832 = vmatpush3.bf16.msra.mxu0 %v7588_v8  ;;  %6469 = vmatprep.subr.bf16.mxu1 %v7918_v1  ;;  %s5422_s9 = sshll.u32 %s364_s7, 2  ;;  %v7597_v23 = vld [vmem:[%s8045_s15] sm:$0xff]   ;;  %v7608_v40 = vld [vmem:[%s8045_s15 + $0x8] sm:$0xff]   ;;  %v7614_v48 = vld [vmem:[%s8045_s15 + $0x10] ss:$0 sps:$4 sm:$0xff]   ;;  %s5424_s7 = sshll.u32 %s8194_s13, 2 }
  0x19   : > { %6833 = vmatprep.subr.bf16.mxu0 %v7918_v1  ;;  %s8070_s17 = scalar_lea.vmem %s9225_s1, %s5422_s9  ;;  %v7619_v45 = vld [vmem:[%s8045_s15] sm:$0xfc]   ;;  %v7620_v49 = vld [vmem:[%s8045_s15 + $0x8] sm:$0xff]   ;;  %s8395_s12 = scalar_lea.vmem %s9226_s2, %s5424_s7 }
  0x1a   : > { %v7599_v15 = vld [vmem:[%s8070_s17 + $0x18] sm:$0xf8]   ;;  %v7600_v16 = vld [vmem:[%s8070_s17 + $0x20] sm:$0xff]   ;;  %v7610_v33 = vld [vmem:[%s8070_s17 + $0x28] sm:$0xff]   ;;  %v598_v51 = vshrl.u32 %v7619_v45, 16  ;;  %v601_v52 = vshll.u32 %v7619_v45, 16 }
  0x1b   : > { %6470 = vmatpush3.bf16.msra.mxu1 %v7589_v9  ;;  %v2736_v19 = vshrl.u32 %v7599_v15, 16  ;;  %v2739_v20 = vshll.u32 %v7599_v15, 16  ;;  %v2744_v21 = vshrl.u32 %v7600_v16, 16  ;;  %v2747_v22 = vshll.u32 %v7600_v16, 16  ;;  %v7622_v53 = vld [vmem:[%s8070_s17 + $0x18] sm:$0xfe]  }
  0x1c   : > { %6834 = vmatpush3.bf16.msra.mxu0 %v7590_v10  ;;  %6471 = vmatprep.subr.bf16.mxu1 %v7918_v1  ;;  %v2753_v35 = vshrl.u32 %v7610_v33, 16  ;;  %v2756_v36 = vshll.u32 %v7610_v33, 16  ;;  %v7623_v54 = vld [vmem:[%s8070_s17 + $0x20] sm:$0xff]   ;;  %v606_v57 = vshrl.u32 %v7620_v49, 16  ;;  %v609_v58 = vshll.u32 %v7620_v49, 16  ;;  %v7618_v15 = vld [vmem:[%s9227_s3 + $0x3b8] sm:$0xff]  }
  0x1d   : > { %6835 = vmatprep.subr.bf16.mxu0 %v7918_v1  ;;  %v2738_v24 = vrot.slane %v2736_v19, 3  ;;  %v2741_v25 = vrot.slane %v2739_v20, 4  ;;  %v2746_v26 = vrot.slane %v2744_v21, 3  ;;  %v2749_v27 = vrot.slane %v2747_v22, 4  ;;  %v7631_v9 = vld [vmem:[%s8045_s15 + $0x10] sm:$0x7f]  }
  0x1e   : > { %v2755_v38 = vrot.slane %v2753_v35, 3  ;;  %v2758_v39 = vrot.slane %v2756_v36, 4  ;;  %v600_v60 = vrot.slane %v598_v51, 2  ;;  %v603_v61 = vrot.slane %v601_v52, 3  ;;  %v7626_v33 = vld [vmem:[%s9227_s3 + $0x3c8] sm:$0xff]   ;;  %v7627_v35 = vld [vmem:[%s9227_s3 + $0x90] sm:$0xff]  }
  0x1f   : > { %6472 = vmatpush3.bf16.msra.mxu1 %v7591_v11  ;;  %v2742_v29 = vor.u32 %v2741_v25, %v2738_v24  ;;  %v2750_v30 = vor.u32 %v2749_v27, %v2746_v26  ;;  %v2922_v62 = vshrl.u32 %v7622_v53, 16  ;;  %v2925_v63 = vshll.u32 %v7622_v53, 16  ;;  %v7624_v25 = vld [vmem:[%s9227_s3 + $0x3c0] sm:$0xff]   ;;  %v7638_v51 = vld [vmem:[%s9227_s3 + $0x3f0] sm:$0xff]   ;;  %s7537_s16 = smul.u32 5, %s9249_s21 }
  0x20   : > { %6836 = vmatpush3.bf16.msra.mxu0 %v7592_v12  ;;  %6473 = vmatprep.subr.bf16.mxu1 %v7918_v1  ;;  %v2759_v41 = vor.u32 %v2758_v39, %v2755_v38  ;;  %v2930_v0 = vshrl.u32 %v7623_v54, 16  ;;  %v2933_v2 = vshll.u32 %v7623_v54, 16  ;;  %v608_v4 = vrot.slane %v606_v57, 2  ;;  %v7629_v39 = vld [vmem:[%s9227_s3 + $0x98] sm:$0xff]   ;;  %v7645_v53 = vld [vmem:[%s8070_s17 + $0xc] sm:$0xff]   ;;  %s7538_s19 = smul.u32 20, %s9243_s22 }
  0x21   : > { %6837 = vmatprep.subr.bf16.mxu0 %v7918_v1  ;;  %v2751_v32 = vsel %vm1133_vm1, %v2742_v29, %v2750_v30  ;;  %v611_v5 = vrot.slane %v609_v58, 3  ;;  %v2924_v7 = vrot.slane %v2922_v62, 1  ;;  %v2927_v8 = vrot.slane %v2925_v63, 2  ;;  %v7644_v54 = vld [vmem:[%s8070_s17 + $0x4] sm:$0xfe]  }
  0x22   : > { %v2760_v44 = vsel %vm1133_vm1, %v2750_v30, %v2759_v41  ;;  %v2932_v10 = vrot.slane %v2930_v0, 1  ;;  %v2935_v11 = vrot.slane %v2933_v2, 2  ;;  %v615_v12 = vshrl.u32 %v7631_v9, 16  ;;  %v7643_v62 = vld [vmem:[%s9227_s3 + $0xc0] sm:$0xff]   ;;  %s388_s21 = sadd.s32 %s7538_s19, %s7537_s16 }
  0x23   : > { %6474 = vmatpush3.bf16.msra.mxu1 %v7593_v13  ;;  %v7633_v13 = vld [vmem:[%s8070_s17 + $0x28] sm:$0x3f]   ;;  %v604_v16 = vor.u32 %v603_v61, %v600_v60  ;;  %v2928_v20 = vor.u32 %v2927_v8, %v2924_v7  ;;  %v3107_v60 = vrot.slane %v7644_v54, 1  ;;  %v3108_v61 = vrot.slane %v7645_v53, 1  ;;  %s5425_s22 = sshll.u32 %s388_s21, 2 }
  0x24   : > { %6838 = vmatpush3.bf16.msra.mxu0 %v7594_v14  ;;  %6475 = vmatprep.subr.bf16.mxu1 %v7918_v1  ;;  %v7617_v14 = vld [vmem:[%s9227_s3 + $0x78] sm:$0xff]   ;;  %v2939_v19 = vshrl.u32 %v7633_v13, 16  ;;  %v2936_v21 = vor.u32 %v2935_v11, %v2932_v10  ;;  %v2942_v22 = vshll.u32 %v7633_v13, 16  ;;  %v617_v24 = vrot.slane %v615_v12, 2  ;;  %v7649_v11 = vld [vmem:[%s9227_s3 + $0xd0] sm:$0xff]   ;;  %v7669_v53 = vld [vmem:[%s9227_s3 + $0x108] sm:$0xff]   ;;  %s390_s30 = scalar_lea.vmem %s9230_s6, %s5425_s22 }
  0x25   : > { %6839 = vmatprep.subr.bf16.mxu0 %v7918_v1  ;;  %v7650_v13 = vld [vmem:[%s9227_s3 + $0x410] sm:$0xff]  }
  0x26   : > { %v2941_v29 = vrot.slane %v2939_v19, 1  ;;  %v2944_v30 = vrot.slane %v2942_v22, 2  ;;  %v7656_v22 = vld [vmem:[%s9227_s3 + $0x420] sm:$0xff]  }
  0x27   : > { %6476 = vmatpush3.bf16.msra.mxu1 %v7595_v17  ;;  %v612_v17 = vor.u32 %v611_v5, %v608_v4  ;;  %v7646_v4 = vld [vmem:[%s9227_s3 + $0x400] sm:$0xff]   ;;  %v7655_v5 = vld [vmem:[%s8070_s17 + $0x14] sm:$0x1f]  }
  0x28   : > { %6840 = vmatpush3.bf16.msra.mxu0 %v7596_v18  ;;  %6489 = vmatprep.subr.bf16.mxu1 %v7918_v1  ;;  %v618_v18 = vshll.u32 %v7631_v9, 16  ;;  %v7648_v9 = vld [vmem:[%s9227_s3 + $0x408] sm:$0xff]   ;;  %v3110_v10 = vrot.slane %v7655_v5, 1 }
  0x29   : > { %6853 = vmatprep.subr.bf16.mxu0 %v7918_v1  ;;  %v613_v26 = vsel %vm596_vm2, %v604_v16, %v612_v17  ;;  %v7651_v16 = vld [vmem:[%s9227_s3 + $0xd8] sm:$0xff]   ;;  %v7689_v5 = vld [vmem:[%s8070_s17 + $0xc] sm:$0xff]  }
  0x2a   : > { %6478 = vmatmul.mubr.bf16.vlgmr.msra.gmra.mrb[0].mxu1 %v7597_v23  ;;  %v7621_v23 = vld [vmem:[%s9227_s3 + $0x80] sm:$0xff]   ;;  %v620_v27 = vrot.slane %v618_v18, 3 }
  0x2b   : > { %6490 = vmatpush3.bf16.msra.mxu1 %v7598_v28  ;;  %6842 = vmatmul.mubr.bf16.vlgmr.msra.gmra.mrb[0].mxu0 %v2751_v32  ;;  %v2937_v28 = vsel %vm1320_vm3, %v2928_v20, %v2936_v21  ;;  %v7654_v18 = vld [vmem:[%s9227_s3 + $0xe0] sm:$0xff]  }
  0x2c   : > { %6854 = vmatpush3.bf16.msra.mxu0 %v7601_v31  ;;  %6491 = vmatprep.subr.bf16.mxu1 %v7918_v1  ;;  %v7625_v31 = vld [vmem:[%s9227_s3 + $0x88] sm:$0xff]   ;;  %v621_v32 = vor.u32 %v620_v27, %v617_v24 }
  0x2d   : > { %6855 = vmatprep.subr.bf16.mxu0 %v7918_v1  ;;  %6481 = vmatprep.mubr.msk.bf16.mxu1 %vm7919_vm0, %v7918_v1  ;;  %v7666_v20 = vld [vmem:[%s8070_s17 + $0x4] sm:$0xf8]  }
  0x2e   : > { %6845 = vmatprep.mubr.msk.bf16.mxu0 %vm7919_vm0, %v7918_v1  ;;  %v622_v36 = vsel %vm596_vm2, %v612_v17, %v621_v32  ;;  %v7652_v17 = vld [vmem:[%s9227_s3 + $0x418] sm:$0xff]   ;;  %v3273_v24 = vshrl.u32 %v7666_v20, 16  ;;  %v7658_v27 = vld [vmem:[%s9227_s3 + $0x428] sm:$0xff]  }
  0x2f   : > { %6492 = vmatpush3.bf16.msra.mxu1 %v7602_v34  ;;  %v2945_v34 = vor.u32 %v2944_v30, %v2941_v29  ;;  %v7659_v29 = vld [vmem:[%s9227_s3 + $0xf0] sm:$0xff]  }
  0x30   : > { %6856 = vmatpush3.bf16.msra.mxu0 %v7603_v37  ;;  %6493 = vmatprep.subr.bf16.mxu1 %v7918_v1  ;;  %v7628_v37 = vld [vmem:[%s9227_s3 + $0x3d0] sm:$0xff]  }
  0x31   : > { %6857 = vmatprep.subr.bf16.mxu0 %v7918_v1  ;;  %v2946_v38 = vsel %vm1320_vm3, %v2936_v21, %v2945_v34  ;;  %v7667_v21 = vld [vmem:[%s8070_s17 + $0xc] sm:$0xff]  }
  0x32   : > { %6482 = vmatmul.mubr.bf16.gmra.mrb[4].mxu1 %v7608_v40  ;;  %v7630_v40 = vld [vmem:[%s9227_s3 + $0x3d8] sm:$0xff]   ;;  %v7660_v30 = vld [vmem:[%s9227_s3 + $0x430] sm:$0xff]  }
  0x33   : > { %6494 = vmatpush3.bf16.msra.mxu1 %v7604_v42  ;;  %6846 = vmatmul.mubr.bf16.gmra.mrb[4].mxu0 %v2760_v44  ;;  %v7632_v42 = vld [vmem:[%s9227_s3 + $0xa0] sm:$0xff]   ;;  %v7642_v44 = vld [vmem:[%s8045_s15 + $0x8] sm:$0xff]  }
  0x34   : > { %6858 = vmatpush3.bf16.msra.mxu0 %v7605_v43  ;;  %6495 = vmatprep.subr.bf16.mxu1 %v7918_v1  ;;  %v7634_v43 = vld [vmem:[%s9227_s3 + $0x3e0] sm:$0xff]   ;;  %v796_v0 = vshrl.u32 %v7642_v44, 16 }
  0x35   : > { %6859 = vmatprep.subr.bf16.mxu0 %v7918_v1  ;;  %6485 = vmatprep.mubr.msk.bf16.mxu1 %vm7919_vm0, %v7918_v1 }
  0x36   : > { %6849 = vmatprep.mubr.msk.bf16.mxu0 %vm7919_vm0, %v7918_v1 }
  0x37   : > { %6496 = vmatpush3.bf16.msra.mxu1 %v7606_v46  ;;  %v7635_v46 = vld [vmem:[%s9227_s3 + $0xa8] sm:$0xff]  }
  0x38   : > { %6860 = vmatpush3.bf16.msra.mxu0 %v7607_v47  ;;  %6497 = vmatprep.subr.bf16.mxu1 %v7918_v1  ;;  %v7636_v47 = vld [vmem:[%s9227_s3 + $0x3e8] sm:$0xff]  }
  0x39   : > { %6861 = vmatprep.subr.bf16.mxu0 %v7918_v1 }
  0x3a   : > { %6486 = vmatmul.mubr.bf16.gmra.mrb[8].mxu1 %v7614_v48  ;;  %v7637_v48 = vld [vmem:[%s9227_s3 + $0xb0] sm:$0xff]  }
  0x3b   : > { %6498 = vmatpush3.bf16.msra.mxu1 %v7609_v50  ;;  %6850 = vmatmul.mubr.bf16.gmra.mrb[8].mxu0 %v2759_v41  ;;  %v7641_v41 = vld [vmem:[%s8045_s15] sm:$0xff]   ;;  %v792_v50 = vshll.u32 %v7642_v44, 16 }
  0x3c   : > { %6862 = vmatpush3.bf16.msra.mxu0 %v7611_v55  ;;  %6499 = vmatprep.subr.bf16.mxu1 %v7918_v1  ;;  %v787_v45 = vshll.u32 %v7641_v41, 16  ;;  %v785_v49 = vshrl.u32 %v7641_v41, 16  ;;  %v7639_v55 = vld [vmem:[%s9227_s3 + $0xb8] sm:$0xff]  }
  0x3d   : > { %6863 = vmatprep.subr.bf16.mxu0 %v7918_v1  ;;  %6505 = vmatprep.mubr.msk.bf16.mxu1 %vm7919_vm0, %v7918_v1  ;;  %v794_v57 = vrot.slane %v792_v50, 1  ;;  %v7668_v50 = vld [vmem:[%s9227_s3 + $0x440] sm:$0xff]  }
  0x3e   : > { %6869 = vmatprep.mubr.msk.bf16.mxu0 %vm7919_vm0, %v7918_v1  ;;  %v789_v52 = vrot.slane %v787_v45, 1 }
  0x3f   : > { %6500 = vmatpush3.bf16.msra.mxu1 %v7612_v56  ;;  %v7640_v56 = vld [vmem:[%s9227_s3 + $0x3f8] sm:$0xff]   ;;  %v798_v7 = vor.u32 %v796_v0, %v794_v57  ;;  %v7676_v0 = vld [vmem:[%s9227_s3 + $0x120] sm:$0xff]  }
  0x40   : > { %6864 = vmatpush3.bf16.msra.mxu0 %v7613_v59  ;;  %6501 = vmatprep.subr.bf16.mxu1 %v7918_v1  ;;  %v790_v58 = vor.u32 %v789_v52, %v785_v49  ;;  %v7653_v59 = vld [vmem:[%s8045_s15 + $0x10] sm:$0x1f]  }
  0x41   : > { %6865 = vmatprep.subr.bf16.mxu0 %v7918_v1  ;;  %v800_v2 = vshll.u32 %v7653_v59, 16 }
  0x42   : > { %v795_v63 = vsel %vm783_vm4, %v790_v58, %v794_v57  ;;  %v7671_v57 = vld [vmem:[%s9227_s3 + $0x110] sm:$0xff]  }
  0x43   : > { %6502 = vmatpush3.bf16.msra.mxu1 %v7615_v3  ;;  %v3109_v3 = vsel %vm967_vm5, %v3107_v60, %v3108_v61  ;;  %v802_v8 = vrot.slane %v800_v2, 1  ;;  %v7686_v2 = vld [vmem:[%s8045_s15 + $0x20] sm:$0xff]  }
  0x44   : > { %6866 = vmatpush3.bf16.msra.mxu0 %v7616_v6  ;;  %6503 = vmatprep.subr.bf16.mxu1 %v7918_v1  ;;  %v7647_v6 = vld [vmem:[%s9227_s3 + $0xc8] sm:$0xff]  }
  0x45   : > { %6867 = vmatprep.subr.bf16.mxu0 %v7918_v1  ;;  %v803_v12 = vsel %vm783_vm4, %v798_v7, %v802_v8  ;;  %v7679_v7 = vld [vmem:[%s9227_s3 + $0x128] sm:$0xff]  }
  0x47   : > { %6504 = vmatpush3.bf16.msra.mxu1 %v7617_v14  ;;  %v3111_v14 = vsel %vm967_vm5, %v3108_v61, %v3110_v10  ;;  %v7685_v61 = vld [vmem:[%s8045_s15 + $0x18] sm:$0xf8]  }
  0x48   : > { %6868 = vmatpush3.bf16.msra.mxu0 %v7618_v15  ;;  %6517 = vmatprep.subr.bf16.mxu1 %v7918_v1  ;;  %v804_v15 = vshrl.u32 %v7653_v59, 16  ;;  %v7672_v59 = vld [vmem:[%s9227_s3 + $0x450] sm:$0xff]  }
  0x49   : > { %6881 = vmatprep.subr.bf16.mxu0 %v7918_v1 }
  0x4a   : > { %6506 = vmatmul.mubr.bf16.vlgmr.msra.gmra.mrb[0].mxu1 %v613_v26  ;;  %v806_v19 = vor.u32 %v804_v15, %v802_v8  ;;  %v3281_v26 = vshrl.u32 %v7667_v21, 16  ;;  %v1138_v8 = vshll.u32 %v7685_v61, 16 }
  0x4b   : > { %6518 = vmatpush3.bf16.msra.mxu1 %v7621_v23  ;;  %6870 = vmatmul.mubr.bf16.vlgmr.msra.gmra.mrb[0].mxu0 %v2937_v28  ;;  %v7657_v23 = vld [vmem:[%s9227_s3 + $0xe8] sm:$0xff]   ;;  %v3284_v28 = vshll.u32 %v7667_v21, 16 }
  0x4c   : > { %6882 = vmatpush3.bf16.msra.mxu0 %v7624_v25  ;;  %6519 = vmatprep.subr.bf16.mxu1 %v7918_v1  ;;  %v3276_v25 = vshll.u32 %v7666_v20, 16  ;;  %v7682_v20 = vld [vmem:[%s9227_s3 + $0x470] sm:$0xff]  }
  0x4d   : > { %6883 = vmatprep.subr.bf16.mxu0 %v7918_v1  ;;  %6509 = vmatprep.mubr.msk.bf16.mxu1 %vm7919_vm0, %v7918_v1 }
  0x4e   : > { %6873 = vmatprep.mubr.msk.bf16.mxu0 %vm7919_vm0, %v7918_v1 }
  0x4f   : > { %6520 = vmatpush3.bf16.msra.mxu1 %v7625_v31  ;;  %v7663_v31 = vld [vmem:[%s8045_s15 + $0x18] sm:$0xfe]  }
  0x50   : > { %6884 = vmatpush3.bf16.msra.mxu0 %v7626_v33  ;;  %6521 = vmatprep.subr.bf16.mxu1 %v7918_v1  ;;  %v3275_v33 = vrot.slane %v3273_v24, 3 }
  0x51   : > { %6885 = vmatprep.subr.bf16.mxu0 %v7918_v1 }
  0x52   : > { %6510 = vmatmul.mubr.bf16.gmra.mrb[4].mxu1 %v622_v36  ;;  %v3286_v36 = vrot.slane %v3284_v28, 4 }
  0x53   : > { %6522 = vmatpush3.bf16.msra.mxu1 %v7627_v35  ;;  %6874 = vmatmul.mubr.bf16.gmra.mrb[4].mxu0 %v2946_v38  ;;  %v3283_v35 = vrot.slane %v3281_v26, 3  ;;  %v7661_v38 = vld [vmem:[%s9227_s3 + $0xf8] sm:$0xff]  }
  0x54   : > { %6886 = vmatpush3.bf16.msra.mxu0 %v7628_v37  ;;  %6523 = vmatprep.subr.bf16.mxu1 %v7918_v1  ;;  %v7677_v37 = vld [vmem:[%s8070_s17 + $0x14] sm:$0xff]  }
  0x55   : > { %6887 = vmatprep.subr.bf16.mxu0 %v7918_v1  ;;  %6513 = vmatprep.mubr.msk.bf16.mxu1 %vm7919_vm0, %v7918_v1  ;;  %v3290_v44 = vshrl.u32 %v7677_v37, 16  ;;  %v3293_v45 = vshll.u32 %v7677_v37, 16 }
  0x56   : > { %6877 = vmatprep.mubr.msk.bf16.mxu0 %vm7919_vm0, %v7918_v1 }
  0x57   : > { %6524 = vmatpush3.bf16.msra.mxu1 %v7629_v39  ;;  %v7662_v39 = vld [vmem:[%s9227_s3 + $0x438] sm:$0xff]   ;;  %v3295_v52 = vrot.slane %v3293_v45, 4 }
  0x58   : > { %6888 = vmatpush3.bf16.msra.mxu0 %v7630_v40  ;;  %6525 = vmatprep.subr.bf16.mxu1 %v7918_v1  ;;  %v968_v40 = vrot.slane %v7663_v31, 1  ;;  %v7684_v31 = vld [vmem:[%s9227_s3 + $0x478] sm:$0xff]  }
  0x59   : > { %6889 = vmatprep.subr.bf16.mxu0 %v7918_v1 }
  0x5a   : > { %6514 = vmatmul.mubr.bf16.gmra.mrb[8].mxu1 %v621_v32  ;;  %v7664_v32 = vld [vmem:[%s8045_s15 + $0x20] sm:$0xff]  }
  0x5b   : > { %6526 = vmatpush3.bf16.msra.mxu1 %v7632_v42  ;;  %6878 = vmatmul.mubr.bf16.gmra.mrb[8].mxu0 %v2945_v34  ;;  %v3278_v34 = vrot.slane %v3276_v25, 4  ;;  %v969_v41 = vrot.slane %v7664_v32, 1 }
  0x5c   : > { %6890 = vmatpush3.bf16.msra.mxu0 %v7634_v43  ;;  %6527 = vmatprep.subr.bf16.mxu1 %v7918_v1  ;;  %v3287_v43 = vor.u32 %v3286_v36, %v3283_v35 }
  0x5d   : > { %6891 = vmatprep.subr.bf16.mxu0 %v7918_v1  ;;  %6533 = vmatprep.mubr.msk.bf16.mxu1 %vm7919_vm0, %v7918_v1  ;;  %v3279_v42 = vor.u32 %v3278_v34, %v3275_v33 }
  0x5e   : > { %6897 = vmatprep.mubr.msk.bf16.mxu0 %vm7919_vm0, %v7918_v1 }
  0x5f   : > { %6528 = vmatpush3.bf16.msra.mxu1 %v7635_v46  ;;  %v7665_v46 = vld [vmem:[%s9227_s3 + $0x100] sm:$0xff]   ;;  %v3288_v49 = vsel %vm1133_vm1, %v3279_v42, %v3287_v43 }
  0x60   : > { %6892 = vmatpush3.bf16.msra.mxu0 %v7636_v47  ;;  %6529 = vmatprep.subr.bf16.mxu1 %v7918_v1  ;;  %v970_v47 = vsel %vm967_vm5, %v968_v40, %v969_v41 }
  0x61   : > { %6893 = vmatprep.subr.bf16.mxu0 %v7918_v1 }
  0x63   : > { %6530 = vmatpush3.bf16.msra.mxu1 %v7637_v48  ;;  %v7675_v48 = vld [vmem:[%s8045_s15 + $0x28] sm:$0x1f]  }
  0x64   : > { %6894 = vmatpush3.bf16.msra.mxu0 %v7638_v51  ;;  %6531 = vmatprep.subr.bf16.mxu1 %v7918_v1  ;;  %v3292_v51 = vrot.slane %v3290_v44, 3  ;;  %v971_v54 = vrot.slane %v7675_v48, 1  ;;  %v7692_v48 = vld [vmem:[%s9227_s3 + $0x488] sm:$0xff]  }
  0x65   : > { %6895 = vmatprep.subr.bf16.mxu0 %v7918_v1 }
  0x66   : > { %v972_v58 = vsel %vm967_vm5, %v969_v41, %v971_v54 }
  0x67   : > { %6532 = vmatpush3.bf16.msra.mxu1 %v7639_v55  ;;  %v7670_v55 = vld [vmem:[%s9227_s3 + $0x448] sm:$0xff]  }
  0x68   : > { %6896 = vmatpush3.bf16.msra.mxu0 %v7640_v56  ;;  %6545 = vmatprep.subr.bf16.mxu1 %v7918_v1  ;;  %v3296_v56 = vor.u32 %v3295_v52, %v3292_v51  ;;  %v7694_v52 = vld [vmem:[%s9227_s3 + $0x490] sm:$0xff]  }
  0x69   : > { %6909 = vmatprep.subr.bf16.mxu0 %v7918_v1 }
  0x6a   : > { %6534 = vmatmul.mubr.bf16.vlgmr.msra.gmra.mrb[0].mxu1 %v795_v63  ;;  %v3297_v60 = vsel %vm1133_vm1, %v3287_v43, %v3296_v56  ;;  %v7674_v63 = vld [vmem:[%s9227_s3 + $0x458] sm:$0xff]   ;;  %v7690_v43 = vld [vmem:[%s9227_s3 + $0x480] sm:$0xff]  }
  0x6b   : > { %6546 = vmatpush3.bf16.msra.mxu1 %v7643_v62  ;;  %6898 = vmatmul.mubr.bf16.vlgmr.msra.gmra.mrb[0].mxu0 %v3109_v3  ;;  %v7673_v62 = vld [vmem:[%s9227_s3 + $0x118] sm:$0xff]   ;;  %v7678_v3 = vld [vmem:[%s9227_s3 + $0x460] sm:$0xff]  }
  0x6c   : > { %6910 = vmatpush3.bf16.msra.mxu0 %v7646_v4  ;;  %6547 = vmatprep.subr.bf16.mxu1 %v7918_v1  ;;  %v1135_v4 = vshrl.u32 %v7685_v61, 16 }
  0x6d   : > { %6911 = vmatprep.subr.bf16.mxu0 %v7918_v1  ;;  %6537 = vmatprep.mubr.msk.bf16.mxu1 %vm7919_vm0, %v7918_v1 }
  0x6e   : > { %6901 = vmatprep.mubr.msk.bf16.mxu0 %vm7919_vm0, %v7918_v1 }
  0x6f   : > { %6548 = vmatpush3.bf16.msra.mxu1 %v7647_v6  ;;  %v7688_v6 = vld [vmem:[%s8070_s17 + $0x4] sm:$0xfe]  }
  0x70   : > { %6912 = vmatpush3.bf16.msra.mxu0 %v7648_v9  ;;  %6549 = vmatprep.subr.bf16.mxu1 %v7918_v1  ;;  %v1143_v9 = vshrl.u32 %v7686_v2, 16  ;;  %v3459_v15 = vshrl.u32 %v7688_v6, 16 }
  0x71   : > { %6913 = vmatprep.subr.bf16.mxu0 %v7918_v1 }
  0x72   : > { %6538 = vmatmul.mubr.bf16.gmra.mrb[4].mxu1 %v803_v12  ;;  %v1146_v12 = vshll.u32 %v7686_v2, 16  ;;  %v3461_v25 = vrot.slane %v3459_v15, 1  ;;  %v7702_v2 = vld [vmem:[%s9227_s3 + $0x4a8] sm:$0xff]   ;;  %v7706_v15 = vld [vmem:[%s9227_s3 + $0x4b8] sm:$0xff]  }
  0x73   : > { %6550 = vmatpush3.bf16.msra.mxu1 %v7649_v11  ;;  %6902 = vmatmul.mubr.bf16.gmra.mrb[4].mxu0 %v3111_v14  ;;  %v1137_v11 = vrot.slane %v1135_v4, 3  ;;  %v3470_v14 = vshll.u32 %v7689_v5, 16 }
  0x74   : > { %6914 = vmatpush3.bf16.msra.mxu0 %v7650_v13  ;;  %6551 = vmatprep.subr.bf16.mxu1 %v7918_v1  ;;  %v3467_v13 = vshrl.u32 %v7689_v5, 16  ;;  %v1148_v21 = vrot.slane %v1146_v12, 4 }
  0x75   : > { %6915 = vmatprep.subr.bf16.mxu0 %v7918_v1  ;;  %6541 = vmatprep.mubr.msk.bf16.mxu1 %vm7919_vm0, %v7918_v1  ;;  %v3472_v24 = vrot.slane %v3470_v14, 2 }
  0x76   : > { %6905 = vmatprep.mubr.msk.bf16.mxu0 %vm7919_vm0, %v7918_v1 }
  0x77   : > { %6552 = vmatpush3.bf16.msra.mxu1 %v7651_v16  ;;  %v3462_v16 = vshll.u32 %v7688_v6, 16 }
  0x78   : > { %6916 = vmatpush3.bf16.msra.mxu0 %v7652_v17  ;;  %6553 = vmatprep.subr.bf16.mxu1 %v7918_v1  ;;  %v7681_v17 = vld [vmem:[%s9227_s3 + $0x130] sm:$0xff]  }
  0x79   : > { %6917 = vmatprep.subr.bf16.mxu0 %v7918_v1  ;;  %v3464_v26 = vrot.slane %v3462_v16, 2  ;;  %v7709_v16 = vld [vmem:[%s9227_s3 + $0x180] sm:$0xff]  }
  0x7a   : > { %6542 = vmatmul.mubr.bf16.gmra.mrb[8].mxu1 %v806_v19  ;;  %v1145_v19 = vrot.slane %v1143_v9, 3  ;;  %v7704_v9 = vld [vmem:[%s9227_s3 + $0x4b0] sm:$0xff]  }
  0x7b   : > { %6554 = vmatpush3.bf16.msra.mxu1 %v7654_v18  ;;  %6906 = vmatmul.mubr.bf16.gmra.mrb[8].mxu0 %v3110_v10  ;;  %v7680_v10 = vld [vmem:[%s9227_s3 + $0x468] sm:$0xff]   ;;  %v1140_v18 = vrot.slane %v1138_v8, 4  ;;  %v3465_v34 = vor.u32 %v3464_v26, %v3461_v25  ;;  %v7714_v25 = vld [vmem:[%s9227_s3 + $0x190] sm:$0xff]  }
  0x7c   : > { %6918 = vmatpush3.bf16.msra.mxu0 %v7656_v22  ;;  %6555 = vmatprep.subr.bf16.mxu1 %v7918_v1  ;;  %v7697_v22 = vld [vmem:[%s8045_s15 + $0x28] sm:$0xff]   ;;  %v1149_v33 = vor.u32 %v1148_v21, %v1145_v19 }
  0x7d   : > { %6919 = vmatprep.subr.bf16.mxu0 %v7918_v1  ;;  %6561 = vmatprep.mubr.msk.bf16.mxu1 %vm7919_vm0, %v7918_v1  ;;  %v1152_v28 = vshrl.u32 %v7697_v22, 16  ;;  %v1141_v32 = vor.u32 %v1140_v18, %v1137_v11  ;;  %v7718_v8 = vld [vmem:[%s8045_s15 + $0x28] sm:$0x3f]   ;;  %v7711_v18 = vld [vmem:[%s9227_s3 + $0x4c0] sm:$0xff]  }
  0x7e   : > { %6925 = vmatprep.mubr.msk.bf16.mxu0 %vm7919_vm0, %v7918_v1  ;;  %v1342_v14 = vshll.u32 %v7718_v8, 16 }
  0x7f   : > { %6556 = vmatpush3.bf16.msra.mxu1 %v7657_v23  ;;  %v3469_v23 = vrot.slane %v3467_v13, 1  ;;  %v1150_v41 = vsel %vm1133_vm1, %v1141_v32, %v1149_v33  ;;  %v1339_v13 = vshrl.u32 %v7718_v8, 16  ;;  %v7732_v32 = vld [vmem:[%s8395_s12] sm:$0xfc]   ;;  %v7738_v8 = vld [vmem:[%s9227_s3 + $0x510] sm:$0xff]  }
  0x80   : > { %6920 = vmatpush3.bf16.msra.mxu0 %v7658_v27  ;;  %6557 = vmatprep.subr.bf16.mxu1 %v7918_v1  ;;  %v7699_v27 = vld [vmem:[%s8070_s17 + $0x14] sm:$0x3f]   ;;  %v1344_v21 = vrot.slane %v1342_v14, 2  ;;  %v7751_v14 = vld [vmem:[%s8045_s15 + $0x4] sm:$0xf8]  }
  0x81   : > { %6921 = vmatprep.subr.bf16.mxu0 %v7918_v1  ;;  %v3473_v35 = vor.u32 %v3472_v24, %v3469_v23  ;;  %v3476_v36 = vshrl.u32 %v7699_v27, 16  ;;  %v3479_v37 = vshll.u32 %v7699_v27, 16  ;;  %v7713_v24 = vld [vmem:[%s9227_s3 + $0x4c8] sm:$0xff]  }
  0x82   : > { %v7720_v27 = vld [vmem:[%s8395_s12 + $0x8] sm:$0xff]  }
  0x83   : > { %6558 = vmatpush3.bf16.msra.mxu1 %v7659_v29  ;;  %v1155_v29 = vshll.u32 %v7697_v22, 16  ;;  %v3474_v42 = vsel %vm1320_vm3, %v3465_v34, %v3473_v35  ;;  %v3478_v44 = vrot.slane %v3476_v36, 1  ;;  %v3481_v45 = vrot.slane %v3479_v37, 2  ;;  %v7712_v22 = vld [vmem:[%s9227_s3 + $0x188] sm:$0xff]  }
  0x84   : > { %6922 = vmatpush3.bf16.msra.mxu0 %v7660_v30  ;;  %6559 = vmatprep.subr.bf16.mxu1 %v7918_v1  ;;  %v7683_v30 = vld [vmem:[%s9227_s3 + $0x138] sm:$0xff]   ;;  %v7733_v34 = vld [vmem:[%s8395_s12 + $0x8] sm:$0xff]   ;;  %v3802_v36 = vshrl.u32 %v7732_v32, 16  ;;  %v3805_v37 = vshll.u32 %v7732_v32, 16 }
  0x85   : > { %6923 = vmatprep.subr.bf16.mxu0 %v7918_v1  ;;  %v1157_v40 = vrot.slane %v1155_v29, 4  ;;  %v7716_v29 = vld [vmem:[%s9227_s3 + $0x198] sm:$0xff]  }
  0x87   : > { %6560 = vmatpush3.bf16.msra.mxu1 %v7661_v38  ;;  %v7687_v38 = vld [vmem:[%s9227_s3 + $0x140] sm:$0xff]  }
  0x88   : > { %6924 = vmatpush3.bf16.msra.mxu0 %v7662_v39  ;;  %6573 = vmatprep.subr.bf16.mxu1 %v7918_v1  ;;  %v1154_v39 = vrot.slane %v1152_v28, 3  ;;  %v7715_v28 = vld [vmem:[%s9227_s3 + $0x4d0] sm:$0xff]  }
  0x89   : > { %6937 = vmatprep.subr.bf16.mxu0 %v7918_v1 }
  0x8a   : > { %6562 = vmatmul.mubr.bf16.vlgmr.msra.gmra.mrb[0].mxu1 %v970_v47  ;;  %v1158_v47 = vor.u32 %v1157_v40, %v1154_v39  ;;  %v3810_v39 = vshrl.u32 %v7733_v34, 16  ;;  %v3813_v40 = vshll.u32 %v7733_v34, 16 }
  0x8b   : > { %6574 = vmatpush3.bf16.msra.mxu1 %v7665_v46  ;;  %6926 = vmatmul.mubr.bf16.vlgmr.msra.gmra.mrb[0].mxu0 %v3288_v49  ;;  %v7691_v46 = vld [vmem:[%s9227_s3 + $0x148] sm:$0xff]   ;;  %v3482_v49 = vor.u32 %v3481_v45, %v3478_v44  ;;  %v7726_v45 = vld [vmem:[%s9227_s3 + $0x4f0] sm:$0xff]  }
  0x8c   : > { %6938 = vmatpush3.bf16.msra.mxu0 %v7668_v50  ;;  %6575 = vmatprep.subr.bf16.mxu1 %v7918_v1  ;;  %v7693_v50 = vld [vmem:[%s9227_s3 + $0x150] sm:$0xff]   ;;  %v1159_v51 = vsel %vm1133_vm1, %v1149_v33, %v1158_v47 }
  0x8d   : > { %6939 = vmatprep.subr.bf16.mxu0 %v7918_v1  ;;  %6565 = vmatprep.mubr.msk.bf16.mxu1 %vm7919_vm0, %v7918_v1  ;;  %v7725_v33 = vld [vmem:[%s8395_s12 + $0x10] ss:$0 sps:$4 sm:$0xff]  }
  0x8e   : > { %6929 = vmatprep.mubr.msk.bf16.mxu0 %vm7919_vm0, %v7918_v1  ;;  %v7730_v44 = vld [vmem:[%s8045_s15 + $0xc] sm:$0xff]  }
  0x8f   : > { %6576 = vmatpush3.bf16.msra.mxu1 %v7669_v53  ;;  %v3483_v53 = vsel %vm1320_vm3, %v3473_v35, %v3482_v49  ;;  %v7721_v35 = vld [vmem:[%s9227_s3 + $0x4e0] sm:$0xff]  }
  0x90   : > { %6940 = vmatpush3.bf16.msra.mxu0 %v7670_v55  ;;  %6577 = vmatprep.subr.bf16.mxu1 %v7918_v1  ;;  %v7696_v55 = vld [vmem:[%s9227_s3 + $0x498] sm:$0xff]  }
  0x91   : > { %6941 = vmatprep.subr.bf16.mxu0 %v7918_v1 }
  0x92   : > { %6566 = vmatmul.mubr.bf16.gmra.mrb[4].mxu1 %v972_v58  ;;  %v7698_v58 = vld [vmem:[%s9227_s3 + $0x160] sm:$0xff]  }
  0x93   : > { %6578 = vmatpush3.bf16.msra.mxu1 %v7671_v57  ;;  %6930 = vmatmul.mubr.bf16.gmra.mrb[4].mxu0 %v3297_v60  ;;  %v7708_v57 = vld [vmem:[%s8045_s15 + $0x20] sm:$0xff]  }
  0x94   : > { %6942 = vmatpush3.bf16.msra.mxu0 %v7672_v59  ;;  %6579 = vmatprep.subr.bf16.mxu1 %v7918_v1  ;;  %v7700_v59 = vld [vmem:[%s9227_s3 + $0x4a0] sm:$0xff]  }
  0x95   : > { %6943 = vmatprep.subr.bf16.mxu0 %v7918_v1  ;;  %6569 = vmatprep.mubr.msk.bf16.mxu1 %vm7919_vm0, %v7918_v1 }
  0x96   : > { %6933 = vmatprep.mubr.msk.bf16.mxu0 %vm7919_vm0, %v7918_v1 }
  0x97   : > { %6580 = vmatpush3.bf16.msra.mxu1 %v7673_v62  ;;  %v1330_v62 = vshrl.u32 %v7708_v57, 16 }
  0x98   : > { %6944 = vmatpush3.bf16.msra.mxu0 %v7674_v63  ;;  %6581 = vmatprep.subr.bf16.mxu1 %v7918_v1  ;;  %v1333_v63 = vshll.u32 %v7708_v57, 16 }
  0x99   : > { %6945 = vmatprep.subr.bf16.mxu0 %v7918_v1  ;;  %v1332_v6 = vrot.slane %v1330_v62, 1 }
  0x9a   : > { %6570 = vmatmul.mubr.bf16.gmra.mrb[8].mxu1 %v971_v54  ;;  %v7695_v54 = vld [vmem:[%s9227_s3 + $0x158] sm:$0xff]  }
  0x9b   : > { %6582 = vmatpush3.bf16.msra.mxu1 %v7676_v0  ;;  %6934 = vmatmul.mubr.bf16.gmra.mrb[8].mxu0 %v3296_v56  ;;  %v7707_v56 = vld [vmem:[%s8045_s15 + $0x18] sm:$0xfe]   ;;  %v7701_v0 = vld [vmem:[%s9227_s3 + $0x168] sm:$0xff]  }
  0x9c   : > { %6946 = vmatpush3.bf16.msra.mxu0 %v7678_v3  ;;  %6583 = vmatprep.subr.bf16.mxu1 %v7918_v1  ;;  %v1322_v60 = vshrl.u32 %v7707_v56, 16  ;;  %v1325_v61 = vshll.u32 %v7707_v56, 16  ;;  %v7703_v3 = vld [vmem:[%s9227_s3 + $0x170] sm:$0xff]  }
  0x9d   : > { %6947 = vmatprep.subr.bf16.mxu0 %v7918_v1  ;;  %6589 = vmatprep.mubr.msk.bf16.mxu1 %vm7919_vm0, %v7918_v1 }
  0x9e   : > { %6953 = vmatprep.mubr.msk.bf16.mxu0 %vm7919_vm0, %v7918_v1  ;;  %v1324_v4 = vrot.slane %v1322_v60, 1  ;;  %v1327_v5 = vrot.slane %v1325_v61, 2  ;;  %v7741_v61 = vld [vmem:[%s8045_s15 + $0x14] sm:$0x1f]  }
  0x9f   : > { %6584 = vmatpush3.bf16.msra.mxu1 %v7679_v7  ;;  %v1335_v7 = vrot.slane %v1333_v63, 2  ;;  %v7734_v63 = vld [vmem:[%s9227_s3 + $0x500] sm:$0xff]  }
  0xa0   : > { %6948 = vmatpush3.bf16.msra.mxu0 %v7680_v10  ;;  %6585 = vmatprep.subr.bf16.mxu1 %v7918_v1  ;;  %v7705_v10 = vld [vmem:[%s9227_s3 + $0x178] sm:$0xff]   ;;  %v1328_v11 = vor.u32 %v1327_v5, %v1324_v4  ;;  %v1510_v4 = vrot.slane %v7741_v61, 1  ;;  %v7736_v5 = vld [vmem:[%s9227_s3 + $0x508] sm:$0xff]  }
  0xa1   : > { %6949 = vmatprep.subr.bf16.mxu0 %v7918_v1  ;;  %v1336_v12 = vor.u32 %v1335_v7, %v1332_v6  ;;  %v7737_v7 = vld [vmem:[%s9227_s3 + $0x1d0] sm:$0xff]  }
  0xa3   : > { %6586 = vmatpush3.bf16.msra.mxu1 %v7681_v17  ;;  %v7710_v17 = vld [vmem:[%s8395_s12] sm:$0xff]   ;;  %v1337_v19 = vsel %vm1320_vm3, %v1328_v11, %v1336_v12  ;;  %v7739_v11 = vld [vmem:[%s9227_s3 + $0x1d8] sm:$0xff]  }
  0xa4   : > { %6950 = vmatpush3.bf16.msra.mxu0 %v7682_v20  ;;  %6587 = vmatprep.subr.bf16.mxu1 %v7918_v1  ;;  %v1341_v20 = vrot.slane %v1339_v13, 1  ;;  %v7742_v13 = vld [vmem:[%s9227_s3 + $0x1e0] sm:$0xff]  }
  0xa5   : > { %6951 = vmatprep.subr.bf16.mxu0 %v7918_v1 }
  0xa6   : > { %v1345_v23 = vor.u32 %v1344_v21, %v1341_v20  ;;  %v1676_v20 = vshll.u32 %v7751_v14, 16  ;;  %v7755_v21 = vld [vmem:[%s8395_s12 + $0x8] sm:$0xff]  }
  0xa7   : > { %6588 = vmatpush3.bf16.msra.mxu1 %v7683_v30  ;;  %v7717_v30 = vld [vmem:[%s9227_s3 + $0x4d8] sm:$0xff]  }
  0xa8   : > { %6952 = vmatpush3.bf16.msra.mxu0 %v7684_v31  ;;  %6601 = vmatprep.subr.bf16.mxu1 %v7918_v1  ;;  %v1346_v26 = vsel %vm1320_vm3, %v1336_v12, %v1345_v23  ;;  %v7719_v31 = vld [vmem:[%s9227_s3 + $0x1a0] sm:$0xff]   ;;  %v7740_v12 = vld [vmem:[%s9227_s3 + $0x518] sm:$0xff]  }
  0xa9   : > { %6965 = vmatprep.subr.bf16.mxu0 %v7918_v1 }
  0xaa   : > { %6590 = vmatmul.mubr.bf16.vlgmr.msra.gmra.mrb[0].mxu1 %v1150_v41  ;;  %v7723_v41 = vld [vmem:[%s9227_s3 + $0x4e8] sm:$0xff]  }
  0xab   : > { %6602 = vmatpush3.bf16.msra.mxu1 %v7687_v38  ;;  %6954 = vmatmul.mubr.bf16.vlgmr.msra.gmra.mrb[0].mxu0 %v3474_v42  ;;  %v7722_v38 = vld [vmem:[%s9227_s3 + $0x1a8] sm:$0xff]   ;;  %v7724_v42 = vld [vmem:[%s9227_s3 + $0x1b0] sm:$0xff]  }
  0xac   : > { %6966 = vmatpush3.bf16.msra.mxu0 %v7690_v43  ;;  %6603 = vmatprep.subr.bf16.mxu1 %v7918_v1  ;;  %v7729_v43 = vld [vmem:[%s8045_s15 + $0x4] sm:$0xfe]  }
  0xad   : > { %6967 = vmatprep.subr.bf16.mxu0 %v7918_v1  ;;  %6593 = vmatprep.mubr.msk.bf16.mxu1 %vm7919_vm0, %v7918_v1 }
  0xae   : > { %6957 = vmatprep.mubr.msk.bf16.mxu0 %vm7919_vm0, %v7918_v1 }
  0xaf   : > { %6604 = vmatpush3.bf16.msra.mxu1 %v7691_v46  ;;  %v3804_v46 = vrot.slane %v3802_v36, 2  ;;  %v7749_v36 = vld [vmem:[%s9227_s3 + $0x1f8] sm:$0xff]  }
  0xb0   : > { %6968 = vmatpush3.bf16.msra.mxu0 %v7692_v48  ;;  %6605 = vmatprep.subr.bf16.mxu1 %v7918_v1  ;;  %v3812_v48 = vrot.slane %v3810_v39, 2 }
  0xb1   : > { %6969 = vmatprep.subr.bf16.mxu0 %v7918_v1 }
  0xb2   : > { %6594 = vmatmul.mubr.bf16.gmra.mrb[4].mxu1 %v1159_v51  ;;  %v7727_v51 = vld [vmem:[%s9227_s3 + $0x1b8] sm:$0xff]  }
  0xb3   : > { %6606 = vmatpush3.bf16.msra.mxu1 %v7693_v50  ;;  %6958 = vmatmul.mubr.bf16.gmra.mrb[4].mxu0 %v3483_v53  ;;  %v7743_v50 = vld [vmem:[%s8395_s12 + $0x10] sm:$0x7f]   ;;  %v1507_v53 = vrot.slane %v7729_v43, 1 }
  0xb4   : > { %6970 = vmatpush3.bf16.msra.mxu0 %v7694_v52  ;;  %6607 = vmatprep.subr.bf16.mxu1 %v7918_v1  ;;  %v7728_v52 = vld [vmem:[%s9227_s3 + $0x4f8] sm:$0xff]   ;;  %v3819_v57 = vshrl.u32 %v7743_v50, 16 }
  0xb5   : > { %6971 = vmatprep.subr.bf16.mxu0 %v7918_v1  ;;  %6597 = vmatprep.mubr.msk.bf16.mxu1 %vm7919_vm0, %v7918_v1 }
  0xb6   : > { %6961 = vmatprep.mubr.msk.bf16.mxu0 %vm7919_vm0, %v7918_v1 }
  0xb7   : > { %6608 = vmatpush3.bf16.msra.mxu1 %v7695_v54  ;;  %v1508_v54 = vrot.slane %v7730_v44, 1  ;;  %v7765_v44 = vld [vmem:[%s8395_s12 + $0x10] sm:$0x1f]  }
  0xb8   : > { %6972 = vmatpush3.bf16.msra.mxu0 %v7696_v55  ;;  %6609 = vmatprep.subr.bf16.mxu1 %v7918_v1 }
  0xb9   : > { %6973 = vmatprep.subr.bf16.mxu0 %v7918_v1  ;;  %v1509_v60 = vsel %vm967_vm5, %v1507_v53, %v1508_v54  ;;  %v7757_v53 = vld [vmem:[%s9227_s3 + $0x208] sm:$0xff]  }
  0xba   : > { %6598 = vmatmul.mubr.bf16.gmra.mrb[8].mxu1 %v1158_v47  ;;  %v3807_v47 = vrot.slane %v3805_v37, 3  ;;  %v7750_v37 = vld [vmem:[%s9227_s3 + $0x538] sm:$0xff]  }
  0xbb   : > { %6610 = vmatpush3.bf16.msra.mxu1 %v7698_v58  ;;  %6962 = vmatmul.mubr.bf16.gmra.mrb[8].mxu0 %v3482_v49  ;;  %v3815_v49 = vrot.slane %v3813_v40, 3  ;;  %v3822_v58 = vshll.u32 %v7743_v50, 16  ;;  %v7756_v50 = vld [vmem:[%s9227_s3 + $0x540] sm:$0xff]  }
  0xbc   : > { %6974 = vmatpush3.bf16.msra.mxu0 %v7700_v59  ;;  %6611 = vmatprep.subr.bf16.mxu1 %v7918_v1  ;;  %v3808_v55 = vor.u32 %v3807_v47, %v3804_v46  ;;  %v7731_v59 = vld [vmem:[%s9227_s3 + $0x1c0] sm:$0xff]  }
  0xbd   : > { %6975 = vmatprep.subr.bf16.mxu0 %v7918_v1  ;;  %6617 = vmatprep.mubr.msk.bf16.mxu1 %vm7919_vm0, %v7918_v1  ;;  %v3816_v56 = vor.u32 %v3815_v49, %v3812_v48 }
  0xbe   : > { %6981 = vmatprep.mubr.msk.bf16.mxu0 %vm7919_vm0, %v7918_v1 }
  0xbf   : > { %6612 = vmatpush3.bf16.msra.mxu1 %v7701_v0  ;;  %v3817_v62 = vsel %vm596_vm2, %v3808_v55, %v3816_v56  ;;  %v3821_v0 = vrot.slane %v3819_v57, 2  ;;  %v7758_v55 = vld [vmem:[%s9227_s3 + $0x548] sm:$0xff]  }
  0xc0   : > { %6976 = vmatpush3.bf16.msra.mxu0 %v7702_v2  ;;  %6613 = vmatprep.subr.bf16.mxu1 %v7918_v1  ;;  %v3824_v2 = vrot.slane %v3822_v58, 3  ;;  %v7759_v58 = vld [vmem:[%s9227_s3 + $0x210] sm:$0xff]  }
  0xc1   : > { %6977 = vmatprep.subr.bf16.mxu0 %v7918_v1 }
  0xc2   : > { %v3825_v6 = vor.u32 %v3824_v2, %v3821_v0  ;;  %v4007_v0 = vshrl.u32 %v7765_v44, 16  ;;  %v7773_v2 = vld [vmem:[%s8045_s15 + $0x4] sm:$0xfe]  }
  0xc3   : > { %6614 = vmatpush3.bf16.msra.mxu1 %v7703_v3  ;;  %v7735_v3 = vld [vmem:[%s9227_s3 + $0x1c8] sm:$0xff]  }
  0xc4   : > { %6978 = vmatpush3.bf16.msra.mxu0 %v7704_v9  ;;  %6615 = vmatprep.subr.bf16.mxu1 %v7918_v1  ;;  %v1511_v9 = vsel %vm967_vm5, %v1508_v54, %v1510_v4 }
  0xc5   : > { %6979 = vmatprep.subr.bf16.mxu0 %v7918_v1 }
  0xc7   : > { %6616 = vmatpush3.bf16.msra.mxu1 %v7705_v10  ;;  %v3826_v10 = vsel %vm596_vm2, %v3816_v56, %v3825_v6 }
  0xc8   : > { %6980 = vmatpush3.bf16.msra.mxu0 %v7706_v15  ;;  %6629 = vmatprep.subr.bf16.mxu1 %v7918_v1  ;;  %v7744_v15 = vld [vmem:[%s9227_s3 + $0x520] sm:$0xff]  }
  0xc9   : > { %6993 = vmatprep.subr.bf16.mxu0 %v7918_v1 }
  0xca   : > { %6618 = vmatmul.mubr.bf16.vlgmr.msra.gmra.mrb[0].mxu1 %v1337_v19  ;;  %v1673_v19 = vshrl.u32 %v7751_v14, 16 }
  0xcb   : > { %6630 = vmatpush3.bf16.msra.mxu1 %v7709_v16  ;;  %6982 = vmatmul.mubr.bf16.vlgmr.msra.gmra.mrb[0].mxu0 %v7710_v17  ;;  %v7752_v16 = vld [vmem:[%s8045_s15 + $0xc] sm:$0xff]   ;;  %v7754_v17 = vld [vmem:[%s8395_s12] sm:$0xff]  }
  0xcc   : > { %6994 = vmatpush3.bf16.msra.mxu0 %v7711_v18  ;;  %6631 = vmatprep.subr.bf16.mxu1 %v7918_v1  ;;  %v7745_v18 = vld [vmem:[%s9227_s3 + $0x1e8] sm:$0xff]   ;;  %v3988_v34 = vshrl.u32 %v7754_v17, 16 }
  0xcd   : > { %6995 = vmatprep.subr.bf16.mxu0 %v7918_v1  ;;  %6621 = vmatprep.mubr.msk.bf16.mxu1 %vm7919_vm0, %v7918_v1 }
  0xce   : > { %6985 = vmatprep.mubr.msk.bf16.mxu0 %vm7919_vm0, %v7918_v1 }
  0xcf   : > { %6632 = vmatpush3.bf16.msra.mxu1 %v7712_v22  ;;  %v1681_v22 = vshrl.u32 %v7752_v16, 16 }
  0xd0   : > { %6996 = vmatpush3.bf16.msra.mxu0 %v7713_v24  ;;  %6633 = vmatprep.subr.bf16.mxu1 %v7918_v1  ;;  %v7746_v24 = vld [vmem:[%s9227_s3 + $0x528] sm:$0xff]  }
  0xd1   : > { %6997 = vmatprep.subr.bf16.mxu0 %v7918_v1 }
  0xd2   : > { %6622 = vmatmul.mubr.bf16.gmra.mrb[4].mxu1 %v1346_v26  ;;  %v7747_v26 = vld [vmem:[%s9227_s3 + $0x1f0] sm:$0xff]  }
  0xd3   : > { %6634 = vmatpush3.bf16.msra.mxu1 %v7714_v25  ;;  %6986 = vmatmul.mubr.bf16.gmra.mrb[4].mxu0 %v7720_v27  ;;  %v3990_v25 = vshll.u32 %v7754_v17, 16  ;;  %v7748_v27 = vld [vmem:[%s9227_s3 + $0x530] sm:$0xff]  }
  0xd4   : > { %6998 = vmatpush3.bf16.msra.mxu0 %v7715_v28  ;;  %6635 = vmatprep.subr.bf16.mxu1 %v7918_v1  ;;  %v1675_v28 = vrot.slane %v1673_v19, 3  ;;  %v7776_v19 = vld [vmem:[%s8395_s12 + $0x18] sm:$0xfe]  }
  0xd5   : > { %6999 = vmatprep.subr.bf16.mxu0 %v7918_v1  ;;  %6625 = vmatprep.mubr.msk.bf16.mxu1 %vm7919_vm0, %v7918_v1 }
  0xd6   : > { %6989 = vmatprep.mubr.msk.bf16.mxu0 %vm7919_vm0, %v7918_v1 }
  0xd7   : > { %6636 = vmatpush3.bf16.msra.mxu1 %v7716_v29  ;;  %v3995_v29 = vshll.u32 %v7755_v21, 16 }
  0xd8   : > { %7000 = vmatpush3.bf16.msra.mxu0 %v7717_v30  ;;  %6637 = vmatprep.subr.bf16.mxu1 %v7918_v1  ;;  %v1678_v30 = vrot.slane %v1676_v20, 4  ;;  %v7785_v20 = vld [vmem:[%s8045_s15 + $0x14] sm:$0x3f]  }
  0xd9   : > { %7001 = vmatprep.subr.bf16.mxu0 %v7918_v1 }
  0xda   : > { %6626 = vmatmul.mubr.bf16.gmra.mrb[8].mxu1 %v1345_v23  ;;  %v1684_v23 = vshll.u32 %v7752_v16, 16  ;;  %v1679_v39 = vor.u32 %v1678_v30, %v1675_v28  ;;  %v4170_v28 = vrot.slane %v7776_v19, 1  ;;  %v7775_v30 = vld [vmem:[%s9227_s3 + $0x240] sm:$0xff]  }
  0xdb   : > { %6638 = vmatpush3.bf16.msra.mxu1 %v7719_v31  ;;  %6990 = vmatmul.mubr.bf16.gmra.mrb[8].mxu0 %v7725_v33  ;;  %v1683_v31 = vrot.slane %v1681_v22, 3  ;;  %v7763_v33 = vld [vmem:[%s8045_s15 + $0x14] sm:$0xff]  }
  0xdc   : > { %7002 = vmatpush3.bf16.msra.mxu0 %v7721_v35  ;;  %6639 = vmatprep.subr.bf16.mxu1 %v7918_v1  ;;  %v1686_v32 = vrot.slane %v1684_v23, 4  ;;  %v3992_v35 = vrot.slane %v3990_v25, 1  ;;  %v7771_v22 = vld [vmem:[%s9227_s3 + $0x238] sm:$0xff]  }
  0xdd   : > { %7003 = vmatprep.subr.bf16.mxu0 %v7918_v1  ;;  %6645 = vmatprep.mubr.msk.bf16.mxu1 %vm7919_vm0, %v7918_v1  ;;  %v7772_v23 = vld [vmem:[%s9227_s3 + $0x578] sm:$0xff]  }
  0xde   : > { %7009 = vmatprep.mubr.msk.bf16.mxu0 %vm7919_vm0, %v7918_v1  ;;  %v1687_v40 = vor.u32 %v1686_v32, %v1683_v31  ;;  %v3993_v43 = vor.u32 %v3992_v35, %v3988_v34  ;;  %v7778_v31 = vld [vmem:[%s9227_s3 + $0x580] sm:$0xff]  }
  0xdf   : > { %6640 = vmatpush3.bf16.msra.mxu1 %v7722_v38  ;;  %v3997_v38 = vrot.slane %v3995_v29, 1 }
  0xe0   : > { %7004 = vmatpush3.bf16.msra.mxu0 %v7723_v41  ;;  %6641 = vmatprep.subr.bf16.mxu1 %v7918_v1  ;;  %v1690_v41 = vshrl.u32 %v7763_v33, 16  ;;  %v1688_v46 = vsel %vm1133_vm1, %v1679_v39, %v1687_v40  ;;  %v7780_v39 = vld [vmem:[%s9227_s3 + $0x588] sm:$0xff]  }
  0xe1   : > { %7005 = vmatprep.subr.bf16.mxu0 %v7918_v1  ;;  %v3998_v49 = vsel %vm783_vm4, %v3993_v43, %v3997_v38  ;;  %v7782_v43 = vld [vmem:[%s9227_s3 + $0x590] sm:$0xff]  }
  0xe2   : > { %v1692_v47 = vrot.slane %v1690_v41, 3  ;;  %v7781_v41 = vld [vmem:[%s9227_s3 + $0x250] sm:$0xff]  }
  0xe3   : > { %6642 = vmatpush3.bf16.msra.mxu1 %v7724_v42  ;;  %v1693_v42 = vshll.u32 %v7763_v33, 16 }
  0xe4   : > { %7006 = vmatpush3.bf16.msra.mxu0 %v7726_v45  ;;  %6643 = vmatprep.subr.bf16.mxu1 %v7918_v1  ;;  %v7753_v45 = vld [vmem:[%s9227_s3 + $0x200] sm:$0xff]  }
  0xe5   : > { %7007 = vmatprep.subr.bf16.mxu0 %v7918_v1  ;;  %v1695_v48 = vrot.slane %v1693_v42, 4 }
  0xe7   : > { %6644 = vmatpush3.bf16.msra.mxu1 %v7727_v51  ;;  %v3999_v51 = vshrl.u32 %v7755_v21, 16  ;;  %v1696_v54 = vor.u32 %v1695_v48, %v1692_v47  ;;  %v7777_v21 = vld [vmem:[%s8395_s12 + $0x20] sm:$0xff]   ;;  %v7797_v48 = vld [vmem:[%s8395_s12 + $0x18] sm:$0xf8]  }
  0xe8   : > { %7008 = vmatpush3.bf16.msra.mxu0 %v7728_v52  ;;  %6657 = vmatprep.subr.bf16.mxu1 %v7918_v1  ;;  %v4003_v52 = vshll.u32 %v7765_v44, 16  ;;  %v4171_v29 = vrot.slane %v7777_v21, 1  ;;  %v7786_v47 = vld [vmem:[%s9227_s3 + $0x260] sm:$0xff]   ;;  %v7805_v21 = vld [vmem:[%s9227_s3 + $0x5d8] sm:$0xff]  }
  0xe9   : > { %7021 = vmatprep.subr.bf16.mxu0 %v7918_v1  ;;  %v4001_v56 = vor.u32 %v3999_v51, %v3997_v38  ;;  %v7789_v51 = vld [vmem:[%s9227_s3 + $0x268] sm:$0xff]  }
  0xea   : > { %6646 = vmatmul.mubr.bf16.vlgmr.msra.gmra.mrb[0].mxu1 %v1509_v60  ;;  %v4005_v57 = vrot.slane %v4003_v52, 1  ;;  %v7760_v60 = vld [vmem:[%s9227_s3 + $0x550] sm:$0xff]   ;;  %v4172_v35 = vsel %vm967_vm5, %v4170_v28, %v4171_v29  ;;  %v4336_v52 = vshrl.u32 %v7797_v48, 16  ;;  %v7821_v28 = vld [vmem:[%s8395_s12 + $0x20] sm:$0xff]  }
  0xeb   : > { %6658 = vmatpush3.bf16.msra.mxu1 %v7731_v59  ;;  %7010 = vmatmul.mubr.bf16.vlgmr.msra.gmra.mrb[0].mxu0 %v3817_v62  ;;  %v1697_v59 = vsel %vm1133_vm1, %v1687_v40, %v1696_v54  ;;  %v7761_v62 = vld [vmem:[%s9227_s3 + $0x218] sm:$0xff]  }
  0xec   : > { %7022 = vmatpush3.bf16.msra.mxu0 %v7734_v63  ;;  %6659 = vmatprep.subr.bf16.mxu1 %v7918_v1  ;;  %v4006_v61 = vsel %vm783_vm4, %v4001_v56, %v4005_v57  ;;  %v7762_v63 = vld [vmem:[%s9227_s3 + $0x558] sm:$0xff]  }
  0xed   : > { %7023 = vmatprep.subr.bf16.mxu0 %v7918_v1  ;;  %6649 = vmatprep.mubr.msk.bf16.mxu1 %vm7919_vm0, %v7918_v1 }
  0xee   : > { %7013 = vmatprep.mubr.msk.bf16.mxu0 %vm7919_vm0, %v7918_v1 }
  0xef   : > { %6660 = vmatpush3.bf16.msra.mxu1 %v7735_v3  ;;  %v7774_v3 = vld [vmem:[%s8045_s15 + $0xc] sm:$0xff]  }
  0xf0   : > { %7024 = vmatpush3.bf16.msra.mxu0 %v7736_v5  ;;  %6661 = vmatprep.subr.bf16.mxu1 %v7918_v1  ;;  %v4009_v5 = vor.u32 %v4007_v0, %v4005_v57  ;;  %v7791_v57 = vld [vmem:[%s9227_s3 + $0x270] sm:$0xff]   ;;  %v7793_v0 = vld [vmem:[%s9227_s3 + $0x278] sm:$0xff]  }
  0xf1   : > { %7025 = vmatprep.subr.bf16.mxu0 %v7918_v1 }
  0xf2   : > { %6650 = vmatmul.mubr.bf16.gmra.mrb[4].mxu1 %v1511_v9  ;;  %v1867_v9 = vshrl.u32 %v7774_v3, 16 }
  0xf3   : > { %6662 = vmatpush3.bf16.msra.mxu1 %v7737_v7  ;;  %7014 = vmatmul.mubr.bf16.gmra.mrb[4].mxu0 %v3826_v10  ;;  %v1859_v7 = vshrl.u32 %v7773_v2, 16  ;;  %v1870_v10 = vshll.u32 %v7774_v3, 16 }
  0xf4   : > { %7026 = vmatpush3.bf16.msra.mxu0 %v7738_v8  ;;  %6663 = vmatprep.subr.bf16.mxu1 %v7918_v1  ;;  %v1862_v8 = vshll.u32 %v7773_v2, 16  ;;  %v1869_v16 = vrot.slane %v1867_v9, 1  ;;  %v7794_v2 = vld [vmem:[%s9227_s3 + $0x5b8] sm:$0xff]  }
  0xf5   : > { %7027 = vmatprep.subr.bf16.mxu0 %v7918_v1  ;;  %6653 = vmatprep.mubr.msk.bf16.mxu1 %vm7919_vm0, %v7918_v1  ;;  %v1872_v17 = vrot.slane %v1870_v10, 2  ;;  %v7799_v10 = vld [vmem:[%s9227_s3 + $0x5c0] sm:$0xff]  }
  0xf6   : > { %7017 = vmatprep.mubr.msk.bf16.mxu0 %vm7919_vm0, %v7918_v1  ;;  %v1864_v14 = vrot.slane %v1862_v8, 2  ;;  %v7796_v8 = vld [vmem:[%s9227_s3 + $0x280] sm:$0xff]  }
  0xf7   : > { %6664 = vmatpush3.bf16.msra.mxu1 %v7739_v11  ;;  %v7767_v11 = vld [vmem:[%s9227_s3 + $0x228] sm:$0xff]   ;;  %v1873_v25 = vor.u32 %v1872_v17, %v1869_v16  ;;  %v7802_v17 = vld [vmem:[%s9227_s3 + $0x290] sm:$0xff]  }
  0xf8   : > { %7028 = vmatpush3.bf16.msra.mxu0 %v7740_v12  ;;  %6665 = vmatprep.subr.bf16.mxu1 %v7918_v1  ;;  %v7768_v12 = vld [vmem:[%s9227_s3 + $0x568] sm:$0xff]  }
  0xf9   : > { %7029 = vmatprep.subr.bf16.mxu0 %v7918_v1  ;;  %v7806_v16 = vld [vmem:[%s8070_s17 + $0x8] sm:$0xff]  }
  0xfa   : > { %6654 = vmatmul.mubr.bf16.gmra.mrb[8].mxu1 %v1510_v4  ;;  %v7764_v4 = vld [vmem:[%s9227_s3 + $0x220] sm:$0xff]  }
  0xfb   : > { %6666 = vmatpush3.bf16.msra.mxu1 %v7742_v13  ;;  %7018 = vmatmul.mubr.bf16.gmra.mrb[8].mxu0 %v3825_v6  ;;  %v7766_v6 = vld [vmem:[%s9227_s3 + $0x560] sm:$0xff]   ;;  %v1861_v13 = vrot.slane %v1859_v7, 1 }
  0xfc   : > { %7030 = vmatpush3.bf16.msra.mxu0 %v7744_v15  ;;  %6667 = vmatprep.subr.bf16.mxu1 %v7918_v1  ;;  %v7769_v15 = vld [vmem:[%s9227_s3 + $0x230] sm:$0xff]   ;;  %v7795_v7 = vld [vmem:[%s8070_s17] sm:$0xff]  }
  0xfd   : > { %7031 = vmatprep.subr.bf16.mxu0 %v7918_v1  ;;  %6673 = vmatprep.mubr.msk.bf16.mxu1 %vm7919_vm0, %v7918_v1 }
  0xfe   : > { %7037 = vmatprep.mubr.msk.bf16.mxu0 %vm7919_vm0, %v7918_v1 }
  0xff   : > { %6668 = vmatpush3.bf16.msra.mxu1 %v7745_v18  ;;  %v7770_v18 = vld [vmem:[%s9227_s3 + $0x570] sm:$0xff]  }
 0x100   : > { %7032 = vmatpush3.bf16.msra.mxu0 %v7746_v24  ;;  %6669 = vmatprep.subr.bf16.mxu1 %v7918_v1  ;;  %v1865_v24 = vor.u32 %v1864_v14, %v1861_v13  ;;  %v7800_v13 = vld [vmem:[%s9227_s3 + $0x288] sm:$0xff]  }
 0x101   : > { %7033 = vmatprep.subr.bf16.mxu0 %v7918_v1  ;;  %v7801_v14 = vld [vmem:[%s9227_s3 + $0x5c8] sm:$0xff]  }
 0x102   : > { %v1874_v32 = vsel %vm1320_vm3, %v1865_v24, %v1873_v25  ;;  %v7817_v24 = vld [vmem:[%s8070_s17] sm:$0xfc]  }
 0x103   : > { %6670 = vmatpush3.bf16.msra.mxu1 %v7747_v26  ;;  %v1876_v26 = vshrl.u32 %v7785_v20, 16 }
 0x104   : > { %7034 = vmatpush3.bf16.msra.mxu0 %v7748_v27  ;;  %6671 = vmatprep.subr.bf16.mxu1 %v7918_v1  ;;  %v1879_v27 = vshll.u32 %v7785_v20, 16  ;;  %v7804_v20 = vld [vmem:[%s9227_s3 + $0x298] sm:$0xff]  }
 0x105   : > { %7035 = vmatprep.subr.bf16.mxu0 %v7918_v1  ;;  %v1878_v33 = vrot.slane %v1876_v26, 1  ;;  %v7809_v26 = vld [vmem:[%s9227_s3 + $0x5e0] sm:$0xff]  }
 0x106   : > { %v1881_v34 = vrot.slane %v1879_v27, 2  ;;  %v7820_v27 = vld [vmem:[%s8395_s12 + $0x18] sm:$0xfe]  }
 0x107   : > { %6672 = vmatpush3.bf16.msra.mxu1 %v7749_v36  ;;  %v7787_v36 = vld [vmem:[%s8395_s12 + $0x28] sm:$0x1f]  }
 0x108   : > { %7036 = vmatpush3.bf16.msra.mxu0 %v7750_v37  ;;  %6685 = vmatprep.subr.bf16.mxu1 %v7918_v1  ;;  %v7779_v37 = vld [vmem:[%s9227_s3 + $0x248] sm:$0xff]   ;;  %v1882_v38 = vor.u32 %v1881_v34, %v1878_v33  ;;  %v4173_v40 = vrot.slane %v7787_v36, 1  ;;  %v4525_v36 = vshll.u32 %v7820_v27, 16 }
 0x109   : > { %7049 = vmatprep.subr.bf16.mxu0 %v7918_v1  ;;  %v7811_v34 = vld [vmem:[%s9227_s3 + $0x5e8] sm:$0xff]  }
 0x10a   : > { %6674 = vmatmul.mubr.bf16.vlgmr.msra.gmra.mrb[0].mxu1 %v1688_v46  ;;  %v1883_v42 = vsel %vm1320_vm3, %v1873_v25, %v1882_v38  ;;  %v4174_v44 = vsel %vm967_vm5, %v4171_v29, %v4173_v40  ;;  %v7784_v46 = vld [vmem:[%s9227_s3 + $0x598] sm:$0xff]   ;;  %v7818_v25 = vld [vmem:[%s8070_s17 + $0x8] sm:$0xff]  }
 0x10b   : > { %6686 = vmatpush3.bf16.msra.mxu1 %v7753_v45  ;;  %7038 = vmatmul.mubr.bf16.vlgmr.msra.gmra.mrb[0].mxu0 %v3998_v49  ;;  %v7783_v45 = vld [vmem:[%s9227_s3 + $0x258] sm:$0xff]   ;;  %v7788_v49 = vld [vmem:[%s9227_s3 + $0x5a0] sm:$0xff]   ;;  %v7810_v29 = vld [vmem:[%s9227_s3 + $0x2a8] sm:$0xff]   ;;  %v2213_v33 = vshll.u32 %v7818_v25, 16 }
 0x10c   : > { %7050 = vmatpush3.bf16.msra.mxu0 %v7756_v50  ;;  %6687 = vmatprep.subr.bf16.mxu1 %v7918_v1  ;;  %v7798_v50 = vld [vmem:[%s8395_s12 + $0x20] sm:$0xff]  }
 0x10d   : > { %7051 = vmatprep.subr.bf16.mxu0 %v7918_v1  ;;  %6677 = vmatprep.mubr.msk.bf16.mxu1 %vm7919_vm0, %v7918_v1  ;;  %v4347_v56 = vshll.u32 %v7798_v50, 16 }
 0x10e   : > { %7041 = vmatprep.mubr.msk.bf16.mxu0 %vm7919_vm0, %v7918_v1 }
 0x10f   : > { %6688 = vmatpush3.bf16.msra.mxu1 %v7757_v53  ;;  %v4339_v53 = vshll.u32 %v7797_v48, 16 }
 0x110   : > { %7052 = vmatpush3.bf16.msra.mxu0 %v7758_v55  ;;  %6689 = vmatprep.subr.bf16.mxu1 %v7918_v1  ;;  %v4344_v55 = vshrl.u32 %v7798_v50, 16  ;;  %v7831_v50 = vld [vmem:[%s8395_s12 + $0x28] sm:$0x3f]  }
 0x111   : > { %7053 = vmatprep.subr.bf16.mxu0 %v7918_v1 }
 0x112   : > { %6678 = vmatmul.mubr.bf16.gmra.mrb[4].mxu1 %v1697_v59  ;;  %v7808_v59 = vld [vmem:[%s8395_s12 + $0x28] sm:$0xff]  }
 0x113   : > { %6690 = vmatpush3.bf16.msra.mxu1 %v7759_v58  ;;  %7042 = vmatmul.mubr.bf16.gmra.mrb[4].mxu0 %v4006_v61  ;;  %v7792_v58 = vld [vmem:[%s9227_s3 + $0x5b0] sm:$0xff]   ;;  %v4341_v61 = vrot.slane %v4339_v53, 4  ;;  %v4353_v3 = vshrl.u32 %v7808_v59, 16 }
 0x114   : > { %7054 = vmatpush3.bf16.msra.mxu0 %v7760_v60  ;;  %6691 = vmatprep.subr.bf16.mxu1 %v7918_v1  ;;  %v4338_v60 = vrot.slane %v4336_v52, 3 }
 0x115   : > { %7055 = vmatprep.subr.bf16.mxu0 %v7918_v1  ;;  %6681 = vmatprep.mubr.msk.bf16.mxu1 %vm7919_vm0, %v7918_v1 }
 0x116   : > { %7045 = vmatprep.mubr.msk.bf16.mxu0 %vm7919_vm0, %v7918_v1 }
 0x117   : > { %6692 = vmatpush3.bf16.msra.mxu1 %v7761_v62  ;;  %v4346_v62 = vrot.slane %v4344_v55, 3 }
 0x118   : > { %7056 = vmatpush3.bf16.msra.mxu0 %v7762_v63  ;;  %6693 = vmatprep.subr.bf16.mxu1 %v7918_v1  ;;  %v4349_v63 = vrot.slane %v4347_v56, 4  ;;  %v7816_v56 = vld [vmem:[%s9227_s3 + $0x5f8] sm:$0xff]  }
 0x119   : > { %7057 = vmatprep.subr.bf16.mxu0 %v7918_v1 }
 0x11a   : > { %6682 = vmatmul.mubr.bf16.gmra.mrb[8].mxu1 %v1696_v54  ;;  %v7790_v54 = vld [vmem:[%s9227_s3 + $0x5a8] sm:$0xff]  }
 0x11b   : > { %6694 = vmatpush3.bf16.msra.mxu1 %v7764_v4  ;;  %7046 = vmatmul.mubr.bf16.gmra.mrb[8].mxu0 %v4009_v5  ;;  %v4356_v4 = vshll.u32 %v7808_v59, 16  ;;  %v4342_v5 = vor.u32 %v4341_v61, %v4338_v60  ;;  %v4539_v59 = vshrl.u32 %v7831_v50, 16  ;;  %v4542_v60 = vshll.u32 %v7831_v50, 16 }
 0x11c   : > { %7058 = vmatpush3.bf16.msra.mxu0 %v7766_v6  ;;  %6695 = vmatprep.subr.bf16.mxu1 %v7918_v1  ;;  %v4350_v6 = vor.u32 %v4349_v63, %v4346_v62  ;;  %v7819_v62 = vld [vmem:[%s9227_s3 + $0x2c0] sm:$0xff]  }
 0x11d   : > { %7059 = vmatprep.subr.bf16.mxu0 %v7918_v1  ;;  %6701 = vmatprep.mubr.msk.bf16.mxu1 %vm7919_vm0, %v7918_v1 }
 0x11e   : > { %7065 = vmatprep.mubr.msk.bf16.mxu0 %vm7919_vm0, %v7918_v1  ;;  %v4351_v9 = vsel %vm1133_vm1, %v4342_v5, %v4350_v6  ;;  %v4544_v5 = vrot.slane %v4542_v60, 2  ;;  %v7864_v60 = vld [vmem:[%s8395_s12 + $0xc] sm:$0xff]  }
 0x11f   : > { %6696 = vmatpush3.bf16.msra.mxu1 %v7767_v11  ;;  %v4355_v11 = vrot.slane %v4353_v3, 3  ;;  %v7822_v3 = vld [vmem:[%s9227_s3 + $0x600] sm:$0xff]  }
 0x120   : > { %7060 = vmatpush3.bf16.msra.mxu0 %v7768_v12  ;;  %6697 = vmatprep.subr.bf16.mxu1 %v7918_v1  ;;  %v4358_v12 = vrot.slane %v4356_v4, 4  ;;  %v4541_v4 = vrot.slane %v4539_v59, 1  ;;  %v7863_v59 = vld [vmem:[%s8395_s12 + $0x4] sm:$0xf8]  }
 0x121   : > { %7061 = vmatprep.subr.bf16.mxu0 %v7918_v1 }
 0x123   : > { %6698 = vmatpush3.bf16.msra.mxu1 %v7769_v15  ;;  %v4359_v15 = vor.u32 %v4358_v12, %v4355_v11  ;;  %v7826_v12 = vld [vmem:[%s9227_s3 + $0x610] sm:$0xff]  }
 0x124   : > { %7062 = vmatpush3.bf16.msra.mxu0 %v7770_v18  ;;  %6699 = vmatprep.subr.bf16.mxu1 %v7918_v1  ;;  %v7803_v18 = vld [vmem:[%s9227_s3 + $0x5d0] sm:$0xff]  }
 0x125   : > { %7063 = vmatprep.subr.bf16.mxu0 %v7918_v1  ;;  %v4360_v19 = vsel %vm1133_vm1, %v4350_v6, %v4359_v15  ;;  %v7823_v6 = vld [vmem:[%s9227_s3 + $0x2c8] sm:$0xff]  }
 0x127   : > { %6700 = vmatpush3.bf16.msra.mxu1 %v7771_v22  ;;  %v7812_v22 = vld [vmem:[%s8070_s17 + $0x10] ss:$0 sps:$4 sm:$0xff]  }
 0x128   : > { %7064 = vmatpush3.bf16.msra.mxu0 %v7772_v23  ;;  %6713 = vmatprep.subr.bf16.mxu1 %v7918_v1  ;;  %v7807_v23 = vld [vmem:[%s9227_s3 + $0x2a0] sm:$0xff]  }
 0x129   : > { %7077 = vmatprep.subr.bf16.mxu0 %v7918_v1 }
 0x12a   : > { %6702 = vmatmul.mubr.bf16.vlgmr.msra.gmra.mrb[0].mxu1 %v1874_v32  ;;  %v2210_v32 = vshrl.u32 %v7818_v25, 16 }
 0x12b   : > { %6714 = vmatpush3.bf16.msra.mxu1 %v7775_v30  ;;  %7066 = vmatmul.mubr.bf16.vlgmr.msra.gmra.mrb[0].mxu0 %v4172_v35  ;;  %v2202_v30 = vshrl.u32 %v7817_v24, 16  ;;  %v4522_v35 = vshrl.u32 %v7820_v27, 16  ;;  %v7836_v27 = vld [vmem:[%s9227_s3 + $0x630] sm:$0xff]  }
 0x12c   : > { %7078 = vmatpush3.bf16.msra.mxu0 %v7778_v31  ;;  %6715 = vmatprep.subr.bf16.mxu1 %v7918_v1  ;;  %v2205_v31 = vshll.u32 %v7817_v24, 16 }
 0x12d   : > { %7079 = vmatprep.subr.bf16.mxu0 %v7918_v1  ;;  %6705 = vmatprep.mubr.msk.bf16.mxu1 %vm7919_vm0, %v7918_v1 }
 0x12e   : > { %7069 = vmatprep.mubr.msk.bf16.mxu0 %vm7919_vm0, %v7918_v1 }
 0x12f   : > { %6716 = vmatpush3.bf16.msra.mxu1 %v7779_v37  ;;  %v4530_v37 = vshrl.u32 %v7821_v28, 16 }
 0x130   : > { %7080 = vmatpush3.bf16.msra.mxu0 %v7780_v39  ;;  %6717 = vmatprep.subr.bf16.mxu1 %v7918_v1  ;;  %v7813_v39 = vld [vmem:[%s9227_s3 + $0x2b0] sm:$0xff]  }
 0x131   : > { %7081 = vmatprep.subr.bf16.mxu0 %v7918_v1  ;;  %v4532_v48 = vrot.slane %v4530_v37, 1 }
 0x132   : > { %6706 = vmatmul.mubr.bf16.gmra.mrb[4].mxu1 %v1883_v42  ;;  %v2207_v42 = vrot.slane %v2205_v31, 3 }
 0x133   : > { %6718 = vmatpush3.bf16.msra.mxu1 %v7781_v41  ;;  %7070 = vmatmul.mubr.bf16.gmra.mrb[4].mxu0 %v4174_v44  ;;  %v2204_v41 = vrot.slane %v2202_v30, 2  ;;  %v2215_v44 = vrot.slane %v2213_v33, 3  ;;  %v7837_v30 = vld [vmem:[%s9227_s3 + $0x2f8] sm:$0xff]   ;;  %v7851_v33 = vld [vmem:[%s8070_s17 + $0x10] sm:$0x1f]  }
 0x134   : > { %7082 = vmatpush3.bf16.msra.mxu0 %v7782_v43  ;;  %6719 = vmatprep.subr.bf16.mxu1 %v7918_v1  ;;  %v2212_v43 = vrot.slane %v2210_v32, 2 }
 0x135   : > { %7083 = vmatprep.subr.bf16.mxu0 %v7918_v1  ;;  %6709 = vmatprep.mubr.msk.bf16.mxu1 %vm7919_vm0, %v7918_v1  ;;  %v2208_v52 = vor.u32 %v2207_v42, %v2204_v41  ;;  %v7844_v42 = vld [vmem:[%s9227_s3 + $0x640] sm:$0xff]  }
 0x136   : > { %7073 = vmatprep.mubr.msk.bf16.mxu0 %vm7919_vm0, %v7918_v1  ;;  %v2216_v53 = vor.u32 %v2215_v44, %v2212_v43  ;;  %v7852_v43 = vld [vmem:[%s8395_s12 + $0x14] sm:$0x1f]   ;;  %v7845_v44 = vld [vmem:[%s9227_s3 + $0x308] sm:$0xff]  }
 0x137   : > { %6720 = vmatpush3.bf16.msra.mxu1 %v7783_v45  ;;  %v7829_v45 = vld [vmem:[%s8070_s17 + $0x10] sm:$0x7f]  }
 0x138   : > { %7084 = vmatpush3.bf16.msra.mxu0 %v7784_v46  ;;  %6721 = vmatprep.subr.bf16.mxu1 %v7918_v1  ;;  %v4524_v46 = vrot.slane %v4522_v35, 1  ;;  %v2222_v55 = vshll.u32 %v7829_v45, 16  ;;  %v2217_v61 = vsel %vm596_vm2, %v2208_v52, %v2216_v53 }
 0x139   : > { %7085 = vmatprep.subr.bf16.mxu0 %v7918_v1 }
 0x13a   : > { %6710 = vmatmul.mubr.bf16.gmra.mrb[8].mxu1 %v1882_v38  ;;  %v4533_v38 = vshll.u32 %v7821_v28, 16  ;;  %v7842_v28 = vld [vmem:[%s8395_s12 + $0x4] sm:$0xfe]  }
 0x13b   : > { %6722 = vmatpush3.bf16.msra.mxu1 %v7786_v47  ;;  %7074 = vmatmul.mubr.bf16.gmra.mrb[8].mxu0 %v4173_v40  ;;  %v7814_v40 = vld [vmem:[%s9227_s3 + $0x5f0] sm:$0xff]   ;;  %v4527_v47 = vrot.slane %v4525_v36, 2  ;;  %v4707_v35 = vrot.slane %v7842_v28, 1 }
 0x13c   : > { %7086 = vmatpush3.bf16.msra.mxu0 %v7788_v49  ;;  %6723 = vmatprep.subr.bf16.mxu1 %v7918_v1  ;;  %v4535_v49 = vrot.slane %v4533_v38, 2  ;;  %v7841_v38 = vld [vmem:[%s9227_s3 + $0x300] sm:$0xff]  }
 0x13d   : > { %7087 = vmatprep.subr.bf16.mxu0 %v7918_v1  ;;  %6729 = vmatprep.mubr.msk.bf16.mxu1 %vm7919_vm0, %v7918_v1 }
 0x13e   : > { %7093 = vmatprep.mubr.msk.bf16.mxu0 %vm7919_vm0, %v7918_v1 }
 0x13f   : > { %6724 = vmatpush3.bf16.msra.mxu1 %v7789_v51  ;;  %v7815_v51 = vld [vmem:[%s9227_s3 + $0x2b8] sm:$0xff]  }
 0x140   : > { %7088 = vmatpush3.bf16.msra.mxu0 %v7790_v54  ;;  %6725 = vmatprep.subr.bf16.mxu1 %v7918_v1  ;;  %v2219_v54 = vshrl.u32 %v7829_v45, 16 }
 0x141   : > { %7089 = vmatprep.subr.bf16.mxu0 %v7918_v1 }
 0x142   : > { %v2221_v63 = vrot.slane %v2219_v54, 2  ;;  %v7849_v54 = vld [vmem:[%s9227_s3 + $0x318] sm:$0xff]  }
 0x143   : > { %6726 = vmatpush3.bf16.msra.mxu1 %v7791_v57  ;;  %v4528_v57 = vor.u32 %v4527_v47, %v4524_v46  ;;  %v7846_v47 = vld [vmem:[%s9227_s3 + $0x648] sm:$0xff]  }
 0x144   : > { %7090 = vmatpush3.bf16.msra.mxu0 %v7792_v58  ;;  %6727 = vmatprep.subr.bf16.mxu1 %v7918_v1  ;;  %v4536_v58 = vor.u32 %v4535_v49, %v4532_v48  ;;  %v4710_v48 = vrot.slane %v7852_v43, 1  ;;  %v7847_v49 = vld [vmem:[%s9227_s3 + $0x310] sm:$0xff]  }
 0x145   : > { %7091 = vmatprep.subr.bf16.mxu0 %v7918_v1 }
 0x147   : > { %6728 = vmatpush3.bf16.msra.mxu1 %v7793_v0  ;;  %v2224_v0 = vrot.slane %v2222_v55, 3  ;;  %v7850_v55 = vld [vmem:[%s9227_s3 + $0x658] sm:$0xff]  }
 0x148   : > { %7092 = vmatpush3.bf16.msra.mxu0 %v7794_v2  ;;  %6741 = vmatprep.subr.bf16.mxu1 %v7918_v1  ;;  %v4537_v2 = vsel %vm1320_vm3, %v4528_v57, %v4536_v58  ;;  %v7853_v57 = vld [vmem:[%s9227_s3 + $0x320] sm:$0xff]  }
 0x149   : > { %7105 = vmatprep.subr.bf16.mxu0 %v7918_v1 }
 0x14a   : > { %6730 = vmatmul.mubr.bf16.vlgmr.msra.gmra.mrb[0].mxu1 %v7795_v7  ;;  %v2225_v7 = vor.u32 %v2224_v0, %v2221_v63  ;;  %v4873_v63 = vshrl.u32 %v7863_v59, 16  ;;  %v4876_v0 = vshll.u32 %v7863_v59, 16 }
 0x14b   : > { %6742 = vmatpush3.bf16.msra.mxu1 %v7796_v8  ;;  %7094 = vmatmul.mubr.bf16.vlgmr.msra.gmra.mrb[0].mxu0 %v4351_v9  ;;  %v7824_v8 = vld [vmem:[%s9227_s3 + $0x608] sm:$0xff]   ;;  %v4545_v9 = vor.u32 %v4544_v5, %v4541_v4  ;;  %v7857_v4 = vld [vmem:[%s9227_s3 + $0x330] sm:$0xff]   ;;  %v7861_v5 = vld [vmem:[%s8070_s17 + $0x18] sm:$0xfe]  }
 0x14c   : > { %7106 = vmatpush3.bf16.msra.mxu0 %v7799_v10  ;;  %6743 = vmatprep.subr.bf16.mxu1 %v7918_v1  ;;  %v7825_v10 = vld [vmem:[%s9227_s3 + $0x2d0] sm:$0xff]   ;;  %v2226_v11 = vsel %vm596_vm2, %v2216_v53, %v2225_v7  ;;  %v2407_v53 = vshrl.u32 %v7851_v33, 16 }
 0x14d   : > { %7107 = vmatprep.subr.bf16.mxu0 %v7918_v1  ;;  %6733 = vmatprep.mubr.msk.bf16.mxu1 %vm7919_vm0, %v7918_v1 }
 0x14e   : > { %7097 = vmatprep.mubr.msk.bf16.mxu0 %vm7919_vm0, %v7918_v1 }
 0x14f   : > { %6744 = vmatpush3.bf16.msra.mxu1 %v7800_v13  ;;  %v4546_v13 = vsel %vm1320_vm3, %v4536_v58, %v4545_v9  ;;  %v7854_v58 = vld [vmem:[%s9227_s3 + $0x660] sm:$0xff]  }
 0x150   : > { %7108 = vmatpush3.bf16.msra.mxu0 %v7801_v14  ;;  %6745 = vmatprep.subr.bf16.mxu1 %v7918_v1  ;;  %v7827_v14 = vld [vmem:[%s9227_s3 + $0x2d8] sm:$0xff]  }
 0x151   : > { %7109 = vmatprep.subr.bf16.mxu0 %v7918_v1 }
 0x152   : > { %6734 = vmatmul.mubr.bf16.gmra.mrb[4].mxu1 %v7806_v16  ;;  %v7830_v16 = vld [vmem:[%s9227_s3 + $0x2e0] sm:$0xff]  }
 0x153   : > { %6746 = vmatpush3.bf16.msra.mxu1 %v7802_v17  ;;  %7098 = vmatmul.mubr.bf16.gmra.mrb[4].mxu0 %v4360_v19  ;;  %v7839_v17 = vld [vmem:[%s8070_s17] sm:$0xff]   ;;  %v7833_v19 = vld [vmem:[%s9227_s3 + $0x2e8] sm:$0xff]  }
 0x154   : > { %7110 = vmatpush3.bf16.msra.mxu0 %v7803_v18  ;;  %6747 = vmatprep.subr.bf16.mxu1 %v7918_v1  ;;  %v7832_v18 = vld [vmem:[%s9227_s3 + $0x620] sm:$0xff]   ;;  %v2388_v24 = vshrl.u32 %v7839_v17, 16 }
 0x155   : > { %7111 = vmatprep.subr.bf16.mxu0 %v7918_v1  ;;  %6737 = vmatprep.mubr.msk.bf16.mxu1 %vm7919_vm0, %v7918_v1 }
 0x156   : > { %7101 = vmatprep.mubr.msk.bf16.mxu0 %vm7919_vm0, %v7918_v1 }
 0x157   : > { %6748 = vmatpush3.bf16.msra.mxu1 %v7804_v20  ;;  %v7840_v20 = vld [vmem:[%s8070_s17 + $0x8] sm:$0xff]  }
 0x158   : > { %7112 = vmatpush3.bf16.msra.mxu0 %v7805_v21  ;;  %6749 = vmatprep.subr.bf16.mxu1 %v7918_v1  ;;  %v2390_v21 = vshll.u32 %v7839_v17, 16 }
 0x159   : > { %7113 = vmatprep.subr.bf16.mxu0 %v7918_v1 }
 0x15a   : > { %6738 = vmatmul.mubr.bf16.gmra.mrb[8].mxu1 %v7812_v22  ;;  %v7834_v22 = vld [vmem:[%s9227_s3 + $0x628] sm:$0xff]   ;;  %v2392_v25 = vrot.slane %v2390_v21, 1 }
 0x15b   : > { %6750 = vmatpush3.bf16.msra.mxu1 %v7807_v23  ;;  %7102 = vmatmul.mubr.bf16.gmra.mrb[8].mxu0 %v4359_v15  ;;  %v7828_v15 = vld [vmem:[%s9227_s3 + $0x618] sm:$0xff]   ;;  %v7835_v23 = vld [vmem:[%s9227_s3 + $0x2f0] sm:$0xff]  }
 0x15c   : > { %7114 = vmatpush3.bf16.msra.mxu0 %v7809_v26  ;;  %6751 = vmatprep.subr.bf16.mxu1 %v7918_v1  ;;  %v2395_v26 = vshll.u32 %v7840_v20, 16  ;;  %v2393_v31 = vor.u32 %v2392_v25, %v2388_v24 }
 0x15d   : > { %7115 = vmatprep.subr.bf16.mxu0 %v7918_v1  ;;  %6757 = vmatprep.mubr.msk.bf16.mxu1 %vm7919_vm0, %v7918_v1 }
 0x15e   : > { %7121 = vmatprep.mubr.msk.bf16.mxu0 %vm7919_vm0, %v7918_v1  ;;  %v2397_v32 = vrot.slane %v2395_v26, 1 }
 0x15f   : > { %6752 = vmatpush3.bf16.msra.mxu1 %v7810_v29  ;;  %v7843_v29 = vld [vmem:[%s8395_s12 + $0xc] sm:$0xff]  }
 0x160   : > { %7116 = vmatpush3.bf16.msra.mxu0 %v7811_v34  ;;  %6753 = vmatprep.subr.bf16.mxu1 %v7918_v1  ;;  %v7838_v34 = vld [vmem:[%s9227_s3 + $0x638] sm:$0xff]   ;;  %v4708_v36 = vrot.slane %v7843_v29, 1  ;;  %v2398_v37 = vsel %vm783_vm4, %v2393_v31, %v2397_v32  ;;  %v7869_v31 = vld [vmem:[%s9227_s3 + $0x690] sm:$0xff]  }
 0x161   : > { %7117 = vmatprep.subr.bf16.mxu0 %v7918_v1 }
 0x162   : > { %v4709_v41 = vsel %vm967_vm5, %v4707_v35, %v4708_v36  ;;  %v4711_v52 = vsel %vm967_vm5, %v4708_v36, %v4710_v48  ;;  %v7876_v35 = vld [vmem:[%s8395_s12 + $0xc] sm:$0xff]   ;;  %v7877_v36 = vld [vmem:[%s8395_s12 + $0x14] sm:$0x3f]  }
 0x163   : > { %6754 = vmatpush3.bf16.msra.mxu1 %v7813_v39  ;;  %v2399_v39 = vshrl.u32 %v7840_v20, 16 }
 0x164   : > { %7118 = vmatpush3.bf16.msra.mxu0 %v7814_v40  ;;  %6755 = vmatprep.subr.bf16.mxu1 %v7918_v1  ;;  %v2403_v40 = vshll.u32 %v7851_v33, 16  ;;  %v7870_v33 = vld [vmem:[%s9227_s3 + $0x698] sm:$0xff]  }
 0x165   : > { %7119 = vmatprep.subr.bf16.mxu0 %v7918_v1  ;;  %v2401_v45 = vor.u32 %v2399_v39, %v2397_v32  ;;  %v5067_v39 = vshrl.u32 %v7876_v35, 16 }
 0x166   : > { %v2405_v46 = vrot.slane %v2403_v40, 1  ;;  %v5070_v40 = vshll.u32 %v7876_v35, 16 }
 0x167   : > { %6756 = vmatpush3.bf16.msra.mxu1 %v7815_v51  ;;  %v7848_v51 = vld [vmem:[%s9227_s3 + $0x650] sm:$0xff]  }
 0x168   : > { %7120 = vmatpush3.bf16.msra.mxu0 %v7816_v56  ;;  %6769 = vmatprep.subr.bf16.mxu1 %v7918_v1  ;;  %v2406_v50 = vsel %vm783_vm4, %v2401_v45, %v2405_v46  ;;  %v2409_v56 = vor.u32 %v2407_v53, %v2405_v46  ;;  %v7873_v45 = vld [vmem:[%s9227_s3 + $0x6b0] sm:$0xff]   ;;  %v5069_v46 = vrot.slane %v5067_v39, 1 }
 0x169   : > { %7133 = vmatprep.subr.bf16.mxu0 %v7918_v1 }
 0x16a   : > { %6758 = vmatmul.mubr.bf16.vlgmr.msra.gmra.mrb[0].mxu1 %v2217_v61  ;;  %v7855_v61 = vld [vmem:[%s9227_s3 + $0x328] sm:$0xff]  }
 0x16b   : > { %6770 = vmatpush3.bf16.msra.mxu1 %v7819_v62  ;;  %7122 = vmatmul.mubr.bf16.vlgmr.msra.gmra.mrb[0].mxu0 %v4537_v2  ;;  %v7856_v62 = vld [vmem:[%s9227_s3 + $0x668] sm:$0xff]   ;;  %v4881_v2 = vshrl.u32 %v7864_v60, 16 }
 0x16c   : > { %7134 = vmatpush3.bf16.msra.mxu0 %v7822_v3  ;;  %6771 = vmatprep.subr.bf16.mxu1 %v7918_v1  ;;  %v4884_v3 = vshll.u32 %v7864_v60, 16 }
 0x16d   : > { %7135 = vmatprep.subr.bf16.mxu0 %v7918_v1  ;;  %6761 = vmatprep.mubr.msk.bf16.mxu1 %vm7919_vm0, %v7918_v1 }
 0x16e   : > { %7125 = vmatprep.mubr.msk.bf16.mxu0 %vm7919_vm0, %v7918_v1 }
 0x16f   : > { %6772 = vmatpush3.bf16.msra.mxu1 %v7823_v6  ;;  %v7862_v6 = vld [vmem:[%s8070_s17 + $0x20] sm:$0xff]  }
 0x170   : > { %7136 = vmatpush3.bf16.msra.mxu0 %v7824_v8  ;;  %6773 = vmatprep.subr.bf16.mxu1 %v7918_v1  ;;  %v4875_v8 = vrot.slane %v4873_v63, 3 }
 0x171   : > { %7137 = vmatprep.subr.bf16.mxu0 %v7918_v1 }
 0x172   : > { %6762 = vmatmul.mubr.bf16.gmra.mrb[4].mxu1 %v2226_v11  ;;  %v4886_v11 = vrot.slane %v4884_v3, 4 }
 0x173   : > { %6774 = vmatpush3.bf16.msra.mxu1 %v7825_v10  ;;  %7126 = vmatmul.mubr.bf16.gmra.mrb[4].mxu0 %v4546_v13  ;;  %v4883_v10 = vrot.slane %v4881_v2, 3  ;;  %v7859_v13 = vld [vmem:[%s9227_s3 + $0x338] sm:$0xff]  }
 0x174   : > { %7138 = vmatpush3.bf16.msra.mxu0 %v7826_v12  ;;  %6775 = vmatprep.subr.bf16.mxu1 %v7918_v1  ;;  %v7868_v12 = vld [vmem:[%s8395_s12 + $0x14] sm:$0xff]  }
 0x175   : > { %7139 = vmatprep.subr.bf16.mxu0 %v7918_v1  ;;  %6765 = vmatprep.mubr.msk.bf16.mxu1 %vm7919_vm0, %v7918_v1  ;;  %v4893_v20 = vshll.u32 %v7868_v12, 16 }
 0x176   : > { %7129 = vmatprep.mubr.msk.bf16.mxu0 %vm7919_vm0, %v7918_v1 }
 0x177   : > { %6776 = vmatpush3.bf16.msra.mxu1 %v7827_v14  ;;  %v2570_v14 = vrot.slane %v7861_v5, 1  ;;  %v4895_v26 = vrot.slane %v4893_v20, 4 }
 0x178   : > { %7140 = vmatpush3.bf16.msra.mxu0 %v7828_v15  ;;  %6777 = vmatprep.subr.bf16.mxu1 %v7918_v1  ;;  %v2571_v15 = vrot.slane %v7862_v6, 1 }
 0x179   : > { %7141 = vmatprep.subr.bf16.mxu0 %v7918_v1 }
 0x17a   : > { %6766 = vmatmul.mubr.bf16.gmra.mrb[8].mxu1 %v2225_v7  ;;  %v7858_v7 = vld [vmem:[%s9227_s3 + $0x670] sm:$0xff]   ;;  %v2572_v21 = vsel %vm967_vm5, %v2570_v14, %v2571_v15 }
 0x17b   : > { %6778 = vmatpush3.bf16.msra.mxu1 %v7830_v16  ;;  %7130 = vmatmul.mubr.bf16.gmra.mrb[8].mxu0 %v4545_v9  ;;  %v4878_v9 = vrot.slane %v4876_v0, 4  ;;  %v7860_v16 = vld [vmem:[%s9227_s3 + $0x678] sm:$0xff]  }
 0x17c   : > { %7142 = vmatpush3.bf16.msra.mxu0 %v7832_v18  ;;  %6779 = vmatprep.subr.bf16.mxu1 %v7918_v1  ;;  %v4887_v18 = vor.u32 %v4886_v11, %v4883_v10 }
 0x17d   : > { %7143 = vmatprep.subr.bf16.mxu0 %v7918_v1  ;;  %6785 = vmatprep.mubr.msk.bf16.mxu1 %vm7919_vm0, %v7918_v1  ;;  %v4879_v17 = vor.u32 %v4878_v9, %v4875_v8 }
 0x17e   : > { %7149 = vmatprep.mubr.msk.bf16.mxu0 %vm7919_vm0, %v7918_v1 }
 0x17f   : > { %6780 = vmatpush3.bf16.msra.mxu1 %v7833_v19  ;;  %v4890_v19 = vshrl.u32 %v7868_v12, 16  ;;  %v4888_v24 = vsel %vm1133_vm1, %v4879_v17, %v4887_v18  ;;  %v6139_v17 = vld [vmem:[%s9228_s4] ss:$0 sm:$0xff] }
 0x180   : > { %7144 = vmatpush3.bf16.msra.mxu0 %v7834_v22  ;;  %6781 = vmatprep.subr.bf16.mxu1 %v7918_v1  ;;  %v7865_v22 = vld [vmem:[%s9227_s3 + $0x680] sm:$0xff]  }
 0x181   : > { %7145 = vmatprep.subr.bf16.mxu0 %v7918_v1  ;;  %v4892_v25 = vrot.slane %v4890_v19, 3 }
 0x183   : > { %6782 = vmatpush3.bf16.msra.mxu1 %v7835_v23  ;;  %v7867_v23 = vld [vmem:[%s8070_s17 + $0x28] sm:$0x1f]   ;;  %v4896_v29 = vor.u32 %v4895_v26, %v4892_v25 }
 0x184   : > { %7146 = vmatpush3.bf16.msra.mxu0 %v7836_v27  ;;  %6783 = vmatprep.subr.bf16.mxu1 %v7918_v1  ;;  %v7866_v27 = vld [vmem:[%s9227_s3 + $0x688] sm:$0xff]   ;;  %v2573_v28 = vrot.slane %v7867_v23, 1  ;;  %v6140_v23 = vld [vmem:[%s9229_s5] ss:$0 sm:$0xff] }
 0x185   : > { %7147 = vmatprep.subr.bf16.mxu0 %v7918_v1  ;;  %v4897_v32 = vsel %vm1133_vm1, %v4887_v18, %v4896_v29 }
 0x187   : > { %6784 = vmatpush3.bf16.msra.mxu1 %v7837_v30  ;;  %v2574_v30 = vsel %vm967_vm5, %v2571_v15, %v2573_v28 }
 0x188   : > { %7148 = vmatpush3.bf16.msra.mxu0 %v7838_v34  ;;  %6797 = vmatprep.subr.bf16.mxu1 %v7918_v1  ;;  %v7871_v34 = vld [vmem:[%s9227_s3 + $0x6a0] sm:$0xff]  }
 0x189   : > { %7161 = vmatprep.subr.bf16.mxu0 %v7918_v1 }
 0x18a   : > { %6786 = vmatmul.mubr.bf16.vlgmr.msra.gmra.mrb[0].mxu1 %v2398_v37  ;;  %v7875_v37 = vld [vmem:[%s8395_s12 + $0x4] sm:$0xfe]  }
 0x18b   : > { %6798 = vmatpush3.bf16.msra.mxu1 %v7841_v38  ;;  %7150 = vmatmul.mubr.bf16.vlgmr.msra.gmra.mrb[0].mxu0 %v4709_v41  ;;  %v7872_v38 = vld [vmem:[%s9227_s3 + $0x6a8] sm:$0xff]   ;;  %v5076_v41 = vshrl.u32 %v7877_v36, 16  ;;  %v5059_v43 = vshrl.u32 %v7875_v37, 16 }
 0x18c   : > { %7162 = vmatpush3.bf16.msra.mxu0 %v7844_v42  ;;  %6799 = vmatprep.subr.bf16.mxu1 %v7918_v1  ;;  %v5079_v42 = vshll.u32 %v7877_v36, 16 }
 0x18d   : > { %7163 = vmatprep.subr.bf16.mxu0 %v7918_v1  ;;  %6789 = vmatprep.mubr.msk.bf16.mxu1 %vm7919_vm0, %v7918_v1 }
 0x18e   : > { %7153 = vmatprep.mubr.msk.bf16.mxu0 %vm7919_vm0, %v7918_v1 }
 0x18f   : > { %6800 = vmatpush3.bf16.msra.mxu1 %v7845_v44  ;;  %v5062_v44 = vshll.u32 %v7875_v37, 16 }
 0x190   : > { %7164 = vmatpush3.bf16.msra.mxu0 %v7846_v47  ;;  %6801 = vmatprep.subr.bf16.mxu1 %v7918_v1  ;;  %v5072_v47 = vrot.slane %v5070_v40, 2 }
 0x191   : > { %7165 = vmatprep.subr.bf16.mxu0 %v7918_v1 }
 0x192   : > { %6790 = vmatmul.mubr.bf16.gmra.mrb[4].mxu1 %v2406_v50  ;;  %v5061_v50 = vrot.slane %v5059_v43, 1  ;;  %v5073_v53 = vor.u32 %v5072_v47, %v5069_v46 }
 0x193   : > { %6802 = vmatpush3.bf16.msra.mxu1 %v7847_v49  ;;  %7154 = vmatmul.mubr.bf16.gmra.mrb[4].mxu0 %v4711_v52  ;;  %v5081_v49 = vrot.slane %v5079_v42, 2  ;;  %v7874_v52 = vld [vmem:[%s9227_s3 + $0x6b8] sm:$0xff]  }
 0x194   : > { %7166 = vmatpush3.bf16.msra.mxu0 %v7848_v51  ;;  %6803 = vmatprep.subr.bf16.mxu1 %v7918_v1  ;;  %v5064_v51 = vrot.slane %v5062_v44, 2 }
 0x195   : > { %7167 = vmatprep.subr.bf16.mxu0 %v7918_v1  ;;  %6793 = vmatprep.mubr.msk.bf16.mxu1 %vm7919_vm0, %v7918_v1 }
 0x196   : > { %7157 = vmatprep.mubr.msk.bf16.mxu0 %vm7919_vm0, %v7918_v1 }
 0x197   : > { %6804 = vmatpush3.bf16.msra.mxu1 %v7849_v54 }
 0x198   : > { %7168 = vmatpush3.bf16.msra.mxu0 %v7850_v55  ;;  %6805 = vmatprep.subr.bf16.mxu1 %v7918_v1  ;;  %v5065_v55 = vor.u32 %v5064_v51, %v5061_v50 }
 0x199   : > { %7169 = vmatprep.subr.bf16.mxu0 %v7918_v1 }
 0x19a   : > { %6794 = vmatmul.mubr.bf16.gmra.mrb[8].mxu1 %v2409_v56 }
 0x19b   : > { %6806 = vmatpush3.bf16.msra.mxu1 %v7853_v57  ;;  %7158 = vmatmul.mubr.bf16.gmra.mrb[8].mxu0 %v4710_v48  ;;  %v5078_v48 = vrot.slane %v5076_v41, 1  ;;  %v5074_v57 = vsel %vm1320_vm3, %v5065_v55, %v5073_v53 }
 0x19c   : > { %7170 = vmatpush3.bf16.msra.mxu0 %v7854_v58  ;;  %6807 = vmatprep.subr.bf16.mxu1 %v7918_v1 }
 0x19d   : > { %7171 = vmatprep.subr.bf16.mxu0 %v7918_v1  ;;  %6813 = vmatprep.mubr.msk.bf16.mxu1 %vm7919_vm0, %v7918_v1  ;;  %v5082_v54 = vor.u32 %v5081_v49, %v5078_v48 }
 0x19e   : > { %7177 = vmatprep.mubr.msk.bf16.mxu0 %vm7919_vm0, %v7918_v1 }
 0x19f   : > { %6808 = vmatpush3.bf16.msra.mxu1 %v7855_v61  ;;  %v5083_v56 = vsel %vm1320_vm3, %v5073_v53, %v5082_v54 }
 0x1a0   : > { %7172 = vmatpush3.bf16.msra.mxu0 %v7856_v62  ;;  %6809 = vmatprep.subr.bf16.mxu1 %v7918_v1 }
 0x1a1   : > { %7173 = vmatprep.subr.bf16.mxu0 %v7918_v1 }
 0x1a3   : > { %6810 = vmatpush3.bf16.msra.mxu1 %v7857_v4 }
 0x1a4   : > { %7174 = vmatpush3.bf16.msra.mxu0 %v7858_v7  ;;  %6811 = vmatprep.subr.bf16.mxu1 %v7918_v1 }
 0x1a5   : > { %7175 = vmatprep.subr.bf16.mxu0 %v7918_v1 }
 0x1a7   : > { %6812 = vmatpush3.bf16.msra.mxu1 %v7859_v13 }
 0x1a8   : > { %7176 = vmatpush3.bf16.msra.mxu0 %v7860_v16  ;;  %7217 = vmatprep.subr.bf16.mxu1 %v7918_v1 }
 0x1a9   : > { %7189 = vmatprep.subr.bf16.mxu0 %v7918_v1 }
 0x1aa   : > { %6814 = vmatmul.mubr.bf16.vlgmr.msra.gmra.mrb[0].mxu1 %v2572_v21 }
 0x1ab   : > { %7178 = vmatmul.mubr.bf16.vlgmr.msra.gmra.mrb[0].mxu0 %v4888_v24  ;;  %7225 = vmatpush3.bf16.msra.mxu1 %v7865_v22 }
 0x1ac   : > { %7190 = vmatpush3.bf16.msra.mxu0 %v7865_v22  ;;  %7218 = vmatprep.subr.bf16.mxu1 %v7918_v1 }
 0x1ad   : > { %7191 = vmatprep.subr.bf16.mxu0 %v7918_v1  ;;  %6817 = vmatprep.mubr.msk.bf16.mxu1 %vm7919_vm0, %v7918_v1 }
 0x1ae   : > { %7181 = vmatprep.mubr.msk.bf16.mxu0 %vm7919_vm0, %v7918_v1 }
 0x1af   : > { %7226 = vmatpush3.bf16.msra.mxu1 %v7866_v27 }
 0x1b0   : > { %7192 = vmatpush3.bf16.msra.mxu0 %v7866_v27  ;;  %7219 = vmatprep.subr.bf16.mxu1 %v7918_v1 }
 0x1b1   : > { %7193 = vmatprep.subr.bf16.mxu0 %v7918_v1 }
 0x1b2   : > { %6818 = vmatmul.mubr.bf16.gmra.mrb[4].mxu1 %v2574_v30 }
 0x1b3   : > { %7182 = vmatmul.mubr.bf16.gmra.mrb[4].mxu0 %v4897_v32  ;;  %7227 = vmatpush3.bf16.msra.mxu1 %v7869_v31 }
 0x1b4   : > { %7194 = vmatpush3.bf16.msra.mxu0 %v7869_v31  ;;  %7220 = vmatprep.subr.bf16.mxu1 %v7918_v1 }
 0x1b5   : > { %7195 = vmatprep.subr.bf16.mxu0 %v7918_v1  ;;  %6821 = vmatprep.mubr.msk.bf16.mxu1 %vm7919_vm0, %v7918_v1 }
 0x1b6   : > { %7185 = vmatprep.mubr.msk.bf16.mxu0 %vm7919_vm0, %v7918_v1 }
 0x1b7   : > { %7228 = vmatpush3.bf16.msra.mxu1 %v7870_v33 }
 0x1b8   : > { %7196 = vmatpush3.bf16.msra.mxu0 %v7870_v33  ;;  %7221 = vmatprep.subr.bf16.mxu1 %v7918_v1 }
 0x1b9   : > { %7197 = vmatprep.subr.bf16.mxu0 %v7918_v1 }
 0x1ba   : > { %6822 = vmatmul.mubr.bf16.gmra.mrb[8].mxu1 %v2573_v28 }
 0x1bb   : > { %7186 = vmatmul.mubr.bf16.gmra.mrb[8].mxu0 %v4896_v29  ;;  %7229 = vmatpush3.bf16.msra.mxu1 %v7871_v34 }
 0x1bc   : > { %7198 = vmatpush3.bf16.msra.mxu0 %v7871_v34  ;;  %7222 = vmatprep.subr.bf16.mxu1 %v7918_v1 }
 0x1bd   : > { %7199 = vmatprep.subr.bf16.mxu0 %v7918_v1  ;;  %7205 = vmatprep.mubr.msk.bf16.mxu0 %vm7919_vm0, %v7918_v1 }
 0x1be   : > { %7209 = vmatprep.mubr.msk.bf16.mxu1 %vm7919_vm0, %v7918_v1 }
 0x1bf   : > { %7230 = vmatpush3.bf16.msra.mxu1 %v7872_v38 }
 0x1c0   : > { %7200 = vmatpush3.bf16.msra.mxu0 %v7872_v38  ;;  %7223 = vmatprep.subr.bf16.mxu1 %v7918_v1 }
 0x1c1   : > { %7201 = vmatprep.subr.bf16.mxu0 %v7918_v1 }
 0x1c3   : > { %7231 = vmatpush3.bf16.msra.mxu1 %v7873_v45 }
 0x1c4   : > { %7202 = vmatpush3.bf16.msra.mxu0 %v7873_v45  ;;  %7224 = vmatprep.subr.bf16.mxu1 %v7918_v1 }
 0x1c5   : > { %7203 = vmatprep.subr.bf16.mxu0 %v7918_v1 }
 0x1c7   : > { %7232 = vmatpush3.bf16.msra.mxu1 %v7874_v52 }
 0x1c8   : > { %7204 = vmatpush3.bf16.msra.mxu0 %v7874_v52 }
 0x1ca   : > { %7210 = vmatmul.mubr.bf16.vlgmr.msra.gmra.mrb[12].mxu1 %v5083_v56 }
 0x1cb   : > { %7206 = vmatmul.mubr.bf16.vlgmr.msra.gmra.mrb[0].mxu0 %v5074_v57  ;;  %7213 = vmatprep.mubr.msk.bf16.mxu1 %vm7919_vm0, %v7918_v1 }
 0x1d2   : > { %7214 = vmatmul.mubr.bf16.gmra.mrb[16].mxu1 %v5082_v54 }
 0x27d   : > { %v2660_v58 = vpop.f32.mrb[0].mxu1 }
 0x27e   : > { %v6815_v59 = vpop.f32.mrb[1].mxu1 }
 0x27f   : > { %v2663_v60 = vpop.f32.mrb[2].mxu1 }
 0x280   : > { %v6816_v61 = vpop.f32.mrb[3].mxu1 }
 0x285   : > { %v2668_v62 = vpop.f32.mrb[4].mxu1 }
 0x286   : > { %v4991_v63 = vpop.f32.mrb[4].mxu0  ;;  %v6819_v0 = vpop.f32.mrb[5].mxu1 }
 0x287   : > { %v7235_v2 = vadd.f32 %v4991_v63, %v2668_v62  ;;  %v7183_v3 = vpop.f32.mrb[5].mxu0  ;;  %v2671_v4 = vpop.f32.mrb[6].mxu1 }
 0x288   : > { %v4994_v5 = vpop.f32.mrb[6].mxu0  ;;  %v6820_v6 = vpop.f32.mrb[7].mxu1 }
 0x289   : > { %v7237_v7 = vadd.f32 %v4994_v5, %v2671_v4  ;;  %v7184_v8 = vpop.f32.mrb[7].mxu0 }
 0x28d   : > { %v2676_v9 = vpop.f32.mrb[8].mxu1 }
 0x28e   : > { %v4999_v10 = vpop.f32.mrb[8].mxu0  ;;  %v6823_v1 = vpop.f32.mrb[9].mxu1 }
 0x28f   : > { %v7239_v11 = vadd.f32 %v4999_v10, %v2676_v9  ;;  %v7187_v12 = vpop.f32.mrb[9].mxu0  ;;  %v2679_v13 = vpop.f32.mrb[10].mxu1 }
 0x290   : > { %v5002_v14 = vpop.f32.mrb[10].mxu0  ;;  %v6824_v15 = vpop.f32.mrb[11].mxu1 }
 0x291   : > { %v7188_v16 = vpop.f32.mrb[11].mxu0 }
 0x29d   : > { %v5177_v18 = vpop.f32.mrb[12].mxu1 }
 0x29e   : > { %v5169_v19 = vpop.f32.mrb[0].mxu0  ;;  %v7236_v20 = vadd.f32 %v7235_v2, %v5177_v18  ;;  %v7211_v21 = vpop.f32.mrb[13].mxu1 }
 0x29f   : > { %v7233_v22 = vadd.f32 %v5169_v19, %v2660_v58  ;;  %v7207_v24 = vpop.f32.mrb[1].mxu0  ;;  %v5180_v25 = vpop.f32.mrb[14].mxu1 }
 0x2a0   : > { %v5215_v26 = vmul.f32 %v7236_v20, %v6139_v17  ;;  %v5172_v27 = vpop.f32.mrb[2].mxu0  ;;  %v7238_v28 = vadd.f32 %v7237_v7, %v5180_v25  ;;  %v7212_v29 = vpop.f32.mrb[15].mxu1 }
 0x2a1   : > { %v5213_v30 = vmul.f32 %v7233_v22, %v6139_v17  ;;  %v7234_v31 = vadd.f32 %v5172_v27, %v2663_v60  ;;  %v7208_v32 = vpop.f32.mrb[3].mxu0 }
 0x2a2   : > { %v5227_v33 = vadd.f32 %v6140_v23, %v5215_v26  ;;  %v5216_v34 = vmul.f32 %v7238_v28, %v6139_v17 }
 0x2a3   : > { %v5225_v35 = vadd.f32 %v6140_v23, %v5213_v30  ;;  %v5214_v36 = vmul.f32 %v7234_v31, %v6139_v17 }
 0x2a4   : > { %v5237_v37 = vmul.f32 0.01, %v5227_v33  ;;  %v5228_v38 = vadd.f32 %v6140_v23, %v5216_v34  ;;  %vm5232_vm6 = vcmp.gt.f32.partialorder %v5227_v33, 0.0 }
 0x2a5   : > { %v5235_v39 = vmul.f32 0.01, %v5225_v35  ;;  %v5226_v40 = vadd.f32 %v6140_v23, %v5214_v36  ;;  %v5185_v41 = vpop.f32.mrb[16].mxu1  ;;  %vm5230_vm7 = vcmp.gt.f32.partialorder %v5225_v35, 0.0 }
 0x2a6   : > { %vm5233_vm8 = vcmp.gt.f32.partialorder %v5228_v38, 0.0  ;;  %v5238_v42 = vmul.f32 0.01, %v5228_v38  ;;  %v7240_v43 = vadd.f32 %v7239_v11, %v5185_v41  ;;  %v7215_v44 = vpop.f32.mrb[17].mxu1  ;;  %v5242_v47 = vsel %vm5232_vm6, %v5227_v33, %v5237_v37 }
 0x2a7   : > { %vm5231_vm9 = vcmp.gt.f32.partialorder %v5226_v40, 0.0  ;;  %v5236_v45 = vmul.f32 0.01, %v5226_v40  ;;  %v5188_v46 = vpop.f32.mrb[18].mxu1  ;;  %v5240_v51 = vsel %vm5230_vm7, %v5225_v35, %v5235_v39 }
 0x2a8   : > { %v5243_v48 = vsel %vm5233_vm8, %v5228_v38, %v5238_v42  ;;  %v5217_v49 = vmul.f32 %v7240_v43, %v6139_v17  ;;  %v7216_v50 = vpop.f32.mrb[19].mxu1 }
 0x2a9   : > { %v5241_v52 = vsel %vm5231_vm9, %v5226_v40, %v5236_v45  ;;  %v6161_v53 = vpack.c.bf16 %v5243_v48, %v5242_v47 }
 0x2aa   : > { %v6156_v54 = vpack.c.bf16 %v5241_v52, %v5240_v51  ;;  %v5229_v55 = vadd.f32 %v6140_v23, %v5217_v49 }
 0x2ab   : > { %6163 = vst [vmem:[%s390_s30 + $0x8] sm:$0xff] %v6161_v53  }
 0x2ac   : > { %6157 = vst [vmem:[%s390_s30] sm:$0xff] %v6156_v54   ;;  %vm5234_vm10 = vcmp.gt.f32.partialorder %v5229_v55, 0.0  ;;  %v5239_v56 = vmul.f32 0.01, %v5229_v55 }
 0x2ae   : > { %v5244_v57 = vsel %vm5234_vm10, %v5229_v55, %v5239_v56 }
 0x2af   : > { %v6152_v58 = vpack.c.bf16 %v5244_v57, %v5244_v57 }
 0x2b1   : > { %5270 = vst [vmem:[%s390_s30 + $0x10] sm:$0xf] %v6152_v58 }
 0x2b2 PF: > { %s16_s25 = sadd.s32 1, %s7916_s25   ;;  %s9232_s21 = smov %s7908_s23 }
 0x2b3   : > { %p13_p10 = scmp.ge.s32.totalorder %s16_s25, 10   ;;  %s9233_s22 = smov %s7912_s24 }
 0x2b4   : > { %s9234_s23 = smov %s9237_s26  ;;  %s9235_s24 = smov %s9241_s27 }
 0x2b5   :  { %15 = sbr.rel (!%p13_p10) target bundleno = 3 (0x3), region = 106 }

</bundles_post_ra>
